<compile_context>
chip_gen: v5e
topology: v5e:2x2
jax: 0.10.0
libtpu: 0.0.40
codegen_flags: <defaults>
</compile_context>

<pallas_src>
import jax
import jax.numpy as jnp
from jax.experimental import pallas as pl
from jax.experimental.pallas import tpu as pltpu

CONTEXT_LEN = 8      # context_len
D_MODEL = 32         # d_model
H = 4                # number of heads
N_BLOCKS = 2         # N decoder blocks
D_HEAD = D_MODEL // H
EPS = 1e-5           # nn.LayerNorm default eps

# CONTEXT_LEN is a power of two -> batch id of a flattened row is row >> shift.
assert CONTEXT_LEN & (CONTEXT_LEN - 1) == 0
CTX_SHIFT = CONTEXT_LEN.bit_length() - 1

# ---- static row layout of the packed (N_BLOCKS, PACK_ROWS, 128) weight buffer
ROW_WQKV = 0                              # (D, 3D) padded to 128 lanes
ROW_WPROJ = ROW_WQKV + D_MODEL            # (D, D)  padded to 128 lanes
ROW_W1 = ROW_WPROJ + D_MODEL              # (D, 4D) == 128 lanes
ROW_W2 = ROW_W1 + D_MODEL                 # (4D, D) padded to 128 lanes
ROW_BQKV = ROW_W2 + 4 * D_MODEL           # bqkv (3D) padded
ROW_B1 = ROW_BQKV + 1                     # b1 (4D)
ROW_LN1G = ROW_B1 + 1
ROW_LN1B = ROW_LN1G + 1
ROW_LN2G = ROW_LN1B + 1
ROW_LN2B = ROW_LN2G + 1
ROW_BPROJ = ROW_LN2B + 1
ROW_B2 = ROW_BPROJ + 1
ROW_LNFG = ROW_B2 + 1                     # final LN (stored in block 0 only)
ROW_LNFB = ROW_LNFG + 1
PACK_ROWS = ((ROW_LNFB + 1 + 7) // 8) * 8  # pad row count to a multiple of 8
PACK_LANES = 128


def _layer_norm(x, g, b):
    mu = jnp.mean(x, axis=-1, keepdims=True)
    var = jnp.mean((x - mu) ** 2, axis=-1, keepdims=True)
    return (x - mu) * jax.lax.rsqrt(var + EPS) * g + b


def decoder_kernel(x_ref, w_ref, o_ref):
    x = x_ref[...]                         # (BT, D) -- whole batch, flattened
    bt = x.shape[0]

    # Block-diagonal causal additive bias, built ONCE as a 2-D (BT, BT) tensor.
    row = jax.lax.broadcasted_iota(jnp.int32, (bt, bt), 0)
    col = jax.lax.broadcasted_iota(jnp.int32, (bt, bt), 1)
    mask = (row >= col) & ((row >> CTX_SHIFT) == (col >> CTX_SHIFT))
    attn_bias = jnp.where(mask, 0.0, -1e30).astype(jnp.float32)   # (BT, BT)

    for i in range(N_BLOCKS):              # static unroll over decoder blocks
        # ---- multi-head self-attention sublayer ----
        ln1_g = w_ref[i, ROW_LN1G:ROW_LN1G + 1, 0:D_MODEL]
        ln1_b = w_ref[i, ROW_LN1B:ROW_LN1B + 1, 0:D_MODEL]
        xn = _layer_norm(x, ln1_g, ln1_b)

        # Fused Q/K/V projection: one lane-dense matmul per block.
        wqkv = w_ref[i, ROW_WQKV:ROW_WQKV + D_MODEL, :]          # (D, 128)
        bqkv = w_ref[i, ROW_BQKV:ROW_BQKV + 1, :]                # (1, 128)
        qkv = jnp.dot(xn, wqkv, preferred_element_type=jnp.float32) + bqkv

        # Split heads only for the score / PV einsums.
        q = qkv[:, 0:D_MODEL].reshape(bt, H, D_HEAD).transpose(1, 0, 2)
        k = qkv[:, D_MODEL:2 * D_MODEL].reshape(bt, H, D_HEAD).transpose(1, 0, 2)
        v = qkv[:, 2 * D_MODEL:3 * D_MODEL].reshape(bt, H, D_HEAD).transpose(1, 0, 2)

        # 1/sqrt(d_head) is already folded into the Q weights/bias host-side.
        s = jnp.einsum('hqd,hkd->hqk', q, k,
                       preferred_element_type=jnp.float32)       # (H, BT, BT)
        s = s + attn_bias[None]                                   # masked_fill
        s = s - jnp.max(s, axis=-1, keepdims=True)
        p = jnp.exp(s)
        p = p * pl.reciprocal(jnp.sum(p, axis=-1, keepdims=True), approx=True)
        # attn_dropout / proj dropout -> identity (eval mode)
        oh = jnp.einsum('hqk,hkd->hqd', p, v,
                        preferred_element_type=jnp.float32)       # (H, BT, Dh)

        # Re-assemble heads into a (BT, D) tile, then ONE projection matmul.
        oh_flat = oh.transpose(1, 0, 2).reshape(bt, D_MODEL)
        wproj = w_ref[i, ROW_WPROJ:ROW_WPROJ + D_MODEL, :]        # (D, 128)
        bproj = w_ref[i, ROW_BPROJ:ROW_BPROJ + 1, 0:D_MODEL]      # (1, D)
        proj = jnp.dot(oh_flat, wproj,
                       preferred_element_type=jnp.float32)[:, 0:D_MODEL]
        x = x + proj + bproj

        # ---- position-wise feed-forward sublayer ----
        ln2_g = w_ref[i, ROW_LN2G:ROW_LN2G + 1, 0:D_MODEL]
        ln2_b = w_ref[i, ROW_LN2B:ROW_LN2B + 1, 0:D_MODEL]
        xn2 = _layer_norm(x, ln2_g, ln2_b)

        w1 = w_ref[i, ROW_W1:ROW_W1 + D_MODEL, :]                 # (D, 4D)
        b1 = w_ref[i, ROW_B1:ROW_B1 + 1, :]                       # (1, 4D)
        hdn = jnp.dot(xn2, w1, preferred_element_type=jnp.float32) + b1
        hdn = jnp.maximum(hdn, 0.0)                               # ReLU

        w2 = w_ref[i, ROW_W2:ROW_W2 + 4 * D_MODEL, :]             # (4D, 128)
        b2 = w_ref[i, ROW_B2:ROW_B2 + 1, 0:D_MODEL]               # (1, D)
        ff = jnp.dot(hdn, w2, preferred_element_type=jnp.float32)[:, 0:D_MODEL]
        # ffn dropout -> identity
        x = x + ff + b2

    # ---- final LayerNorm ----
    lnf_g = w_ref[0, ROW_LNFG:ROW_LNFG + 1, 0:D_MODEL]
    lnf_b = w_ref[0, ROW_LNFB:ROW_LNFB + 1, 0:D_MODEL]
    o_ref[...] = _layer_norm(x, lnf_g, lnf_b)


def pack_params(params):
    """Host-side packing (run ONCE): transpose, pad to 128 lanes, fold the
    attention scale into Q, and lay everything out in one f32 buffer."""
    (ln1_g, ln1_b, wqkv, bqkv, wproj, bproj,
     ln2_g, ln2_b, w1, b1, w2, b2, lnf_g, lnf_b) = params
    scale = 1.0 / (D_HEAD ** 0.5)
    D = D_MODEL

    def padw(a):
        pad = PACK_LANES - a.shape[-1]
        return jnp.pad(a, [(0, 0)] * (a.ndim - 1) + [(0, pad)])

    wqkv_t = jnp.transpose(wqkv, (0, 2, 1))            # (N, D, 3D)
    wqkv_t = wqkv_t.at[:, :, 0:D].multiply(scale)      # fold scale into Q cols
    bqkv_s = bqkv.at[:, 0:D].multiply(scale)           # (N, 3D)
    wproj_t = jnp.transpose(wproj, (0, 2, 1))          # (N, D, D)
    w1_t = jnp.transpose(w1, (0, 2, 1))                # (N, D, 4D)
    w2_t = jnp.transpose(w2, (0, 2, 1))                # (N, 4D, D)

    wbuf = jnp.zeros((N_BLOCKS, PACK_ROWS, PACK_LANES), jnp.float32)
    wbuf = wbuf.at[:, ROW_WQKV:ROW_WQKV + D, :].set(padw(wqkv_t))
    wbuf = wbuf.at[:, ROW_WPROJ:ROW_WPROJ + D, :].set(padw(wproj_t))
    wbuf = wbuf.at[:, ROW_W1:ROW_W1 + D, :].set(w1_t)
    wbuf = wbuf.at[:, ROW_W2:ROW_W2 + 4 * D, :].set(padw(w2_t))
    wbuf = wbuf.at[:, ROW_BQKV, :].set(padw(bqkv_s))
    wbuf = wbuf.at[:, ROW_B1, :].set(b1)
    wbuf = wbuf.at[:, ROW_LN1G, 0:D].set(ln1_g)
    wbuf = wbuf.at[:, ROW_LN1B, 0:D].set(ln1_b)
    wbuf = wbuf.at[:, ROW_LN2G, 0:D].set(ln2_g)
    wbuf = wbuf.at[:, ROW_LN2B, 0:D].set(ln2_b)
    wbuf = wbuf.at[:, ROW_BPROJ, 0:D].set(bproj)
    wbuf = wbuf.at[:, ROW_B2, 0:D].set(b2)
    wbuf = wbuf.at[0, ROW_LNFG, 0:D].set(lnf_g[0])
    wbuf = wbuf.at[0, ROW_LNFB, 0:D].set(lnf_b[0])
    return wbuf


@jax.jit
def decoder_apply(x, wbuf):
    """x: (B, T, D) float32.  wbuf: packed parameters from pack_params."""
    B, T, D = x.shape
    assert T == CONTEXT_LEN and D == D_MODEL
    bt = B * T
    x2 = x.reshape(bt, D)                  # fold batch into the row dimension

    out = pl.pallas_call(
        decoder_kernel,
        out_shape=jax.ShapeDtypeStruct((bt, D), jnp.float32),
        grid_spec=pltpu.PrefetchScalarGridSpec(
            num_scalar_prefetch=0,
            grid=(1,),                     # single step: whole (tiny) batch
            in_specs=[pl.BlockSpec((bt, D), lambda _: (0, 0)),
                      pl.BlockSpec(wbuf.shape, lambda _: (0, 0, 0))],
            out_specs=pl.BlockSpec((bt, D), lambda _: (0, 0)),
        ),
        compiler_params=pltpu.CompilerParams(
            dimension_semantics=("arbitrary",)),
    )(x2, wbuf)
    return out.reshape(B, T, D)


def decoder_forward(x, params):
    """Convenience wrapper: packs (once per call) and applies the kernel."""
    return decoder_apply(x, pack_params(params))


def init_params(key):
    """Deterministic synthetic parameters (PyTorch nn.Linear convention)."""
    ks = jax.random.split(key, 16)
    s = 0.05
    ln1_g = 1.0 + s * jax.random.normal(ks[0], (N_BLOCKS, D_MODEL), jnp.float32)
    ln1_b = s * jax.random.normal(ks[1], (N_BLOCKS, D_MODEL), jnp.float32)
    wqkv = s * jax.random.normal(ks[2], (N_BLOCKS, 3 * D_MODEL, D_MODEL), jnp.float32)
    bqkv = s * jax.random.normal(ks[3], (N_BLOCKS, 3 * D_MODEL), jnp.float32)
    wproj = s * jax.random.normal(ks[4], (N_BLOCKS, D_MODEL, D_MODEL), jnp.float32)
    bproj = s * jax.random.normal(ks[5], (N_BLOCKS, D_MODEL), jnp.float32)
    ln2_g = 1.0 + s * jax.random.normal(ks[6], (N_BLOCKS, D_MODEL), jnp.float32)
    ln2_b = s * jax.random.normal(ks[7], (N_BLOCKS, D_MODEL), jnp.float32)
    w1 = s * jax.random.normal(ks[8], (N_BLOCKS, 4 * D_MODEL, D_MODEL), jnp.float32)
    b1 = s * jax.random.normal(ks[9], (N_BLOCKS, 4 * D_MODEL), jnp.float32)
    w2 = s * jax.random.normal(ks[10], (N_BLOCKS, D_MODEL, 4 * D_MODEL), jnp.float32)
    b2 = s * jax.random.normal(ks[11], (N_BLOCKS, D_MODEL), jnp.float32)
    lnf_g = 1.0 + s * jax.random.normal(ks[12], (1, D_MODEL), jnp.float32)
    lnf_b = s * jax.random.normal(ks[13], (1, D_MODEL), jnp.float32)
    return (ln1_g, ln1_b, wqkv, bqkv, wproj, bproj,
            ln2_g, ln2_b, w1, b1, w2, b2, lnf_g, lnf_b)


def decoder_reference(x, params):
    """Pure-JAX reference reproducing the PyTorch forward (eval mode)."""
    (ln1_g, ln1_b, wqkv, bqkv, wproj, bproj,
     ln2_g, ln2_b, w1, b1, w2, b2, lnf_g, lnf_b) = params
    B, T, D = x.shape
    mask = jnp.tril(jnp.ones((T, T), jnp.bool_))
    for i in range(N_BLOCKS):
        xn = _layer_norm(x, ln1_g[i], ln1_b[i])
        qkv = xn @ wqkv[i].T + bqkv[i]
        q, k, v = jnp.split(qkv, 3, axis=-1)
        q = q.reshape(B, T, H, D_HEAD).transpose(0, 2, 1, 3)
        k = k.reshape(B, T, H, D_HEAD).transpose(0, 2, 1, 3)
        v = v.reshape(B, T, H, D_HEAD).transpose(0, 2, 1, 3)
        att = jnp.einsum("bhqd,bhkd->bhqk", q, k) / jnp.sqrt(jnp.float32(D_HEAD))
        att = jnp.where(mask, att, -jnp.inf)
        att = jax.nn.softmax(att, axis=-1)
        out = jnp.einsum("bhqk,bhkd->bhqd", att, v)
        out = out.transpose(0, 2, 1, 3).reshape(B, T, D)
        x = x + (out @ wproj[i].T + bproj[i])
        xn2 = _layer_norm(x, ln2_g[i], ln2_b[i])
        x = x + (jnp.maximum(xn2 @ w1[i].T + b1[i], 0.0) @ w2[i].T + b2[i])
    return _layer_norm(x, lnf_g[0], lnf_b[0])


if __name__ == "__main__":
    key = jax.random.PRNGKey(0)
    k_x, k_p = jax.random.split(key)
    B = 2
    x = jax.random.normal(k_x, (B, CONTEXT_LEN, D_MODEL), jnp.float32)
    params = init_params(k_p)

    wbuf = pack_params(params)             # packing runs once, not per call
    out = decoder_apply(x, wbuf)
    out = jax.block_until_ready(out)

    ref = decoder_reference(x, params)
    assert out.shape == (B, CONTEXT_LEN, D_MODEL)
    # tolerance 1e-3: pl.reciprocal(approx=True) in the softmax denominator
    assert jnp.allclose(out, ref, rtol=1e-3, atol=1e-3), (
        float(jnp.max(jnp.abs(out - ref))))
    print("KERNEL_OK")
</pallas_src>

<mosaic_0001>
module attributes {stable_mosaic.version = 11 : i64} {
  func.func @decoder_kernel(%arg0: i32, %arg1: memref<16x32xf32, #tpu.memory_space<vmem>>, %arg2: memref<2x240x128xf32, #tpu.memory_space<vmem>>, %arg3: memref<16x32xf32, #tpu.memory_space<vmem>>) attributes {dimension_semantics = [#tpu.dimension_semantics<arbitrary>], iteration_bounds = array<i64: 1>, scalar_prefetch = 0 : i64, scratch_operands = 0 : i64, tpu.core_type = #tpu.core_type<tc>, window_params = [{pipeline_mode = #tpu.pipeline_mode<synchronous>, transform_indices = @transform_0, window_bounds = array<i64: 16, 32>}, {pipeline_mode = #tpu.pipeline_mode<synchronous>, transform_indices = @transform_1, window_bounds = array<i64: 2, 240, 128>}, {pipeline_mode = #tpu.pipeline_mode<synchronous>, transform_indices = @transform_2, window_bounds = array<i64: 16, 32>}]} {
    %c0 = arith.constant 0 : index
    %c0_0 = arith.constant 0 : index
    %0 = vector.load %arg1[%c0, %c0_0] : memref<16x32xf32, #tpu.memory_space<vmem>>, vector<16x32xf32>
    %1 = tpu.iota {dimensions = array<i32: 0>} : vector<16x16xi32>
    %2 = tpu.iota {dimensions = array<i32: 1>} : vector<16x16xi32>
    %3 = arith.cmpi sge, %1, %2 : vector<16x16xi32>
    %c3_i32 = arith.constant 3 : i32
    %4 = vector.broadcast %c3_i32 : i32 to vector<16x16xi32>
    %5 = arith.shrsi %1, %4 : vector<16x16xi32>
    %c3_i32_1 = arith.constant 3 : i32
    %6 = vector.broadcast %c3_i32_1 : i32 to vector<16x16xi32>
    %7 = arith.shrsi %2, %6 : vector<16x16xi32>
    %8 = arith.cmpi eq, %5, %7 : vector<16x16xi32>
    %9 = arith.andi %3, %8 : vector<16x16xi1>
    %cst = arith.constant 0.000000e+00 : f32
    %cst_2 = arith.constant -1.000000e+30 : f32
    %10 = vector.broadcast %cst : f32 to vector<16x16xf32>
    %11 = vector.broadcast %cst_2 : f32 to vector<16x16xf32>
    %12 = arith.select %9, %10, %11 : vector<16x16xi1>, vector<16x16xf32>
    %c0_3 = arith.constant 0 : index
    %c226 = arith.constant 226 : index
    %c0_4 = arith.constant 0 : index
    %13 = vector.load %arg2[%c0_3, %c226, %c0_4] : memref<2x240x128xf32, #tpu.memory_space<vmem>>, vector<1x1x32xf32>
    %14 = vector.shape_cast %13 : vector<1x1x32xf32> to vector<1x32xf32>
    %c0_5 = arith.constant 0 : index
    %c227 = arith.constant 227 : index
    %c0_6 = arith.constant 0 : index
    %15 = vector.load %arg2[%c0_5, %c227, %c0_6] : memref<2x240x128xf32, #tpu.memory_space<vmem>>, vector<1x1x32xf32>
    %16 = vector.shape_cast %15 : vector<1x1x32xf32> to vector<1x32xf32>
    %cst_7 = arith.constant dense<0.000000e+00> : vector<16xf32>
    %17 = vector.multi_reduction <add>, %0, %cst_7 [1] : vector<16x32xf32> to vector<16xf32>
    %18 = vector.shape_cast %17 : vector<16xf32> to vector<16x1xf32>
    %cst_8 = arith.constant 3.200000e+01 : f32
    %19 = vector.broadcast %cst_8 : f32 to vector<16x1xf32>
    %20 = arith.divf %18, %19 : vector<16x1xf32>
    %21 = vector.broadcast %20 : vector<16x1xf32> to vector<16x32xf32>
    %22 = arith.subf %0, %21 : vector<16x32xf32>
    %23 = arith.mulf %22, %22 : vector<16x32xf32>
    %cst_9 = arith.constant dense<0.000000e+00> : vector<16xf32>
    %24 = vector.multi_reduction <add>, %23, %cst_9 [1] : vector<16x32xf32> to vector<16xf32>
    %25 = vector.shape_cast %24 : vector<16xf32> to vector<16x1xf32>
    %cst_10 = arith.constant 3.200000e+01 : f32
    %26 = vector.broadcast %cst_10 : f32 to vector<16x1xf32>
    %27 = arith.divf %25, %26 : vector<16x1xf32>
    %28 = vector.broadcast %20 : vector<16x1xf32> to vector<16x32xf32>
    %29 = arith.subf %0, %28 : vector<16x32xf32>
    %cst_11 = arith.constant 9.99999974E-6 : f32
    %30 = vector.broadcast %cst_11 : f32 to vector<16x1xf32>
    %31 = arith.addf %27, %30 : vector<16x1xf32>
    %32 = math.rsqrt %31 : vector<16x1xf32>
    %33 = vector.broadcast %32 : vector<16x1xf32> to vector<16x32xf32>
    %34 = arith.mulf %29, %33 : vector<16x32xf32>
    %35 = vector.broadcast %14 : vector<1x32xf32> to vector<16x32xf32>
    %36 = arith.mulf %34, %35 : vector<16x32xf32>
    %37 = vector.broadcast %16 : vector<1x32xf32> to vector<16x32xf32>
    %38 = arith.addf %36, %37 : vector<16x32xf32>
    %c0_12 = arith.constant 0 : index
    %c0_13 = arith.constant 0 : index
    %c0_14 = arith.constant 0 : index
    %39 = vector.load %arg2[%c0_12, %c0_13, %c0_14] : memref<2x240x128xf32, #tpu.memory_space<vmem>>, vector<1x32x128xf32>
    %40 = vector.shape_cast %39 : vector<1x32x128xf32> to vector<32x128xf32>
    %c0_15 = arith.constant 0 : index
    %c224 = arith.constant 224 : index
    %c0_16 = arith.constant 0 : index
    %41 = vector.load %arg2[%c0_15, %c224, %c0_16] : memref<2x240x128xf32, #tpu.memory_space<vmem>>, vector<1x1x128xf32>
    %42 = vector.shape_cast %41 : vector<1x1x128xf32> to vector<1x128xf32>
    %cst_17 = arith.constant dense<0.000000e+00> : vector<16x128xf32>
    %43 = tpu.matmul %38, %40, %cst_17 {dimension_numbers = #tpu.dot_dimension_numbers<[1], [0], [0], [1], [0, 0, 1, 1], [], []>} : vector<16x32xf32>, vector<32x128xf32>, vector<16x128xf32> -> vector<16x128xf32>
    %44 = vector.broadcast %42 : vector<1x128xf32> to vector<16x128xf32>
    %45 = arith.addf %43, %44 : vector<16x128xf32>
    %46 = vector.extract_strided_slice %45 {offsets = [0, 0], sizes = [16, 32], strides = [1, 1]} : vector<16x128xf32> to vector<16x32xf32>
    %47 = vector.shape_cast %46 : vector<16x32xf32> to vector<16x4x8xf32>
    %48 = tpu.transpose %47, [1, 0, 2] : vector<16x4x8xf32> -> vector<4x16x8xf32>
    %49 = vector.extract_strided_slice %45 {offsets = [0, 32], sizes = [16, 32], strides = [1, 1]} : vector<16x128xf32> to vector<16x32xf32>
    %50 = vector.shape_cast %49 : vector<16x32xf32> to vector<16x4x8xf32>
    %51 = tpu.transpose %50, [1, 0, 2] : vector<16x4x8xf32> -> vector<4x16x8xf32>
    %52 = vector.extract_strided_slice %45 {offsets = [0, 64], sizes = [16, 32], strides = [1, 1]} : vector<16x128xf32> to vector<16x32xf32>
    %53 = vector.shape_cast %52 : vector<16x32xf32> to vector<16x4x8xf32>
    %54 = tpu.transpose %53, [1, 0, 2] : vector<16x4x8xf32> -> vector<4x16x8xf32>
    "tpu.trace_start"() <{level = 10 : i32, message = "hqd,hkd->hqk"}> : () -> ()
    %cst_18 = arith.constant dense<0.000000e+00> : vector<4x16x16xf32>
    %55 = tpu.matmul %48, %51, %cst_18 {dimension_numbers = #tpu.dot_dimension_numbers<[2], [2], [1], [1], [0, 0, 0, 1, 1, 1], [0], [0]>} : vector<4x16x8xf32>, vector<4x16x8xf32>, vector<4x16x16xf32> -> vector<4x16x16xf32>
    "tpu.trace_stop"() : () -> ()
    %56 = vector.shape_cast %12 : vector<16x16xf32> to vector<1x16x16xf32>
    %57 = vector.broadcast %56 : vector<1x16x16xf32> to vector<4x16x16xf32>
    %58 = arith.addf %55, %57 : vector<4x16x16xf32>
    %cst_19 = arith.constant dense<0xFF800000> : vector<4x16xf32>
    %59 = vector.multi_reduction <maximumf>, %58, %cst_19 [2] : vector<4x16x16xf32> to vector<4x16xf32>
    %60 = vector.shape_cast %59 : vector<4x16xf32> to vector<4x16x1xf32>
    %61 = vector.broadcast %60 : vector<4x16x1xf32> to vector<4x16x16xf32>
    %62 = arith.subf %58, %61 : vector<4x16x16xf32>
    %63 = math.exp %62 : vector<4x16x16xf32>
    %cst_20 = arith.constant dense<0.000000e+00> : vector<4x16xf32>
    %64 = vector.multi_reduction <add>, %63, %cst_20 [2] : vector<4x16x16xf32> to vector<4x16xf32>
    %65 = vector.shape_cast %64 : vector<4x16xf32> to vector<4x16x1xf32>
    %66 = tpu.reciprocal %65 {approx = true} : vector<4x16x1xf32> -> vector<4x16x1xf32>
    %67 = vector.broadcast %66 : vector<4x16x1xf32> to vector<4x16x16xf32>
    %68 = arith.mulf %63, %67 : vector<4x16x16xf32>
    "tpu.trace_start"() <{level = 10 : i32, message = "hqk,hkd->hqd"}> : () -> ()
    %cst_21 = arith.constant dense<0.000000e+00> : vector<4x16x8xf32>
    %69 = tpu.matmul %68, %54, %cst_21 {dimension_numbers = #tpu.dot_dimension_numbers<[2], [1], [1], [2], [0, 0, 0, 1, 1, 2], [0], [0]>} : vector<4x16x16xf32>, vector<4x16x8xf32>, vector<4x16x8xf32> -> vector<4x16x8xf32>
    "tpu.trace_stop"() : () -> ()
    %70 = tpu.transpose %69, [1, 0, 2] : vector<4x16x8xf32> -> vector<16x4x8xf32>
    %71 = vector.shape_cast %70 : vector<16x4x8xf32> to vector<16x32xf32>
    %c0_22 = arith.constant 0 : index
    %c32 = arith.constant 32 : index
    %c0_23 = arith.constant 0 : index
    %72 = vector.load %arg2[%c0_22, %c32, %c0_23] : memref<2x240x128xf32, #tpu.memory_space<vmem>>, vector<1x32x128xf32>
    %73 = vector.shape_cast %72 : vector<1x32x128xf32> to vector<32x128xf32>
    %c0_24 = arith.constant 0 : index
    %c230 = arith.constant 230 : index
    %c0_25 = arith.constant 0 : index
    %74 = vector.load %arg2[%c0_24, %c230, %c0_25] : memref<2x240x128xf32, #tpu.memory_space<vmem>>, vector<1x1x32xf32>
    %75 = vector.shape_cast %74 : vector<1x1x32xf32> to vector<1x32xf32>
    %cst_26 = arith.constant dense<0.000000e+00> : vector<16x128xf32>
    %76 = tpu.matmul %71, %73, %cst_26 {dimension_numbers = #tpu.dot_dimension_numbers<[1], [0], [0], [1], [0, 0, 1, 1], [], []>} : vector<16x32xf32>, vector<32x128xf32>, vector<16x128xf32> -> vector<16x128xf32>
    %77 = vector.extract_strided_slice %76 {offsets = [0, 0], sizes = [16, 32], strides = [1, 1]} : vector<16x128xf32> to vector<16x32xf32>
    %78 = arith.addf %0, %77 : vector<16x32xf32>
    %79 = vector.broadcast %75 : vector<1x32xf32> to vector<16x32xf32>
    %80 = arith.addf %78, %79 : vector<16x32xf32>
    %c0_27 = arith.constant 0 : index
    %c228 = arith.constant 228 : index
    %c0_28 = arith.constant 0 : index
    %81 = vector.load %arg2[%c0_27, %c228, %c0_28] : memref<2x240x128xf32, #tpu.memory_space<vmem>>, vector<1x1x32xf32>
    %82 = vector.shape_cast %81 : vector<1x1x32xf32> to vector<1x32xf32>
    %c0_29 = arith.constant 0 : index
    %c229 = arith.constant 229 : index
    %c0_30 = arith.constant 0 : index
    %83 = vector.load %arg2[%c0_29, %c229, %c0_30] : memref<2x240x128xf32, #tpu.memory_space<vmem>>, vector<1x1x32xf32>
    %84 = vector.shape_cast %83 : vector<1x1x32xf32> to vector<1x32xf32>
    %cst_31 = arith.constant dense<0.000000e+00> : vector<16xf32>
    %85 = vector.multi_reduction <add>, %80, %cst_31 [1] : vector<16x32xf32> to vector<16xf32>
    %86 = vector.shape_cast %85 : vector<16xf32> to vector<16x1xf32>
    %cst_32 = arith.constant 3.200000e+01 : f32
    %87 = vector.broadcast %cst_32 : f32 to vector<16x1xf32>
    %88 = arith.divf %86, %87 : vector<16x1xf32>
    %89 = vector.broadcast %88 : vector<16x1xf32> to vector<16x32xf32>
    %90 = arith.subf %80, %89 : vector<16x32xf32>
    %91 = arith.mulf %90, %90 : vector<16x32xf32>
    %cst_33 = arith.constant dense<0.000000e+00> : vector<16xf32>
    %92 = vector.multi_reduction <add>, %91, %cst_33 [1] : vector<16x32xf32> to vector<16xf32>
    %93 = vector.shape_cast %92 : vector<16xf32> to vector<16x1xf32>
    %cst_34 = arith.constant 3.200000e+01 : f32
    %94 = vector.broadcast %cst_34 : f32 to vector<16x1xf32>
    %95 = arith.divf %93, %94 : vector<16x1xf32>
    %96 = vector.broadcast %88 : vector<16x1xf32> to vector<16x32xf32>
    %97 = arith.subf %80, %96 : vector<16x32xf32>
    %cst_35 = arith.constant 9.99999974E-6 : f32
    %98 = vector.broadcast %cst_35 : f32 to vector<16x1xf32>
    %99 = arith.addf %95, %98 : vector<16x1xf32>
    %100 = math.rsqrt %99 : vector<16x1xf32>
    %101 = vector.broadcast %100 : vector<16x1xf32> to vector<16x32xf32>
    %102 = arith.mulf %97, %101 : vector<16x32xf32>
    %103 = vector.broadcast %82 : vector<1x32xf32> to vector<16x32xf32>
    %104 = arith.mulf %102, %103 : vector<16x32xf32>
    %105 = vector.broadcast %84 : vector<1x32xf32> to vector<16x32xf32>
    %106 = arith.addf %104, %105 : vector<16x32xf32>
    %c0_36 = arith.constant 0 : index
    %c64 = arith.constant 64 : index
    %c0_37 = arith.constant 0 : index
    %107 = vector.load %arg2[%c0_36, %c64, %c0_37] : memref<2x240x128xf32, #tpu.memory_space<vmem>>, vector<1x32x128xf32>
    %108 = vector.shape_cast %107 : vector<1x32x128xf32> to vector<32x128xf32>
    %c0_38 = arith.constant 0 : index
    %c225 = arith.constant 225 : index
    %c0_39 = arith.constant 0 : index
    %109 = vector.load %arg2[%c0_38, %c225, %c0_39] : memref<2x240x128xf32, #tpu.memory_space<vmem>>, vector<1x1x128xf32>
    %110 = vector.shape_cast %109 : vector<1x1x128xf32> to vector<1x128xf32>
    %cst_40 = arith.constant dense<0.000000e+00> : vector<16x128xf32>
    %111 = tpu.matmul %106, %108, %cst_40 {dimension_numbers = #tpu.dot_dimension_numbers<[1], [0], [0], [1], [0, 0, 1, 1], [], []>} : vector<16x32xf32>, vector<32x128xf32>, vector<16x128xf32> -> vector<16x128xf32>
    %112 = vector.broadcast %110 : vector<1x128xf32> to vector<16x128xf32>
    %113 = arith.addf %111, %112 : vector<16x128xf32>
    %cst_41 = arith.constant 0.000000e+00 : f32
    %114 = vector.broadcast %cst_41 : f32 to vector<16x128xf32>
    %115 = arith.maximumf %113, %114 : vector<16x128xf32>
    %c0_42 = arith.constant 0 : index
    %c96 = arith.constant 96 : index
    %c0_43 = arith.constant 0 : index
    %116 = vector.load %arg2[%c0_42, %c96, %c0_43] : memref<2x240x128xf32, #tpu.memory_space<vmem>>, vector<1x128x128xf32>
    %117 = vector.shape_cast %116 : vector<1x128x128xf32> to vector<128x128xf32>
    %c0_44 = arith.constant 0 : index
    %c231 = arith.constant 231 : index
    %c0_45 = arith.constant 0 : index
    %118 = vector.load %arg2[%c0_44, %c231, %c0_45] : memref<2x240x128xf32, #tpu.memory_space<vmem>>, vector<1x1x32xf32>
    %119 = vector.shape_cast %118 : vector<1x1x32xf32> to vector<1x32xf32>
    %cst_46 = arith.constant dense<0.000000e+00> : vector<16x128xf32>
    %120 = tpu.matmul %115, %117, %cst_46 {dimension_numbers = #tpu.dot_dimension_numbers<[1], [0], [0], [1], [0, 0, 1, 1], [], []>} : vector<16x128xf32>, vector<128x128xf32>, vector<16x128xf32> -> vector<16x128xf32>
    %121 = vector.extract_strided_slice %120 {offsets = [0, 0], sizes = [16, 32], strides = [1, 1]} : vector<16x128xf32> to vector<16x32xf32>
    %122 = arith.addf %80, %121 : vector<16x32xf32>
    %123 = vector.broadcast %119 : vector<1x32xf32> to vector<16x32xf32>
    %124 = arith.addf %122, %123 : vector<16x32xf32>
    %c1 = arith.constant 1 : index
    %c226_47 = arith.constant 226 : index
    %c0_48 = arith.constant 0 : index
    %125 = vector.load %arg2[%c1, %c226_47, %c0_48] : memref<2x240x128xf32, #tpu.memory_space<vmem>>, vector<1x1x32xf32>
    %126 = vector.shape_cast %125 : vector<1x1x32xf32> to vector<1x32xf32>
    %c1_49 = arith.constant 1 : index
    %c227_50 = arith.constant 227 : index
    %c0_51 = arith.constant 0 : index
    %127 = vector.load %arg2[%c1_49, %c227_50, %c0_51] : memref<2x240x128xf32, #tpu.memory_space<vmem>>, vector<1x1x32xf32>
    %128 = vector.shape_cast %127 : vector<1x1x32xf32> to vector<1x32xf32>
    %cst_52 = arith.constant dense<0.000000e+00> : vector<16xf32>
    %129 = vector.multi_reduction <add>, %124, %cst_52 [1] : vector<16x32xf32> to vector<16xf32>
    %130 = vector.shape_cast %129 : vector<16xf32> to vector<16x1xf32>
    %cst_53 = arith.constant 3.200000e+01 : f32
    %131 = vector.broadcast %cst_53 : f32 to vector<16x1xf32>
    %132 = arith.divf %130, %131 : vector<16x1xf32>
    %133 = vector.broadcast %132 : vector<16x1xf32> to vector<16x32xf32>
    %134 = arith.subf %124, %133 : vector<16x32xf32>
    %135 = arith.mulf %134, %134 : vector<16x32xf32>
    %cst_54 = arith.constant dense<0.000000e+00> : vector<16xf32>
    %136 = vector.multi_reduction <add>, %135, %cst_54 [1] : vector<16x32xf32> to vector<16xf32>
    %137 = vector.shape_cast %136 : vector<16xf32> to vector<16x1xf32>
    %cst_55 = arith.constant 3.200000e+01 : f32
    %138 = vector.broadcast %cst_55 : f32 to vector<16x1xf32>
    %139 = arith.divf %137, %138 : vector<16x1xf32>
    %140 = vector.broadcast %132 : vector<16x1xf32> to vector<16x32xf32>
    %141 = arith.subf %124, %140 : vector<16x32xf32>
    %cst_56 = arith.constant 9.99999974E-6 : f32
    %142 = vector.broadcast %cst_56 : f32 to vector<16x1xf32>
    %143 = arith.addf %139, %142 : vector<16x1xf32>
    %144 = math.rsqrt %143 : vector<16x1xf32>
    %145 = vector.broadcast %144 : vector<16x1xf32> to vector<16x32xf32>
    %146 = arith.mulf %141, %145 : vector<16x32xf32>
    %147 = vector.broadcast %126 : vector<1x32xf32> to vector<16x32xf32>
    %148 = arith.mulf %146, %147 : vector<16x32xf32>
    %149 = vector.broadcast %128 : vector<1x32xf32> to vector<16x32xf32>
    %150 = arith.addf %148, %149 : vector<16x32xf32>
    %c1_57 = arith.constant 1 : index
    %c0_58 = arith.constant 0 : index
    %c0_59 = arith.constant 0 : index
    %151 = vector.load %arg2[%c1_57, %c0_58, %c0_59] : memref<2x240x128xf32, #tpu.memory_space<vmem>>, vector<1x32x128xf32>
    %152 = vector.shape_cast %151 : vector<1x32x128xf32> to vector<32x128xf32>
    %c1_60 = arith.constant 1 : index
    %c224_61 = arith.constant 224 : index
    %c0_62 = arith.constant 0 : index
    %153 = vector.load %arg2[%c1_60, %c224_61, %c0_62] : memref<2x240x128xf32, #tpu.memory_space<vmem>>, vector<1x1x128xf32>
    %154 = vector.shape_cast %153 : vector<1x1x128xf32> to vector<1x128xf32>
    %cst_63 = arith.constant dense<0.000000e+00> : vector<16x128xf32>
    %155 = tpu.matmul %150, %152, %cst_63 {dimension_numbers = #tpu.dot_dimension_numbers<[1], [0], [0], [1], [0, 0, 1, 1], [], []>} : vector<16x32xf32>, vector<32x128xf32>, vector<16x128xf32> -> vector<16x128xf32>
    %156 = vector.broadcast %154 : vector<1x128xf32> to vector<16x128xf32>
    %157 = arith.addf %155, %156 : vector<16x128xf32>
    %158 = vector.extract_strided_slice %157 {offsets = [0, 0], sizes = [16, 32], strides = [1, 1]} : vector<16x128xf32> to vector<16x32xf32>
    %159 = vector.shape_cast %158 : vector<16x32xf32> to vector<16x4x8xf32>
    %160 = tpu.transpose %159, [1, 0, 2] : vector<16x4x8xf32> -> vector<4x16x8xf32>
    %161 = vector.extract_strided_slice %157 {offsets = [0, 32], sizes = [16, 32], strides = [1, 1]} : vector<16x128xf32> to vector<16x32xf32>
    %162 = vector.shape_cast %161 : vector<16x32xf32> to vector<16x4x8xf32>
    %163 = tpu.transpose %162, [1, 0, 2] : vector<16x4x8xf32> -> vector<4x16x8xf32>
    %164 = vector.extract_strided_slice %157 {offsets = [0, 64], sizes = [16, 32], strides = [1, 1]} : vector<16x128xf32> to vector<16x32xf32>
    %165 = vector.shape_cast %164 : vector<16x32xf32> to vector<16x4x8xf32>
    %166 = tpu.transpose %165, [1, 0, 2] : vector<16x4x8xf32> -> vector<4x16x8xf32>
    "tpu.trace_start"() <{level = 10 : i32, message = "hqd,hkd->hqk"}> : () -> ()
    %cst_64 = arith.constant dense<0.000000e+00> : vector<4x16x16xf32>
    %167 = tpu.matmul %160, %163, %cst_64 {dimension_numbers = #tpu.dot_dimension_numbers<[2], [2], [1], [1], [0, 0, 0, 1, 1, 1], [0], [0]>} : vector<4x16x8xf32>, vector<4x16x8xf32>, vector<4x16x16xf32> -> vector<4x16x16xf32>
    "tpu.trace_stop"() : () -> ()
    %168 = vector.shape_cast %12 : vector<16x16xf32> to vector<1x16x16xf32>
    %169 = vector.broadcast %168 : vector<1x16x16xf32> to vector<4x16x16xf32>
    %170 = arith.addf %167, %169 : vector<4x16x16xf32>
    %cst_65 = arith.constant dense<0xFF800000> : vector<4x16xf32>
    %171 = vector.multi_reduction <maximumf>, %170, %cst_65 [2] : vector<4x16x16xf32> to vector<4x16xf32>
    %172 = vector.shape_cast %171 : vector<4x16xf32> to vector<4x16x1xf32>
    %173 = vector.broadcast %172 : vector<4x16x1xf32> to vector<4x16x16xf32>
    %174 = arith.subf %170, %173 : vector<4x16x16xf32>
    %175 = math.exp %174 : vector<4x16x16xf32>
    %cst_66 = arith.constant dense<0.000000e+00> : vector<4x16xf32>
    %176 = vector.multi_reduction <add>, %175, %cst_66 [2] : vector<4x16x16xf32> to vector<4x16xf32>
    %177 = vector.shape_cast %176 : vector<4x16xf32> to vector<4x16x1xf32>
    %178 = tpu.reciprocal %177 {approx = true} : vector<4x16x1xf32> -> vector<4x16x1xf32>
    %179 = vector.broadcast %178 : vector<4x16x1xf32> to vector<4x16x16xf32>
    %180 = arith.mulf %175, %179 : vector<4x16x16xf32>
    "tpu.trace_start"() <{level = 10 : i32, message = "hqk,hkd->hqd"}> : () -> ()
    %cst_67 = arith.constant dense<0.000000e+00> : vector<4x16x8xf32>
    %181 = tpu.matmul %180, %166, %cst_67 {dimension_numbers = #tpu.dot_dimension_numbers<[2], [1], [1], [2], [0, 0, 0, 1, 1, 2], [0], [0]>} : vector<4x16x16xf32>, vector<4x16x8xf32>, vector<4x16x8xf32> -> vector<4x16x8xf32>
    "tpu.trace_stop"() : () -> ()
    %182 = tpu.transpose %181, [1, 0, 2] : vector<4x16x8xf32> -> vector<16x4x8xf32>
    %183 = vector.shape_cast %182 : vector<16x4x8xf32> to vector<16x32xf32>
    %c1_68 = arith.constant 1 : index
    %c32_69 = arith.constant 32 : index
    %c0_70 = arith.constant 0 : index
    %184 = vector.load %arg2[%c1_68, %c32_69, %c0_70] : memref<2x240x128xf32, #tpu.memory_space<vmem>>, vector<1x32x128xf32>
    %185 = vector.shape_cast %184 : vector<1x32x128xf32> to vector<32x128xf32>
    %c1_71 = arith.constant 1 : index
    %c230_72 = arith.constant 230 : index
    %c0_73 = arith.constant 0 : index
    %186 = vector.load %arg2[%c1_71, %c230_72, %c0_73] : memref<2x240x128xf32, #tpu.memory_space<vmem>>, vector<1x1x32xf32>
    %187 = vector.shape_cast %186 : vector<1x1x32xf32> to vector<1x32xf32>
    %cst_74 = arith.constant dense<0.000000e+00> : vector<16x128xf32>
    %188 = tpu.matmul %183, %185, %cst_74 {dimension_numbers = #tpu.dot_dimension_numbers<[1], [0], [0], [1], [0, 0, 1, 1], [], []>} : vector<16x32xf32>, vector<32x128xf32>, vector<16x128xf32> -> vector<16x128xf32>
    %189 = vector.extract_strided_slice %188 {offsets = [0, 0], sizes = [16, 32], strides = [1, 1]} : vector<16x128xf32> to vector<16x32xf32>
    %190 = arith.addf %124, %189 : vector<16x32xf32>
    %191 = vector.broadcast %187 : vector<1x32xf32> to vector<16x32xf32>
    %192 = arith.addf %190, %191 : vector<16x32xf32>
    %c1_75 = arith.constant 1 : index
    %c228_76 = arith.constant 228 : index
    %c0_77 = arith.constant 0 : index
    %193 = vector.load %arg2[%c1_75, %c228_76, %c0_77] : memref<2x240x128xf32, #tpu.memory_space<vmem>>, vector<1x1x32xf32>
    %194 = vector.shape_cast %193 : vector<1x1x32xf32> to vector<1x32xf32>
    %c1_78 = arith.constant 1 : index
    %c229_79 = arith.constant 229 : index
    %c0_80 = arith.constant 0 : index
    %195 = vector.load %arg2[%c1_78, %c229_79, %c0_80] : memref<2x240x128xf32, #tpu.memory_space<vmem>>, vector<1x1x32xf32>
    %196 = vector.shape_cast %195 : vector<1x1x32xf32> to vector<1x32xf32>
    %cst_81 = arith.constant dense<0.000000e+00> : vector<16xf32>
    %197 = vector.multi_reduction <add>, %192, %cst_81 [1] : vector<16x32xf32> to vector<16xf32>
    %198 = vector.shape_cast %197 : vector<16xf32> to vector<16x1xf32>
    %cst_82 = arith.constant 3.200000e+01 : f32
    %199 = vector.broadcast %cst_82 : f32 to vector<16x1xf32>
    %200 = arith.divf %198, %199 : vector<16x1xf32>
    %201 = vector.broadcast %200 : vector<16x1xf32> to vector<16x32xf32>
    %202 = arith.subf %192, %201 : vector<16x32xf32>
    %203 = arith.mulf %202, %202 : vector<16x32xf32>
    %cst_83 = arith.constant dense<0.000000e+00> : vector<16xf32>
    %204 = vector.multi_reduction <add>, %203, %cst_83 [1] : vector<16x32xf32> to vector<16xf32>
    %205 = vector.shape_cast %204 : vector<16xf32> to vector<16x1xf32>
    %cst_84 = arith.constant 3.200000e+01 : f32
    %206 = vector.broadcast %cst_84 : f32 to vector<16x1xf32>
    %207 = arith.divf %205, %206 : vector<16x1xf32>
    %208 = vector.broadcast %200 : vector<16x1xf32> to vector<16x32xf32>
    %209 = arith.subf %192, %208 : vector<16x32xf32>
    %cst_85 = arith.constant 9.99999974E-6 : f32
    %210 = vector.broadcast %cst_85 : f32 to vector<16x1xf32>
    %211 = arith.addf %207, %210 : vector<16x1xf32>
    %212 = math.rsqrt %211 : vector<16x1xf32>
    %213 = vector.broadcast %212 : vector<16x1xf32> to vector<16x32xf32>
    %214 = arith.mulf %209, %213 : vector<16x32xf32>
    %215 = vector.broadcast %194 : vector<1x32xf32> to vector<16x32xf32>
    %216 = arith.mulf %214, %215 : vector<16x32xf32>
    %217 = vector.broadcast %196 : vector<1x32xf32> to vector<16x32xf32>
    %218 = arith.addf %216, %217 : vector<16x32xf32>
    %c1_86 = arith.constant 1 : index
    %c64_87 = arith.constant 64 : index
    %c0_88 = arith.constant 0 : index
    %219 = vector.load %arg2[%c1_86, %c64_87, %c0_88] : memref<2x240x128xf32, #tpu.memory_space<vmem>>, vector<1x32x128xf32>
    %220 = vector.shape_cast %219 : vector<1x32x128xf32> to vector<32x128xf32>
    %c1_89 = arith.constant 1 : index
    %c225_90 = arith.constant 225 : index
    %c0_91 = arith.constant 0 : index
    %221 = vector.load %arg2[%c1_89, %c225_90, %c0_91] : memref<2x240x128xf32, #tpu.memory_space<vmem>>, vector<1x1x128xf32>
    %222 = vector.shape_cast %221 : vector<1x1x128xf32> to vector<1x128xf32>
    %cst_92 = arith.constant dense<0.000000e+00> : vector<16x128xf32>
    %223 = tpu.matmul %218, %220, %cst_92 {dimension_numbers = #tpu.dot_dimension_numbers<[1], [0], [0], [1], [0, 0, 1, 1], [], []>} : vector<16x32xf32>, vector<32x128xf32>, vector<16x128xf32> -> vector<16x128xf32>
    %224 = vector.broadcast %222 : vector<1x128xf32> to vector<16x128xf32>
    %225 = arith.addf %223, %224 : vector<16x128xf32>
    %cst_93 = arith.constant 0.000000e+00 : f32
    %226 = vector.broadcast %cst_93 : f32 to vector<16x128xf32>
    %227 = arith.maximumf %225, %226 : vector<16x128xf32>
    %c1_94 = arith.constant 1 : index
    %c96_95 = arith.constant 96 : index
    %c0_96 = arith.constant 0 : index
    %228 = vector.load %arg2[%c1_94, %c96_95, %c0_96] : memref<2x240x128xf32, #tpu.memory_space<vmem>>, vector<1x128x128xf32>
    %229 = vector.shape_cast %228 : vector<1x128x128xf32> to vector<128x128xf32>
    %c1_97 = arith.constant 1 : index
    %c231_98 = arith.constant 231 : index
    %c0_99 = arith.constant 0 : index
    %230 = vector.load %arg2[%c1_97, %c231_98, %c0_99] : memref<2x240x128xf32, #tpu.memory_space<vmem>>, vector<1x1x32xf32>
    %231 = vector.shape_cast %230 : vector<1x1x32xf32> to vector<1x32xf32>
    %cst_100 = arith.constant dense<0.000000e+00> : vector<16x128xf32>
    %232 = tpu.matmul %227, %229, %cst_100 {dimension_numbers = #tpu.dot_dimension_numbers<[1], [0], [0], [1], [0, 0, 1, 1], [], []>} : vector<16x128xf32>, vector<128x128xf32>, vector<16x128xf32> -> vector<16x128xf32>
    %233 = vector.extract_strided_slice %232 {offsets = [0, 0], sizes = [16, 32], strides = [1, 1]} : vector<16x128xf32> to vector<16x32xf32>
    %234 = arith.addf %192, %233 : vector<16x32xf32>
    %235 = vector.broadcast %231 : vector<1x32xf32> to vector<16x32xf32>
    %236 = arith.addf %234, %235 : vector<16x32xf32>
    %c0_101 = arith.constant 0 : index
    %c232 = arith.constant 232 : index
    %c0_102 = arith.constant 0 : index
    %237 = vector.load %arg2[%c0_101, %c232, %c0_102] : memref<2x240x128xf32, #tpu.memory_space<vmem>>, vector<1x1x32xf32>
    %238 = vector.shape_cast %237 : vector<1x1x32xf32> to vector<1x32xf32>
    %c0_103 = arith.constant 0 : index
    %c233 = arith.constant 233 : index
    %c0_104 = arith.constant 0 : index
    %239 = vector.load %arg2[%c0_103, %c233, %c0_104] : memref<2x240x128xf32, #tpu.memory_space<vmem>>, vector<1x1x32xf32>
    %240 = vector.shape_cast %239 : vector<1x1x32xf32> to vector<1x32xf32>
    %cst_105 = arith.constant dense<0.000000e+00> : vector<16xf32>
    %241 = vector.multi_reduction <add>, %236, %cst_105 [1] : vector<16x32xf32> to vector<16xf32>
    %242 = vector.shape_cast %241 : vector<16xf32> to vector<16x1xf32>
    %cst_106 = arith.constant 3.200000e+01 : f32
    %243 = vector.broadcast %cst_106 : f32 to vector<16x1xf32>
    %244 = arith.divf %242, %243 : vector<16x1xf32>
    %245 = vector.broadcast %244 : vector<16x1xf32> to vector<16x32xf32>
    %246 = arith.subf %236, %245 : vector<16x32xf32>
    %247 = arith.mulf %246, %246 : vector<16x32xf32>
    %cst_107 = arith.constant dense<0.000000e+00> : vector<16xf32>
    %248 = vector.multi_reduction <add>, %247, %cst_107 [1] : vector<16x32xf32> to vector<16xf32>
    %249 = vector.shape_cast %248 : vector<16xf32> to vector<16x1xf32>
    %cst_108 = arith.constant 3.200000e+01 : f32
    %250 = vector.broadcast %cst_108 : f32 to vector<16x1xf32>
    %251 = arith.divf %249, %250 : vector<16x1xf32>
    %252 = vector.broadcast %244 : vector<16x1xf32> to vector<16x32xf32>
    %253 = arith.subf %236, %252 : vector<16x32xf32>
    %cst_109 = arith.constant 9.99999974E-6 : f32
    %254 = vector.broadcast %cst_109 : f32 to vector<16x1xf32>
    %255 = arith.addf %251, %254 : vector<16x1xf32>
    %256 = math.rsqrt %255 : vector<16x1xf32>
    %257 = vector.broadcast %256 : vector<16x1xf32> to vector<16x32xf32>
    %258 = arith.mulf %253, %257 : vector<16x32xf32>
    %259 = vector.broadcast %238 : vector<1x32xf32> to vector<16x32xf32>
    %260 = arith.mulf %258, %259 : vector<16x32xf32>
    %261 = vector.broadcast %240 : vector<1x32xf32> to vector<16x32xf32>
    %262 = arith.addf %260, %261 : vector<16x32xf32>
    %c0_110 = arith.constant 0 : index
    %c0_111 = arith.constant 0 : index
    %263 = vector.load %arg3[%c0_110, %c0_111] : memref<16x32xf32, #tpu.memory_space<vmem>>, vector<16x32xf32>
    tpu.vector_store %arg3[%c0_110, %c0_111], %262 {strides = array<i32>} : memref<16x32xf32, #tpu.memory_space<vmem>>, vector<16x32xf32>,
    return
  }
  func.func @transform_0(%arg0: i32) -> (i32, i32) {
    %c0_i32 = arith.constant 0 : i32
    %c0_i32_0 = arith.constant 0 : i32
    %c0_i32_1 = arith.constant 0 : i32
    return %c0_i32, %c0_i32_0 : i32, i32
  }
  func.func @transform_1(%arg0: i32) -> (i32, i32, i32) {
    %c0_i32 = arith.constant 0 : i32
    %c0_i32_0 = arith.constant 0 : i32
    %c0_i32_1 = arith.constant 0 : i32
    %c0_i32_2 = arith.constant 0 : i32
    return %c0_i32, %c0_i32_0, %c0_i32_1 : i32, i32, i32
  }
  func.func @transform_2(%arg0: i32) -> (i32, i32) {
    %c0_i32 = arith.constant 0 : i32
    %c0_i32_0 = arith.constant 0 : i32
    %c0_i32_1 = arith.constant 0 : i32
    return %c0_i32, %c0_i32_0 : i32, i32
  }
}

</mosaic_0001>

<bundles_post_ra>
// kernel: decoder_apply.1
= control target key start
LH: loop header
LB: loop body
LE: loop exit
PB: predicated region body
PF: predicated region fallthrough
CT: control target
= control target key end

     0   :  { %7 = vsyncpa [#allocation3], 0  ;;  %s4827_s0 = inlined_call_operand.hbm [shape: f32[16,32], index: 0, kind: input, shape index: {}]   ;;  %s4828_s1 = inlined_call_operand.hbm [shape: f32[2,240,128], index: 1, kind: input, shape index: {}]   ;;  %s4829_s2 = inlined_call_operand.hbm [shape: f32[16,32], index: 2, kind: output, shape index: {}]  }
   0x1   :  { %8 = vsyncpa [#allocation6], 0 }
   0x2   :  { %9 = vsyncpa [#allocation4], 0  ;;  %s14_s11 = sshll.u32 %s4827_s0, 4  ;;  %s3619_s12 = smov [#allocation2]   ;;  %s15_s11 = int_to_ptr.hbm [resolvable:$true] %s14_s11 }
   0x3   :  { %s16_s13 = sshll.u32 %s3619_s12, 4  ;;  %s27_s16 = sshll.u32 %s4828_s1, 4  ;;  %s17_s13 = int_to_ptr.vmem [resolvable:$true] %s16_s13  ;;  %s28_s16 = int_to_ptr.hbm [resolvable:$true] %s27_s16 }
   0x4   :  { %s3620_s17 = smov 128   ;;  %s3621_s18 = smov 8  }
   0x5   :  { %22 = dma.hbm_to_vmem [thread:$0]  %s15_s11, 256, %s17_s13, [#allocation3], %s3620_s17, %s3620_s17, %s3621_s18  }
   0x6   :  { %s3622_s19 = smov [#allocation5]  }
   0x7   :  { %s29_s20 = sshll.u32 %s3622_s19, 4  ;;  %s30_s20 = int_to_ptr.vmem [resolvable:$true] %s29_s20 }
   0x8   :  { %35 = dma.hbm_to_vmem [thread:$0]  %s28_s16, 7680, %s30_s20, [#allocation6], %s3620_s17, %s3620_s17, %s3621_s18  }
   0x9   :  { %3613 = dma.done.wait [#allocation3], 256  }
   0xa   :  { %3614 = vsyncadd [#allocation3], 4294967040 }
   0xb   :  { %3615 = dma.done.wait [#allocation6], 7680  }
   0xc   :  { %3616 = vsyncadd [#allocation6], 4294959616  ;;  %vm64_vm0 = vcmask 261120   ;;  %v45_v0 = vld [vmem:[#allocation2 + $0x8] sm:$0xff]  ;;  %v44_v2 = vld [vmem:[#allocation2] sm:$0xff]  ;;  %v3623_v4 = vmov 32.0  }
   0xd   :  { %v68_v1 = vsel %vm64_vm0, %v45_v0, 0.0  ;;  %v65_v3 = vsel %vm64_vm0, %v44_v2, 0.0  ;;  %3453 = vrcp.f32 %v3623_v4  ;;  %v125_v21 = vld [vmem:[#allocation5 + $0x18] sm:$0xff]  ;;  %v124_v22 = vld [vmem:[#allocation5 + $0x10] sm:$0xff]  ;;  %v123_v23 = vld [vmem:[#allocation5 + $0x8] sm:$0xff]  ;;  %s3624_s0 = smov 112  }
   0xe   :  { %69 = vadd.xlane.f32.xlu0 %v68_v1  ;;  %3373 = vmatpush.msra.mxu3 %v125_v21  ;;  %v122_v24 = vld [vmem:[#allocation5] sm:$0xff]  ;;  %s3625_s1 = smov 120   ;;  %s3626_s21 = smov 104   ;;  %v3628_v62 = vmov 1983009808   ;;  %vm178_vm8 = vcmask 1047556  }
   0xf   :  { %146 = vmatpush.msra.mxu1 %v125_v21  ;;  %v3435_v39 = vld [vmem:[#allocation5 + $0xe2] ss:$0 sm:$0xff]  ;;  %v3436_v43 = vld [vmem:[#allocation5 + $0xe3] ss:$0 sm:$0xff]  ;;  %v3437_v53 = vld [vmem:[#allocation5 + $0xe0] ss:$0 sm:$0xff]  ;;  %v183_v63 = vunpack.c.l.s4 %v3628_v62 }
  0x10   :  { %3374 = vmatpush.msra.mxu3 %v124_v22  ;;  %s3627_s22 = smov 96   ;;  %s3630_s23 = smov 64   ;;  %vm886_vm9 = vcmask 64512   ;;  %vm1027_vm13 = vcmask 130048  }
  0x11   :  { %147 = vmatpush.msra.mxu1 %v124_v22  ;;  %s3632_s24 = smov 16   ;;  %s3633_s25 = smov 24  }
  0x12   :  { %3375 = vmatpush.msra.mxu3 %v123_v23  ;;  %s3634_s26 = smov [#allocation7]   ;;  %s3299_s30 = sshll.u32 %s4829_s2, 4  ;;  %s3300_s30 = int_to_ptr.hbm [resolvable:$true] %s3299_s30 }
  0x13   :  { %v3454_v5 = vpop.eup %3453  ;;  %148 = vmatpush.msra.mxu1 %v123_v23  ;;  %s3297_s27 = sshll.u32 %s3634_s26, 4  ;;  %s3298_s27 = int_to_ptr.vmem [resolvable:$true] %s3297_s27 }
  0x14   :  { %v72_v6 = vmul.f32 32.0, %v3454_v5  ;;  %vm76_vm1 = vweird.f32 %v3454_v5  ;;  %3376 = vmatpush.msra.mxu3 %v122_v24 }
  0x15   :  { %149 = vmatpush.msra.mxu1 %v122_v24 }
  0x16   :  { %66 = vadd.xlane.f32.xlu0 %v65_v3  ;;  %v73_v7 = vsub.f32 1.0, %v72_v6  ;;  %v3710_v3 = vunpack.c.0.s8 %v183_v63 }
  0x18   :  { %v74_v8 = vmul.f32 %v3454_v5, %v73_v7 }
  0x1a   :  { %v75_v9 = vadd.f32 %v3454_v5, %v74_v8 }
  0x1c   :  { %v3664_v10 = vsel %vm76_vm1, %v3454_v5, %v75_v9  ;;  %v3629_v5 = vmov 1934713408  }
  0x1d   :  { %v207_v6 = vunpack.c.l.s4 %v3629_v5 }
  0x81   :  { %v70_v11 = vpop.xlane.xlu0 %69 }
  0x82   :  { %v79_v12 = vmul.f32 %v3664_v10, %v70_v11 }
  0x84   :  { %v81_v13 = vsub.f32 %v45_v0, %v79_v12 }
  0x86   :  { %v83_v14 = vmul.f32 %v81_v13, %v81_v13 }
  0x88   :  { %v87_v15 = vsel %vm64_vm0, %v83_v14, 0.0  ;;  %v3724_v14 = vunpack.c.0.s8 %v207_v6 }
  0x89   :  { %88 = vadd.xlane.f32.xlu1 %v87_v15  ;;  %v67_v16 = vpop.xlane.xlu0 %66 }
  0x8a   :  { %v78_v17 = vmul.f32 %v3664_v10, %v67_v16 }
  0x8c   :  { %v80_v18 = vsub.f32 %v44_v2, %v78_v17 }
  0x8e   :  { %v82_v19 = vmul.f32 %v80_v18, %v80_v18 }
  0x90   :  { %v84_v20 = vsel %vm64_vm0, %v82_v19, 0.0 }
  0x91   :  { %85 = vadd.xlane.f32.xlu1 %v84_v20 }
  0xfc   :  { %v89_v25 = vpop.xlane.xlu1 %88 }
  0xfd   :  { %v91_v26 = vmul.f32 %v89_v25, %v3664_v10 }
  0xff   :  { %v93_v27 = vadd.f32 1e-05, %v91_v26 }
 0x101   :  { %3455 = vrsqrt.f32 %v93_v27  ;;  %vm110_vm3 = vweird.f32 %v93_v27 }
 0x104   :  { %v86_v28 = vpop.xlane.xlu1 %85 }
 0x105   :  { %v90_v29 = vmul.f32 %v86_v28, %v3664_v10 }
 0x107   :  { %v3456_v30 = vpop.eup %3455  ;;  %v92_v31 = vadd.f32 1e-05, %v90_v29 }
 0x108   :  { %v105_v32 = vmul.f32 %v3456_v30, %v93_v27  ;;  %vm111_vm2 = vweird.f32 %v3456_v30 }
 0x109   :  { %3457 = vrsqrt.f32 %v92_v31  ;;  %vm112_vm4 = vmor %vm110_vm3, %vm111_vm2  ;;  %vm100_vm6 = vweird.f32 %v92_v31  ;;  %vm1480_vm2 = vcmask 195584  }
 0x10a   :  { %v106_v33 = vmul.f32 %v3456_v30, %v105_v32 }
 0x10c   :  { %v107_v34 = vmul.f32 0.5, %v106_v33 }
 0x10e   :  { %v108_v35 = vsub.f32 1.5, %v107_v34 }
 0x10f   :  { %v3458_v36 = vpop.eup %3457 }
 0x110   :  { %v109_v37 = vmul.f32 %v3456_v30, %v108_v35  ;;  %v95_v38 = vmul.f32 %v3458_v36, %v92_v31  ;;  %vm101_vm5 = vweird.f32 %v3458_v36 }
 0x111   :  { %vm102_vm7 = vmor %vm100_vm6, %vm101_vm5 }
 0x112   :  { %v113_v40 = vsel %vm112_vm4, %v3456_v30, %v109_v37  ;;  %v96_v41 = vmul.f32 %v3458_v36, %v95_v38 }
 0x113   :  { %v115_v42 = vmul.f32 %v113_v40, %v81_v13 }
 0x114   :  { %v97_v44 = vmul.f32 0.5, %v96_v41 }
 0x115   :  { %v118_v45 = vmul.f32 %v3435_v39, %v115_v42 }
 0x116   :  { %v98_v46 = vsub.f32 1.5, %v97_v44 }
 0x117   :  { %v121_v47 = vadd.f32 %v3436_v43, %v118_v45 }
 0x118   :  { %v99_v48 = vmul.f32 %v3458_v36, %v98_v46 }
 0x119   :  { %3314 = vmatmul.msk.f32.vlgmr.msra.gmra.mxu3 %vm64_vm0, %v121_v47 }
 0x11a   :  { %v103_v49 = vsel %vm102_vm7, %v3458_v36, %v99_v48 }
 0x11b   :  { %v114_v50 = vmul.f32 %v103_v49, %v80_v18 }
 0x11d   :  { %v117_v51 = vmul.f32 %v3435_v39, %v114_v50 }
 0x11f   :  { %v120_v52 = vadd.f32 %v3436_v43, %v117_v51 }
 0x121   :  { %3313 = vmatmul.msk.f32.vlgmr.msra.gmra.mxu1 %vm64_vm0, %v120_v52 }
 0x19c   :  { %v154_v54 = vpop.f32.mrf.mxu3 }
 0x19d   :  { %v3674_v55 = vadd.f32 %v3437_v53, %v154_v54 }
 0x19e   :  { %v151_v56 = vpop.f32.mrf.mxu1 }
 0x19f   :  { %v3676_v57 = vadd.f32 %v3437_v53, %v151_v56  ;;  %167 = vrot.lane.b32.xlu2 %v3674_v55, %s3624_s0  ;;  %161 = vrot.lane.b32.xlu0 %v3674_v55, %s3625_s1  ;;  %v236_v2 = vrot.slane %v3674_v55, 4 }
 0x1a1   :  { %165 = vrot.lane.b32.xlu1 %v3676_v57, %s3624_s0  ;;  %v3395_v43 = vpack.i.bf16 %v3676_v57, %v3674_v55 }
 0x1a7   :  { %173 = vrot.lane.b32.xlu2 %v3674_v55, %s3626_s21  ;;  %400 = vrot.lane.b32.xlu0 %v3674_v55, %s3627_s22 }
 0x1af   :  { %171 = vrot.lane.b32.xlu2 %v3676_v57, %s3626_s21 }
 0x1b7   :  { %159 = vrot.lane.b32.xlu2 %v3676_v57, %s3625_s1 }
 0x1f9   :  { %v3692_v58 = vpop.permute.xlu2 %167 }
 0x1fa   :  { %408 = vrot.lane.b32.xlu2 %v3692_v58, %s3627_s22  ;;  %v234_v60 = vrot.slane %v3692_v58, 4  ;;  %v237_v4 = vsel %vm178_vm8, %v3692_v58, %v236_v2 }
 0x1fb   :  { %v245_v11 = vperm.slane %v237_v4, %v3710_v3 }
 0x1fc   :  { %v235_v1 = vsel %vm178_vm8, %v234_v60, %v3674_v55 }
 0x1fd   :  { %v241_v7 = vperm.slane %v235_v1, %v3710_v3  ;;  %v272_v22 = vrot.slane %v245_v11, 4 }
 0x1ff   :  { %v260_v18 = vrot.slane %v241_v7, 4 }
 0x201   :  { %v3696_v59 = vpop.permute.xlu2 %173 }
 0x202   :  { %412 = vrot.lane.b32.xlu2 %v3696_v59, %s3627_s22  ;;  %v246_v8 = vrot.slane %v3696_v59, 4 }
 0x209   :  { %v3701_v61 = vpop.permute.xlu2 %171 }
 0x20a   :  { %398 = vrot.lane.b32.xlu2 %v3676_v57, %s3627_s22  ;;  %v3410_v0 = vpack.i.bf16 %v3701_v61, %v3696_v59 }
 0x211   :  { %v3716_v9 = vpop.permute.xlu0 %161  ;;  %v3745_v33 = vpop.permute.xlu2 %159 }
 0x212   :  { %v247_v12 = vsel %vm178_vm8, %v246_v8, %v3716_v9  ;;  %v248_v13 = vrot.slane %v3716_v9, 4  ;;  %404 = vrot.lane.b32.xlu1 %v3716_v9, %s3627_s22  ;;  %v3400_v17 = vpack.i.bf16 %v3692_v58, %v3716_v9 }
 0x213   :  { %v253_v15 = vperm.slane %v247_v12, %v3710_v3  ;;  %v3727_v16 = vpop.permute.xlu1 %165 }
 0x214   :  { %v249_v19 = vsel %vm178_vm8, %v3696_v59, %v248_v13  ;;  %406 = vrot.lane.b32.xlu0 %v3727_v16, %s3627_s22 }
 0x215   :  { %v257_v20 = vperm.slane %v249_v19, %v3710_v3  ;;  %v258_v21 = vrot.slane %v253_v15, 4  ;;  %v261_v23 = vsel %vm178_vm8, %v253_v15, %v260_v18  ;;  %v177_v19 = vrot.slane %v3727_v16, 4 }
 0x216   :  { %v269_v25 = vperm.slane %v261_v23, %v3724_v14 }
 0x217   :  { %v259_v24 = vsel %vm178_vm8, %v258_v21, %v241_v7  ;;  %v270_v26 = vrot.slane %v257_v20, 4  ;;  %v273_v28 = vsel %vm178_vm8, %v257_v20, %v272_v22  ;;  %v180_v20 = vrot.slane %v3676_v57, 4 }
 0x218   :  { %v265_v27 = vperm.slane %v259_v24, %v3724_v14  ;;  %v284_v30 = vrot.slane %v269_v25, 4  ;;  %v281_v31 = vperm.slane %v273_v28, %v3724_v14  ;;  %v192_v22 = vrot.slane %v3745_v33, 4 }
 0x219   :  { %v271_v29 = vsel %vm178_vm8, %v270_v26, %v245_v11  ;;  %v181_v21 = vsel %vm178_vm8, %v3727_v16, %v180_v20  ;;  %v179_v23 = vsel %vm178_vm8, %v177_v19, %v3676_v57  ;;  %v190_v26 = vrot.slane %v3701_v61, 4 }
 0x21a   :  { %v282_v32 = vrot.slane %v265_v27, 4  ;;  %410 = vrot.lane.b32.xlu1 %v3701_v61, %s3627_s22  ;;  %v285_v34 = vsel %vm178_vm8, 0.0, %v284_v30  ;;  %v277_v37 = vperm.slane %v271_v29, %v3724_v14  ;;  %v288_v38 = vrot.slane %v281_v31, 4 }
 0x21b   :  { %v349_v36 = vrot.slane %v285_v34, 4  ;;  %v344_v39 = vsel %vm178_vm8, %v284_v30, %v265_v27  ;;  %v189_v24 = vperm.slane %v181_v21, %v3710_v3  ;;  %v185_v25 = vperm.slane %v179_v23, %v3710_v3 }
 0x21c   :  { %v283_v35 = vsel %vm178_vm8, 0.0, %v282_v32  ;;  %402 = vrot.lane.b32.xlu0 %v3745_v33, %s3627_s22  ;;  %v286_v41 = vrot.slane %v277_v37, 4  ;;  %v289_v42 = vsel %vm178_vm8, 0.0, %v288_v38  ;;  %v348_v44 = vperm.slane %v344_v39, %v3710_v3 }
 0x21d   :  { %v350_v40 = vsel %vm178_vm8, %v349_v36, %v283_v35  ;;  %v355_v47 = vsel %vm178_vm8, %v288_v38, %v277_v37  ;;  %v360_v49 = vrot.slane %v289_v42, 4  ;;  %v193_v27 = vsel %vm178_vm8, %v3701_v61, %v192_v22 }
 0x21e   :  { %v287_v45 = vsel %vm178_vm8, 0.0, %v286_v41  ;;  %v354_v46 = vperm.slane %v350_v40, %v3710_v3  ;;  %v359_v48 = vperm.slane %v355_v47, %v3710_v3  ;;  %v368_v52 = vrot.slane %v348_v44, 4 }
 0x21f   :  { %v361_v51 = vsel %vm178_vm8, %v360_v49, %v287_v45  ;;  %v216_v28 = vrot.slane %v189_v24, 4  ;;  %v191_v29 = vsel %vm178_vm8, %v190_v26, %v3745_v33  ;;  %v201_v30 = vperm.slane %v193_v27, %v3710_v3 }
 0x220   :  { %v366_v50 = vrot.slane %v354_v46, 4  ;;  %v365_v53 = vperm.slane %v361_v51, %v3710_v3  ;;  %v380_v54 = vrot.slane %v359_v48, 4  ;;  %v369_v62 = vsel %vm178_vm8, %v354_v46, %v368_v52 }
 0x221   :  { %v377_v2 = vperm.slane %v369_v62, %v3724_v14  ;;  %v204_v31 = vrot.slane %v185_v25, 4  ;;  %v197_v34 = vperm.slane %v191_v29, %v3710_v3  ;;  %v217_v57 = vsel %vm178_vm8, %v201_v30, %v216_v28 }
 0x222   :  { %v367_v55 = vsel %vm178_vm8, %v366_v50, %v348_v44  ;;  %v378_v60 = vrot.slane %v365_v53, 4  ;;  %v381_v4 = vsel %vm178_vm8, %v365_v53, %v380_v54  ;;  %v214_v35 = vrot.slane %v201_v30, 4 }
 0x223   :  { %v373_v56 = vperm.slane %v367_v55, %v3724_v14  ;;  %v389_v6 = vperm.slane %v381_v4, %v3724_v14  ;;  %v396_v7 = vrot.slane %v377_v2, 4  ;;  %v205_v36 = vsel %vm178_vm8, %v197_v34, %v204_v31 }
 0x224   :  { %3396 = vrot.lane.b32.xlu0 %v3395_v43, %s3630_s23  ;;  %v379_v63 = vsel %vm178_vm8, %v378_v60, %v359_v48  ;;  %v225_v37 = vperm.slane %v217_v57, %v3724_v14  ;;  %v213_v38 = vperm.slane %v205_v36, %v3724_v14  ;;  %v202_v39 = vrot.slane %v197_v34, 4  ;;  %v401_v48 = vpop.permute.xlu0 %400 }
 0x225   :  { %v392_v1 = vrot.slane %v373_v56, 4  ;;  %v385_v5 = vperm.slane %v379_v63, %v3724_v14  ;;  %v394_v12 = vrot.slane %v389_v6, 4  ;;  %v3777_v13 = vsel %vm178_vm8, %v389_v6, %v396_v7 }
 0x226   :  { %v215_v40 = vsel %vm178_vm8, %v214_v35, %v189_v24  ;;  %v232_v41 = vrot.slane %v225_v37, 4  ;;  %v203_v42 = vsel %vm178_vm8, %v202_v39, %v185_v25  ;;  %v228_v44 = vrot.slane %v213_v38, 4 }
 0x227   :  { %v3774_v8 = vsel %vm178_vm8, %v385_v5, %v392_v1  ;;  %v390_v11 = vrot.slane %v385_v5, 4  ;;  %v3783_v18 = vsel %vm178_vm8, %v394_v12, %v377_v2  ;;  %v221_v43 = vperm.slane %v215_v40, %v3724_v14 }
 0x228   :  { %v209_v46 = vperm.slane %v203_v42, %v3724_v14  ;;  %v233_v47 = vsel %vm178_vm8, 0.0, %v232_v41  ;;  %v229_v51 = vsel %vm178_vm8, 0.0, %v228_v44  ;;  %v480_v54 = vrot.slane %v401_v48, 4 }
 0x229   :  { %v3780_v15 = vsel %vm178_vm8, %v390_v11, %v373_v56  ;;  %v230_v50 = vrot.slane %v221_v43, 4  ;;  %v306_v52 = vrot.slane %v233_v47, 4  ;;  %v301_v55 = vsel %vm178_vm8, %v232_v41, %v221_v43 }
 0x22a   :  { %v226_v53 = vrot.slane %v209_v46, 4  ;;  %v290_v60 = vsel %vm178_vm8, %v228_v44, %v209_v46  ;;  %v295_v62 = vrot.slane %v229_v51, 4  ;;  %v3817_v2 = vperm.slane %v301_v55, %v3710_v3 }
 0x22b   :  { %v231_v1 = vsel %vm178_vm8, 0.0, %v230_v50  ;;  %v3823_v11 = vperm.slane %v290_v60, %v3710_v3 }
 0x22c   :  { %v307_v4 = vsel %vm178_vm8, %v306_v52, %v231_v1  ;;  %v227_v7 = vsel %vm178_vm8, 0.0, %v226_v53  ;;  %v326_v26 = vrot.slane %v3817_v2, 4 }
 0x22d   :  { %v296_v20 = vsel %vm178_vm8, %v295_v62, %v227_v7  ;;  %v3828_v22 = vperm.slane %v307_v4, %v3710_v3  ;;  %v314_v31 = vrot.slane %v3823_v11, 4 }
 0x22e   :  { %v3834_v30 = vperm.slane %v296_v20, %v3710_v3 }
 0x22f   :  { %v327_v42 = vsel %vm178_vm8, %v3828_v22, %v326_v26  ;;  %v324_v50 = vrot.slane %v3828_v22, 4 }
 0x230   :  { %v3858_v55 = vperm.slane %v327_v42, %v3724_v14 }
 0x254   :  { %v409_v32 = vpop.permute.xlu2 %408 }
 0x255   :  { %v478_v49 = vrot.slane %v409_v32, 4  ;;  %v481_v63 = vsel %vm178_vm8, %v409_v32, %v480_v54  ;;  %v3855_v54 = vsel %vm178_vm8, %v3834_v30, %v314_v31 }
 0x256   :  { %v489_v12 = vperm.slane %v481_v63, %v3710_v3 }
 0x257   :  { %v479_v56 = vsel %vm178_vm8, %v478_v49, %v401_v48 }
 0x258   :  { %v485_v5 = vperm.slane %v479_v56, %v3710_v3  ;;  %v516_v32 = vrot.slane %v489_v12, 4 }
 0x25a   :  { %v504_v27 = vrot.slane %v485_v5, 4 }
 0x25c   :  { %v413_v45 = vpop.permute.xlu2 %412 }
 0x25d   :  { %v490_v19 = vrot.slane %v413_v45, 4 }
 0x264   :  { %v399_v6 = vpop.permute.xlu2 %398 }
 0x265   :  { %v424_v23 = vrot.slane %v399_v6, 4 }
 0x284   :  { %v405_v21 = vpop.permute.xlu1 %404 }
 0x285   :  { %v491_v24 = vsel %vm178_vm8, %v490_v19, %v405_v21  ;;  %v492_v25 = vrot.slane %v405_v21, 4 }
 0x286   :  { %v497_v28 = vperm.slane %v491_v24, %v3710_v3  ;;  %v407_v29 = vpop.permute.xlu0 %406 }
 0x287   :  { %v493_v34 = vsel %vm178_vm8, %v413_v45, %v492_v25  ;;  %v422_v57 = vrot.slane %v407_v29, 4  ;;  %v425_v35 = vsel %vm178_vm8, %v407_v29, %v424_v23 }
 0x288   :  { %v501_v36 = vperm.slane %v493_v34, %v3710_v3  ;;  %v502_v37 = vrot.slane %v497_v28, 4  ;;  %v505_v38 = vsel %vm178_vm8, %v497_v28, %v504_v27  ;;  %v433_v39 = vperm.slane %v425_v35, %v3710_v3 }
 0x289   :  { %v513_v40 = vperm.slane %v505_v38, %v3724_v14  ;;  %v423_v41 = vsel %vm178_vm8, %v422_v57, %v399_v6  ;;  %v312_v38 = vrot.slane %v3834_v30, 4  ;;  %v325_v30 = vsel %vm178_vm8, %v324_v50, %v3817_v2 }
 0x28a   :  { %v503_v43 = vsel %vm178_vm8, %v502_v37, %v485_v5  ;;  %v514_v44 = vrot.slane %v501_v36, 4  ;;  %v517_v45 = vsel %vm178_vm8, %v501_v36, %v516_v32  ;;  %v429_v46 = vperm.slane %v423_v41, %v3710_v3 }
 0x28b   :  { %v509_v47 = vperm.slane %v503_v43, %v3724_v14  ;;  %v525_v48 = vperm.slane %v517_v45, %v3724_v14  ;;  %v528_v49 = vrot.slane %v513_v40, 4  ;;  %v460_v52 = vrot.slane %v433_v39, 4 }
 0x28c   :  { %v515_v51 = vsel %vm178_vm8, %v514_v44, %v489_v12  ;;  %v411_v53 = vpop.permute.xlu1 %410  ;;  %v448_v5 = vrot.slane %v429_v46, 4  ;;  %v313_v2 = vsel %vm178_vm8, %v312_v38, %v3823_v11 }
 0x28d   :  { %v521_v56 = vperm.slane %v515_v51, %v3724_v14  ;;  %v526_v60 = vrot.slane %v509_v47, 4  ;;  %v529_v62 = vsel %vm178_vm8, 0.0, %v528_v49  ;;  %v532_v63 = vrot.slane %v525_v48, 4 }
 0x28e   :  { %v588_v1 = vsel %vm178_vm8, %v528_v49, %v509_v47  ;;  %v593_v4 = vrot.slane %v529_v62, 4  ;;  %v434_v6 = vrot.slane %v411_v53, 4  ;;  %v403_v7 = vpop.permute.xlu0 %402 }
 0x28f   :  { %v527_v12 = vsel %vm178_vm8, 0.0, %v526_v60  ;;  %v533_v19 = vsel %vm178_vm8, 0.0, %v532_v63  ;;  %v592_v20 = vperm.slane %v588_v1, %v3710_v3  ;;  %v436_v21 = vrot.slane %v403_v7, 4 }
 0x290   :  { %v604_v22 = vrot.slane %v533_v19, 4  ;;  %v435_v23 = vsel %vm178_vm8, %v434_v6, %v403_v7  ;;  %v530_v24 = vrot.slane %v521_v56, 4  ;;  %v594_v25 = vsel %vm178_vm8, %v593_v4, %v527_v12 }
 0x291   :  { %v437_v26 = vsel %vm178_vm8, %v411_v53, %v436_v21  ;;  %v441_v27 = vperm.slane %v435_v23, %v3710_v3  ;;  %v598_v28 = vperm.slane %v594_v25, %v3710_v3  ;;  %v599_v29 = vsel %vm178_vm8, %v532_v63, %v521_v56 }
 0x292   :  { %v445_v31 = vperm.slane %v437_v26, %v3710_v3  ;;  %v531_v32 = vsel %vm178_vm8, 0.0, %v530_v24  ;;  %v603_v34 = vperm.slane %v599_v29, %v3710_v3  ;;  %v612_v57 = vrot.slane %v592_v20, 4 }
 0x293   :  { %v446_v35 = vrot.slane %v441_v27, 4  ;;  %v449_v36 = vsel %vm178_vm8, %v441_v27, %v448_v5  ;;  %v605_v37 = vsel %vm178_vm8, %v604_v22, %v531_v32  ;;  %v610_v62 = vrot.slane %v598_v28, 4 }
 0x294   :  { %v457_v40 = vperm.slane %v449_v36, %v3724_v14  ;;  %v458_v41 = vrot.slane %v445_v31, 4  ;;  %v461_v42 = vsel %vm178_vm8, %v445_v31, %v460_v52  ;;  %v609_v43 = vperm.slane %v605_v37, %v3710_v3 }
 0x295   :  { %v447_v44 = vsel %vm178_vm8, %v446_v35, %v429_v46  ;;  %v469_v45 = vperm.slane %v461_v42, %v3724_v14  ;;  %v613_v47 = vsel %vm178_vm8, %v598_v28, %v612_v57  ;;  %v624_v48 = vrot.slane %v603_v34, 4 }
 0x296   :  { %v453_v49 = vperm.slane %v447_v44, %v3724_v14  ;;  %v459_v51 = vsel %vm178_vm8, %v458_v41, %v433_v39  ;;  %v472_v53 = vrot.slane %v457_v40, 4  ;;  %v621_v60 = vperm.slane %v613_v47, %v3724_v14 }
 0x297   :  { %v465_v56 = vperm.slane %v459_v51, %v3724_v14  ;;  %v476_v52 = vrot.slane %v469_v45, 4  ;;  %v625_v4 = vsel %vm178_vm8, %v609_v43, %v624_v48  ;;  %v611_v22 = vsel %vm178_vm8, %v610_v62, %v592_v20 }
 0x298   :  { %v470_v46 = vrot.slane %v453_v49, 4  ;;  %v473_v63 = vsel %vm178_vm8, 0.0, %v472_v53  ;;  %v534_v1 = vsel %vm178_vm8, %v472_v53, %v453_v49  ;;  %v633_v19 = vperm.slane %v625_v4, %v3724_v14 }
 0x299   :  { %v474_v5 = vrot.slane %v465_v56, 4  ;;  %v477_v39 = vsel %vm178_vm8, 0.0, %v476_v52  ;;  %v539_v6 = vrot.slane %v473_v63, 4  ;;  %v538_v7 = vperm.slane %v534_v1, %v3710_v3 }
 0x29a   :  { %v471_v50 = vsel %vm178_vm8, 0.0, %v470_v46  ;;  %v550_v12 = vrot.slane %v477_v39, 4  ;;  %v640_v21 = vrot.slane %v621_v60, 4  ;;  %v622_v23 = vrot.slane %v609_v43, 4 }
 0x29b   :  { %v617_v24 = vperm.slane %v611_v22, %v3724_v14  ;;  %v475_v25 = vsel %vm178_vm8, 0.0, %v474_v5  ;;  %v540_v26 = vsel %vm178_vm8, %v539_v6, %v471_v50  ;;  %v545_v11 = vsel %vm178_vm8, %v476_v52, %v465_v56 }
 0x29c   :  { %v641_v27 = vsel %vm178_vm8, %v633_v19, %v640_v21  ;;  %v623_v28 = vsel %vm178_vm8, %v622_v23, %v603_v34  ;;  %v638_v29 = vrot.slane %v633_v19, 4  ;;  %v544_v31 = vperm.slane %v540_v26, %v3710_v3 }
 0x29d   :  { %3327 = vmatpush.xpose.msk.msra.mxu0 %vm886_vm9, %v641_v27  ;;  %v629_v20 = vperm.slane %v623_v28, %v3724_v14  ;;  %v636_v32 = vrot.slane %v617_v24, 4  ;;  %v549_v57 = vperm.slane %v545_v11, %v3710_v3  ;;  %v551_v35 = vsel %vm178_vm8, %v550_v12, %v475_v25 }
 0x29e   :  { %v639_v36 = vsel %vm178_vm8, %v638_v29, %v621_v60  ;;  %v555_v37 = vperm.slane %v551_v35, %v3710_v3  ;;  %v558_v38 = vrot.slane %v538_v7, 4  ;;  %v556_v40 = vrot.slane %v544_v31, 4 }
 0x29f   :  { %v637_v34 = vsel %vm178_vm8, %v629_v20, %v636_v32  ;;  %3323 = vmatpush.xpose.msk.msrb.mxu3 %vm886_vm9, %v639_v36  ;;  %v634_v41 = vrot.slane %v629_v20, 4  ;;  %v570_v42 = vrot.slane %v549_v57, 4  ;;  %v323_v43 = vperm.slane %v3855_v54, %v3724_v14 }
 0x2a0   :  { %3319 = vmatpush.xpose.msk.msra.mxu2 %vm886_vm9, %v637_v34  ;;  %v559_v44 = vsel %vm178_vm8, %v544_v31, %v558_v38  ;;  %v557_v45 = vsel %vm178_vm8, %v556_v40, %v538_v7  ;;  %v568_v47 = vrot.slane %v555_v37, 4  ;;  %v319_v48 = vperm.slane %v313_v2, %v3724_v14 }
 0x2a1   :  { %v635_v49 = vsel %vm178_vm8, %v634_v41, %v617_v24  ;;  %v567_v51 = vperm.slane %v559_v44, %v3724_v14  ;;  %v571_v53 = vsel %vm178_vm8, %v555_v37, %v570_v42  ;;  %v563_v56 = vperm.slane %v557_v45, %v3724_v14 }
 0x2a2   :  { %3315 = vmatpush.xpose.msk.msrb.mxu1 %vm886_vm9, %v635_v49  ;;  %v579_v54 = vperm.slane %v571_v53, %v3724_v14  ;;  %v569_v52 = vsel %vm178_vm8, %v568_v47, %v549_v57  ;;  %v331_v60 = vperm.slane %v325_v30, %v3724_v14  ;;  %v342_v4 = vrot.slane %v323_v43, 4 }
 0x2a3   :  { %v586_v62 = vrot.slane %v567_v51, 4  ;;  %v575_v46 = vperm.slane %v569_v52, %v3724_v14  ;;  %v582_v63 = vrot.slane %v563_v56, 4  ;;  %v338_v5 = vrot.slane %v319_v48, 4 }
 0x2a4   :  { %v584_v1 = vrot.slane %v579_v54, 4  ;;  %v340_v50 = vrot.slane %v3858_v55, 4  ;;  %v336_v7 = vrot.slane %v331_v60, 4  ;;  %v343_v19 = vsel %vm178_vm8, %v3858_v55, %v342_v4 }
 0x2a5   :  { %v587_v39 = vsel %vm178_vm8, %v579_v54, %v586_v62  ;;  %v583_v6 = vsel %vm178_vm8, %v575_v46, %v582_v63  ;;  %v580_v2 = vrot.slane %v575_v46, 4  ;;  %v339_v21 = vsel %vm178_vm8, %v331_v60, %v338_v5  ;;  %v3992_v60 = vpop.permute.xlu0 %3396 }
 0x2a6   :  { %3328 = vmatpush.xpose.msk.msra.mxu0 %vm886_vm9, %v587_v39  ;;  %3320 = vmatpush.xpose.msk.msra.mxu2 %vm886_vm9, %v583_v6  ;;  %v585_v30 = vsel %vm178_vm8, %v584_v1, %v567_v51  ;;  %v341_v22 = vsel %vm178_vm8, %v340_v50, %v323_v43  ;;  %v337_v23 = vsel %vm178_vm8, %v336_v7, %v319_v48  ;;  %v46_v55 = vlaneseq }
 0x2a7   :  { %3324 = vmatpush.xpose.msk.msrb.mxu3 %vm886_vm9, %v585_v30  ;;  %v581_v12 = vsel %vm178_vm8, %v580_v2, %v563_v56  ;;  %v3631_v28 = vmov -1e+30   ;;  %v3405_v52 = vpack.i.bf16 %v3727_v16, %v3745_v33 }
 0x2a8   :  { %3316 = vmatpush.xpose.msk.msrb.mxu1 %vm886_vm9, %v581_v12  ;;  %v47_v24 = vshrl.u32 %v46_v55, 7  ;;  %v50_v25 = vand.u32 127, %v46_v55 }
 0x2a9   :  { %3329 = vmatmul.msk.f32.vlgmr.msra.gmra.mxu0 %vm886_vm9, %v343_v19  ;;  %3321 = vmatmul.msk.f32.vlgmr.msra.gmra.mxu2 %vm886_vm9, %v339_v21 }
 0x2aa   :  { %3377 = vmatpush.xpose.msk.msrb.mxu2 %vm886_vm9, %v641_v27  ;;  %3325 = vmatmul.msk.f32.vlgmr.msrb.gmra.mxu3 %vm886_vm9, %v341_v22  ;;  %v53_v26 = vshra.s32 %v47_v24, 3  ;;  %v55_v11 = vshra.s32 %v50_v25, 3  ;;  %vm51_vm10 = vcmp.ge.s32.totalorder %v47_v24, %v50_v25  ;;  %v48_v27 = vadd.s32 8, %v47_v24 }
 0x2ab   :  { %3317 = vmatmul.msk.f32.vlgmr.msrb.gmra.mxu1 %vm886_vm9, %v337_v23 }
 0x2ac   :  { %vm56_vm11 = vcmp.eq.s32.totalorder %v53_v26, %v55_v11  ;;  %vm52_vm14 = vcmp.ge.s32.totalorder %v48_v27, %v50_v25 }
 0x2ad   :  { %vm58_vm12 = vmand %vm51_vm10, %vm56_vm11 }
 0x2ae   :  { %3378 = vmatpush.xpose.msk.msrb.mxu2 %vm886_vm9, %v587_v39 }
 0x2b1   :  { %3322 = vmatmul.msk.f32.gmra.mxu2 %vm886_vm9, %v3774_v8  ;;  %v3958_v8 = vsel %vm58_vm12, 0.0, %v3631_v28 }
 0x2b2   :  { %3326 = vmatmul.msk.f32.gmra.mxu3 %vm886_vm9, %v3783_v18 }
 0x2b3   :  { %3318 = vmatmul.msk.f32.gmra.mxu1 %vm886_vm9, %v3780_v15  ;;  %v54_v15 = vshra.s32 %v48_v27, 3 }
 0x2b5   :  { %vm57_vm15 = vcmp.eq.s32.totalorder %v54_v15, %v55_v11 }
 0x2b6   :  { %vm59_vm1 = vmand %vm52_vm14, %vm57_vm15 }
 0x2b7   :  { %v3968_v34 = vsel %vm59_vm1, 0.0, %v3631_v28 }
 0x2b9   :  { %3330 = vmatmul.msk.f32.vlgmr.msrb.gmra.mxu2 %vm886_vm9, %v3777_v13 }
 0x326   :  { %v1021_v29 = vpop.f32.mrf.mxu0 }
 0x327   :  { %v1022_v18 = vadd.f32 %v1021_v29, %v3958_v8  ;;  %v3398_v29 = vunpack.i.l.bf16 %v3992_v60 }
 0x328   :  { %v916_v31 = vpop.f32.mrf.mxu1 }
 0x329   :  { %v1046_v13 = vsel %vm1027_vm13, %v1022_v18, -inf  ;;  %v917_v20 = vadd.f32 %v916_v31, %v3958_v8 }
 0x32a   :  { %1047 = vmax.xlane.f32.xlu1 %v1046_v13  ;;  %v724_v13 = vrot.slane %v3398_v29, 4 }
 0x32b   :  { %v1028_v32 = vsel %vm1027_vm13, %v917_v20, -inf }
 0x32c   :  { %v951_v57 = vpop.f32.mrf.mxu2  ;;  %1029 = vmax.xlane.f32.xlu0 %v1028_v32 }
 0x32d   :  { %v952_v35 = vadd.f32 %v951_v57, %v3958_v8  ;;  %v986_v36 = vpop.f32.mrf.mxu3 }
 0x32e   :  { %v987_v37 = vadd.f32 %v986_v36, %v3958_v8 }
 0x32f   :  { %v1034_v38 = vsel %vm1027_vm13, %v952_v35, -inf }
 0x330   :  { %v1040_v40 = vsel %vm1027_vm13, %v987_v37, -inf  ;;  %v919_v41 = vpop.f32.mrf.mxu1 }
 0x331   :  { %1041 = vmax.xlane.f32.xlu2 %v1040_v40  ;;  %v3971_v42 = vadd.f32 %v919_v41, %v3968_v34 }
 0x332   :  { %1035 = vmax.xlane.f32.xlu1 %v1034_v38 }
 0x333   :  { %v1031_v47 = vsel %vm1027_vm13, %v3971_v42, -inf }
 0x334   :  { %v954_v43 = vpop.f32.mrf.mxu2 }
 0x335   :  { %v955_v44 = vadd.f32 %v954_v43, %v3968_v34  ;;  %v989_v48 = vpop.f32.mrf.mxu3 }
 0x336   :  { %v990_v49 = vadd.f32 %v989_v48, %v3968_v34 }
 0x337   :  { %v1037_v45 = vsel %vm1027_vm13, %v955_v44, -inf }
 0x338   :  { %1038 = vmax.xlane.f32.xlu0 %v1037_v45  ;;  %v1043_v54 = vsel %vm1027_vm13, %v990_v49, -inf }
 0x339   :  { %1032 = vmax.xlane.f32.xlu2 %v1031_v47 }
 0x33c   :  { %v1024_v51 = vpop.f32.mrf.mxu2 }
 0x33d   :  { %v1025_v53 = vadd.f32 %v1024_v51, %v3968_v34 }
 0x33f   :  { %v1049_v56 = vsel %vm1027_vm13, %v1025_v53, -inf }
 0x340   :  { %1050 = vmax.xlane.f32.xlu1 %v1049_v56 }
 0x341   :  { %1044 = vmax.xlane.f32.xlu2 %v1043_v54 }
 0x34c   :  { %3411 = vrot.lane.b32.xlu0 %v3410_v0, %s3630_s23 }
 0x359   :  { %3401 = vrot.lane.b32.xlu2 %v3400_v17, %s3630_s23  ;;  %3406 = vrot.lane.b32.xlu1 %v3405_v52, %s3630_s23 }
 0x39d   :  { %v1048_v62 = vpop.xlane.xlu1 %1047 }
 0x39e   :  { %v1058_v5 = vsub.f32 %v1022_v18, %v1048_v62 }
 0x39f   :  { %v1030_v46 = vpop.xlane.xlu0 %1029 }
 0x3a0   :  { %v1052_v63 = vsub.f32 %v917_v20, %v1030_v46  ;;  %v1072_v58 = vmul.f32 1.442695, %v1058_v5 }
 0x3a2   :  { %v1060_v1 = vmul.f32 1.442695, %v1052_v63 }
 0x3a4   :  { %3459 = vpow2.f32 %v1060_v1  ;;  %v1042_v4 = vpop.xlane.xlu2 %1041  ;;  %v3399_v1 = vunpack.i.h.bf16 %v3992_v60 }
 0x3a5   :  { %v1056_v59 = vsub.f32 %v987_v37, %v1042_v4  ;;  %v1036_v61 = vpop.xlane.xlu1 %1035 }
 0x3a6   :  { %v1054_v0 = vsub.f32 %v952_v35, %v1036_v61 }
 0x3a7   :  { %v1068_v16 = vmul.f32 1.442695, %v1056_v59 }
 0x3a8   :  { %v1064_v33 = vmul.f32 1.442695, %v1054_v0 }
 0x3a9   :  { %3461 = vpow2.f32 %v1068_v16 }
 0x3aa   :  { %v3994_v39 = vpop.eup %3459  ;;  %3463 = vpow2.f32 %v1064_v33 }
 0x3ab   :  { %v1039_v9 = vpop.xlane.xlu0 %1038  ;;  %v1076_v17 = vsel %vm1027_vm13, %v3994_v39, 0.0  ;;  %3465 = vpow2.f32 %v1072_v58 }
 0x3ac   :  { %v1033_v6 = vpop.xlane.xlu2 %1032  ;;  %v1055_v2 = vsub.f32 %v955_v44, %v1039_v9  ;;  %1077 = vadd.xlane.f32.xlu1 %v1076_v17 }
 0x3ad   :  { %v1053_v11 = vsub.f32 %v3971_v42, %v1033_v6 }
 0x3ae   :  { %v1066_v50 = vmul.f32 1.442695, %v1055_v2 }
 0x3af   :  { %v3998_v30 = vpop.eup %3461  ;;  %v1062_v15 = vmul.f32 1.442695, %v1053_v11 }
 0x3b0   :  { %v4000_v7 = vpop.eup %3463  ;;  %3467 = vpow2.f32 %v1066_v50  ;;  %v1088_v12 = vsel %vm1027_vm13, %v3998_v30, 0.0 }
 0x3b1   :  { %1089 = vadd.xlane.f32.xlu2 %v1088_v12  ;;  %v1082_v19 = vsel %vm1027_vm13, %v4000_v7, 0.0  ;;  %v4006_v55 = vpop.eup %3465  ;;  %v668_v12 = vrot.slane %v3399_v1, 4 }
 0x3b2   :  { %1083 = vadd.xlane.f32.xlu0 %v1082_v19  ;;  %v1094_v18 = vsel %vm1027_vm13, %v4006_v55, 0.0 }
 0x3b3   :  { %v1051_v21 = vpop.xlane.xlu1 %1050 }
 0x3b4   :  { %v1059_v22 = vsub.f32 %v1025_v53, %v1051_v21  ;;  %v1045_v23 = vpop.xlane.xlu2 %1044 }
 0x3b5   :  { %v1057_v24 = vsub.f32 %v990_v49, %v1045_v23 }
 0x3b6   :  { %v4008_v25 = vpop.eup %3467  ;;  %v1074_v26 = vmul.f32 1.442695, %v1059_v22 }
 0x3b7   :  { %v1070_v27 = vmul.f32 1.442695, %v1057_v24  ;;  %v1085_v28 = vsel %vm1027_vm13, %v4008_v25, 0.0 }
 0x3b8   :  { %3469 = vpow2.f32 %v1074_v26  ;;  %1086 = vadd.xlane.f32.xlu1 %v1085_v28 }
 0x3b9   :  { %3471 = vpow2.f32 %v1070_v27 }
 0x3ba   :  { %1095 = vadd.xlane.f32.xlu0 %v1094_v18  ;;  %3473 = vpow2.f32 %v1062_v15 }
 0x3bc   :  { %v3402_v31 = vpop.permute.xlu2 %3401 }
 0x3bd   :  { %v3404_v20 = vunpack.i.h.bf16 %v3402_v31  ;;  %v3403_v32 = vunpack.i.l.bf16 %v3402_v31 }
 0x3be   :  { %v4016_v57 = vpop.eup %3469  ;;  %v4018_v35 = vpop.permute.xlu0 %3411 }
 0x3bf   :  { %v4020_v36 = vpop.eup %3471  ;;  %v722_v37 = vrot.slane %v3404_v20, 4  ;;  %v725_v38 = vsel %vm178_vm8, %v3404_v20, %v724_v13  ;;  %v736_v40 = vrot.slane %v3403_v32, 4  ;;  %v3413_v42 = vunpack.i.l.bf16 %v4018_v35 }
 0x3c0   :  { %v733_v41 = vperm.slane %v725_v38, %v3710_v3  ;;  %v1091_v43 = vsel %vm1027_vm13, %v4020_v36, 0.0  ;;  %v1097_v44 = vsel %vm1027_vm13, %v4016_v57, 0.0  ;;  %v4034_v52 = vpop.eup %3473  ;;  %v3414_v59 = vunpack.i.h.bf16 %v4018_v35 }
 0x3c1   :  { %v723_v45 = vsel %vm178_vm8, %v722_v37, %v3398_v29  ;;  %1092 = vadd.xlane.f32.xlu2 %v1091_v43  ;;  %v734_v49 = vrot.slane %v3413_v42, 4  ;;  %v737_v51 = vsel %vm178_vm8, %v3413_v42, %v736_v40  ;;  %v1079_v9 = vsel %vm1027_vm13, %v4034_v52, 0.0 }
 0x3c2   :  { %v729_v47 = vperm.slane %v723_v45, %v3710_v3  ;;  %v760_v48 = vrot.slane %v733_v41, 4  ;;  %1098 = vadd.xlane.f32.xlu0 %v1097_v44  ;;  %v745_v53 = vperm.slane %v737_v51, %v3710_v3  ;;  %v678_v19 = vrot.slane %v3414_v59, 4 }
 0x3c3   :  { %v735_v54 = vsel %vm178_vm8, %v734_v49, %v3403_v32 }
 0x3c4   :  { %v748_v56 = vrot.slane %v729_v47, 4  ;;  %v741_v62 = vperm.slane %v735_v54, %v3710_v3  ;;  %v758_v46 = vrot.slane %v745_v53, 4  ;;  %v761_v63 = vsel %vm178_vm8, %v745_v53, %v760_v48 }
 0x3c5   :  { %v769_v4 = vperm.slane %v761_v63, %v3724_v14 }
 0x3c6   :  { %v746_v61 = vrot.slane %v741_v62, 4  ;;  %v749_v0 = vsel %vm178_vm8, %v741_v62, %v748_v56  ;;  %v759_v5 = vsel %vm178_vm8, %v758_v46, %v733_v41 }
 0x3c7   :  { %v757_v16 = vperm.slane %v749_v0, %v3724_v14  ;;  %v765_v33 = vperm.slane %v759_v5, %v3724_v14  ;;  %v776_v58 = vrot.slane %v769_v4, 4 }
 0x3c8   :  { %v747_v17 = vsel %vm178_vm8, %v746_v61, %v729_v47 }
 0x3c9   :  { %1080 = vadd.xlane.f32.xlu2 %v1079_v9  ;;  %v753_v60 = vperm.slane %v747_v17, %v3724_v14  ;;  %v772_v6 = vrot.slane %v757_v16, 4  ;;  %v774_v2 = vrot.slane %v765_v33, 4  ;;  %v777_v50 = vsel %vm178_vm8, 0.0, %v776_v58 }
 0x3ca   :  { %v843_v21 = vsel %vm178_vm8, %v776_v58, %v765_v33  ;;  %v848_v22 = vrot.slane %v777_v50, 4 }
 0x3cb   :  { %v3407_v23 = vpop.permute.xlu1 %3406  ;;  %v773_v24 = vsel %vm178_vm8, 0.0, %v772_v6  ;;  %v770_v27 = vrot.slane %v753_v60, 4  ;;  %v775_v29 = vsel %vm178_vm8, 0.0, %v774_v2  ;;  %v832_v18 = vsel %vm178_vm8, %v772_v6, %v753_v60 }
 0x3cc   :  { %v3409_v26 = vunpack.i.h.bf16 %v3407_v23  ;;  %v3408_v11 = vunpack.i.l.bf16 %v3407_v23  ;;  %v837_v28 = vrot.slane %v773_v24, 4  ;;  %v847_v15 = vperm.slane %v843_v21, %v3710_v3 }
 0x3cd   :  { %v771_v38 = vsel %vm178_vm8, 0.0, %v770_v27  ;;  %v836_v40 = vperm.slane %v832_v18, %v3710_v3  ;;  %v849_v44 = vsel %vm178_vm8, %v848_v22, %v775_v29 }
 0x3ce   :  { %v666_v31 = vrot.slane %v3409_v26, 4  ;;  %v669_v13 = vsel %vm178_vm8, %v3409_v26, %v668_v12  ;;  %v679_v20 = vsel %vm178_vm8, %v678_v19, %v3408_v11  ;;  %v680_v32 = vrot.slane %v3408_v11, 4 }
 0x3cf   :  { %v677_v35 = vperm.slane %v669_v13, %v3710_v3  ;;  %v685_v37 = vperm.slane %v679_v20, %v3710_v3  ;;  %v838_v43 = vsel %vm178_vm8, %v837_v28, %v771_v38  ;;  %v853_v53 = vperm.slane %v849_v44, %v3710_v3 }
 0x3d0   :  { %v667_v41 = vsel %vm178_vm8, %v666_v31, %v3399_v1  ;;  %v681_v42 = vsel %vm178_vm8, %v3414_v59, %v680_v32  ;;  %v842_v51 = vperm.slane %v838_v43, %v3710_v3  ;;  %v856_v56 = vrot.slane %v836_v40, 4 }
 0x3d1   :  { %v673_v45 = vperm.slane %v667_v41, %v3710_v3  ;;  %v689_v47 = vperm.slane %v681_v42, %v3710_v3  ;;  %v690_v48 = vrot.slane %v685_v37, 4  ;;  %v704_v49 = vrot.slane %v677_v35, 4 }
 0x3d2   :  { %v868_v54 = vrot.slane %v847_v15, 4  ;;  %v857_v61 = vsel %vm178_vm8, %v842_v51, %v856_v56  ;;  %v854_v50 = vrot.slane %v842_v51, 4  ;;  %v866_v12 = vrot.slane %v853_v53, 4 }
 0x3d3   :  { %v691_v62 = vsel %vm178_vm8, %v690_v48, %v673_v45  ;;  %v692_v46 = vrot.slane %v673_v45, 4  ;;  %v702_v63 = vrot.slane %v689_v47, 4  ;;  %v705_v1 = vsel %vm178_vm8, %v689_v47, %v704_v49 }
 0x3d4   :  { %v697_v4 = vperm.slane %v691_v62, %v3724_v14  ;;  %v713_v59 = vperm.slane %v705_v1, %v3724_v14  ;;  %v869_v0 = vsel %vm178_vm8, %v853_v53, %v868_v54  ;;  %v865_v33 = vperm.slane %v857_v61, %v3724_v14 }
 0x3d5   :  { %v693_v5 = vsel %vm178_vm8, %v685_v37, %v692_v46  ;;  %v703_v16 = vsel %vm178_vm8, %v702_v63, %v677_v35  ;;  %v877_v58 = vperm.slane %v869_v0, %v3724_v14  ;;  %v855_v27 = vsel %vm178_vm8, %v854_v50, %v836_v40 }
 0x3d6   :  { %v701_v9 = vperm.slane %v693_v5, %v3724_v14  ;;  %v709_v17 = vperm.slane %v703_v16, %v3724_v14  ;;  %v714_v60 = vrot.slane %v697_v4, 4  ;;  %v720_v6 = vrot.slane %v713_v59, 4 }
 0x3d7   :  { %v882_v2 = vrot.slane %v877_v58, 4  ;;  %v884_v19 = vrot.slane %v865_v33, 4  ;;  %v867_v28 = vsel %vm178_vm8, %v866_v12, %v847_v15  ;;  %v861_v31 = vperm.slane %v855_v27, %v3724_v14 }
 0x3d8   :  { %v716_v21 = vrot.slane %v701_v9, 4  ;;  %v718_v22 = vrot.slane %v709_v17, 4  ;;  %v721_v23 = vsel %vm178_vm8, 0.0, %v720_v6  ;;  %v715_v24 = vsel %vm178_vm8, 0.0, %v714_v60 }
 0x3d9   :  { %v794_v26 = vrot.slane %v721_v23, 4  ;;  %v883_v11 = vsel %vm178_vm8, %v882_v2, %v865_v33  ;;  %v873_v13 = vperm.slane %v867_v28, %v3724_v14  ;;  %v885_v32 = vsel %vm178_vm8, %v877_v58, %v884_v19 }
 0x3da   :  { %v717_v29 = vsel %vm178_vm8, 0.0, %v716_v21  ;;  %v719_v18 = vsel %vm178_vm8, 0.0, %v718_v22  ;;  %1194 = vmatpush.msra.mxu3 %v883_v11  ;;  %v778_v35 = vsel %vm178_vm8, %v716_v21, %v697_v4  ;;  %v789_v37 = vsel %vm178_vm8, %v720_v6, %v709_v17  ;;  %1223 = vmatpush.msrb.mxu0 %v885_v32 }
 0x3db   :  { %v783_v20 = vrot.slane %v717_v29, 4  ;;  %v878_v38 = vrot.slane %v873_v13, 4  ;;  %v880_v40 = vrot.slane %v861_v31, 4  ;;  %v782_v15 = vperm.slane %v778_v35, %v3710_v3 }
 0x3dc   :  { %v793_v41 = vperm.slane %v789_v37, %v3710_v3  ;;  %v795_v43 = vsel %vm178_vm8, %v794_v26, %v719_v18 }
 0x3dd   :  { %v784_v42 = vsel %vm178_vm8, %v783_v20, %v715_v24  ;;  %v879_v44 = vsel %vm178_vm8, %v878_v38, %v861_v31  ;;  %v881_v45 = vsel %vm178_vm8, %v873_v13, %v880_v40  ;;  %v799_v48 = vperm.slane %v795_v43, %v3710_v3 }
 0x3de   :  { %v788_v47 = vperm.slane %v784_v42, %v3710_v3  ;;  %1136 = vmatpush.msra.mxu1 %v879_v44  ;;  %1165 = vmatpush.msra.mxu2 %v881_v45  ;;  %v802_v49 = vrot.slane %v782_v15, 4  ;;  %v814_v51 = vrot.slane %v793_v41, 4 }
 0x3df   :  { %v812_v56 = vrot.slane %v799_v48, 4 }
 0x3e0   :  { %v800_v53 = vrot.slane %v788_v47, 4  ;;  %v803_v54 = vsel %vm178_vm8, %v788_v47, %v802_v49  ;;  %v815_v62 = vsel %vm178_vm8, %v799_v48, %v814_v51 }
 0x3e1   :  { %v811_v46 = vperm.slane %v803_v54, %v3724_v14  ;;  %v823_v63 = vperm.slane %v815_v62, %v3724_v14  ;;  %v813_v4 = vsel %vm178_vm8, %v812_v56, %v793_v41 }
 0x3e2   :  { %v801_v1 = vsel %vm178_vm8, %v800_v53, %v782_v15  ;;  %v819_v61 = vperm.slane %v813_v4, %v3724_v14 }
 0x3e3   :  { %v807_v59 = vperm.slane %v801_v1, %v3724_v14  ;;  %v828_v0 = vrot.slane %v823_v63, 4  ;;  %v830_v5 = vrot.slane %v811_v46, 4 }
 0x3e4   :  { %v824_v16 = vrot.slane %v819_v61, 4 }
 0x3e5   :  { %v826_v33 = vrot.slane %v807_v59, 4  ;;  %v829_v58 = vsel %vm178_vm8, %v828_v0, %v811_v46  ;;  %v831_v9 = vsel %vm178_vm8, %v823_v63, %v830_v5 }
 0x3e6   :  { %1195 = vmatpush.msra.mxu3 %v829_v58  ;;  %v825_v17 = vsel %vm178_vm8, %v824_v16, %v807_v59  ;;  %1224 = vmatpush.msrb.mxu0 %v831_v9 }
 0x3e7   :  { %v827_v60 = vsel %vm178_vm8, %v819_v61, %v826_v33  ;;  %1137 = vmatpush.msra.mxu1 %v825_v17 }
 0x3e8   :  { %1166 = vmatpush.msra.mxu2 %v827_v60 }
 0x41f   :  { %v1078_v6 = vpop.xlane.xlu1 %1077 }
 0x420   :  { %3475 = vrcp.f32 %v1078_v6 }
 0x424   :  { %v1090_v2 = vpop.xlane.xlu2 %1089 }
 0x425   :  { %3477 = vrcp.f32 %v1090_v2  ;;  %v1084_v50 = vpop.xlane.xlu0 %1083 }
 0x426   :  { %v3476_v12 = vpop.eup %3475  ;;  %3479 = vrcp.f32 %v1084_v50 }
 0x427   :  { %v1108_v19 = vmul.f32 %v3476_v12, %v3994_v39 }
 0x429   :  { %3331 = vmatmul.msk.f32.vlgmr.msra.gmra.mxu1 %vm1027_vm13, %v1108_v19 }
 0x42b   :  { %v3478_v21 = vpop.eup %3477  ;;  %v1087_v22 = vpop.xlane.xlu1 %1086 }
 0x42c   :  { %v3480_v23 = vpop.eup %3479  ;;  %v1112_v24 = vmul.f32 %v3478_v21, %v3998_v30  ;;  %3481 = vrcp.f32 %v1087_v22 }
 0x42d   :  { %v1110_v26 = vmul.f32 %v3480_v23, %v4000_v7  ;;  %v1096_v11 = vpop.xlane.xlu0 %1095 }
 0x42e   :  { %3483 = vrcp.f32 %v1096_v11  ;;  %3335 = vmatmul.msk.f32.vlgmr.msra.gmra.mxu3 %vm1027_vm13, %v1112_v24 }
 0x42f   :  { %3333 = vmatmul.msk.f32.vlgmr.msra.gmra.mxu2 %vm1027_vm13, %v1110_v26 }
 0x432   :  { %v3482_v27 = vpop.eup %3481 }
 0x433   :  { %v1111_v28 = vmul.f32 %v3482_v27, %v4008_v25 }
 0x434   :  { %v3484_v39 = vpop.eup %3483  ;;  %v1093_v29 = vpop.xlane.xlu2 %1092 }
 0x435   :  { %3485 = vrcp.f32 %v1093_v29  ;;  %v1099_v18 = vpop.xlane.xlu0 %1098  ;;  %v1114_v31 = vmul.f32 %v3484_v39, %v4006_v55 }
 0x436   :  { %3487 = vrcp.f32 %v1099_v18 }
 0x437   :  { %3334 = vmatmul.msk.f32.gmra.mxu2 %vm1027_vm13, %v1111_v28  ;;  %3337 = vmatmul.msk.f32.vlgmr.msrb.gmra.mxu0 %vm1027_vm13, %v1114_v31 }
 0x43b   :  { %v3486_v30 = vpop.eup %3485 }
 0x43c   :  { %v3488_v7 = vpop.eup %3487  ;;  %v1081_v13 = vpop.xlane.xlu2 %1080  ;;  %v1113_v20 = vmul.f32 %v3486_v30, %v4020_v36 }
 0x43d   :  { %3489 = vrcp.f32 %v1081_v13  ;;  %v1115_v32 = vmul.f32 %v3488_v7, %v4016_v57 }
 0x43e   :  { %3336 = vmatmul.msk.f32.gmra.mxu3 %vm1027_vm13, %v1113_v20 }
 0x43f   :  { %3338 = vmatmul.msk.f32.gmra.mxu0 %vm1027_vm13, %v1115_v32 }
 0x443   :  { %v3490_v25 = vpop.eup %3489 }
 0x444   :  { %v1109_v55 = vmul.f32 %v3490_v25, %v4034_v52 }
 0x446   :  { %3332 = vmatmul.msk.f32.gmra.mxu1 %vm1027_vm13, %v1109_v55 }
 0x4a6   :  { %v1139_v35 = vpop.f32.mrf.mxu1 }
 0x4a7   :  { %v1234_v37 = vrot.slane %v1139_v35, 4 }
 0x4b1   :  { %v1197_v38 = vpop.f32.mrf.mxu3 }
 0x4b2   :  { %v1168_v40 = vpop.f32.mrf.mxu2  ;;  %v1232_v15 = vrot.slane %v1197_v38, 4  ;;  %v1235_v41 = vsel %vm178_vm8, %v1197_v38, %v1234_v37 }
 0x4b3   :  { %v1246_v36 = vrot.slane %v1168_v40, 4  ;;  %v1243_v42 = vperm.slane %v1235_v41, %v3710_v3 }
 0x4b4   :  { %v1233_v57 = vsel %vm178_vm8, %v1232_v15, %v1139_v35  ;;  %v1226_v43 = vpop.f32.mrf.mxu0 }
 0x4b5   :  { %v1239_v44 = vperm.slane %v1233_v57, %v3710_v3  ;;  %v1270_v45 = vrot.slane %v1243_v42, 4  ;;  %v1244_v47 = vrot.slane %v1226_v43, 4  ;;  %v1247_v52 = vsel %vm178_vm8, %v1226_v43, %v1246_v36 }
 0x4b6   :  { %v1255_v48 = vperm.slane %v1247_v52, %v3710_v3 }
 0x4b7   :  { %v1258_v49 = vrot.slane %v1239_v44, 4  ;;  %v1245_v51 = vsel %vm178_vm8, %v1244_v47, %v1168_v40 }
 0x4b8   :  { %v1251_v53 = vperm.slane %v1245_v51, %v3710_v3  ;;  %v1268_v56 = vrot.slane %v1255_v48, 4  ;;  %v1271_v54 = vsel %vm178_vm8, %v1255_v48, %v1270_v45 }
 0x4b9   :  { %v1279_v62 = vperm.slane %v1271_v54, %v3724_v14 }
 0x4ba   :  { %v1256_v46 = vrot.slane %v1251_v53, 4  ;;  %v1259_v63 = vsel %vm178_vm8, %v1251_v53, %v1258_v49  ;;  %v1269_v1 = vsel %vm178_vm8, %v1268_v56, %v1243_v42  ;;  %v1171_v4 = vpop.f32.mrf.mxu2 }
 0x4bb   :  { %v1267_v59 = vperm.slane %v1259_v63, %v3724_v14  ;;  %v1275_v61 = vperm.slane %v1269_v1, %v3724_v14  ;;  %v1286_v0 = vrot.slane %v1279_v62, 4  ;;  %v1302_v5 = vrot.slane %v1171_v4, 4 }
 0x4bc   :  { %v1257_v16 = vsel %vm178_vm8, %v1256_v46, %v1239_v44  ;;  %v1229_v33 = vpop.f32.mrf.mxu0 }
 0x4bd   :  { %v1263_v58 = vperm.slane %v1257_v16, %v3724_v14  ;;  %v1282_v9 = vrot.slane %v1267_v59, 4  ;;  %v1284_v17 = vrot.slane %v1275_v61, 4  ;;  %v1287_v60 = vsel %vm178_vm8, 0.0, %v1286_v0 }
 0x4be   :  { %v1355_v6 = vsel %vm178_vm8, %v1286_v0, %v1275_v61  ;;  %v1360_v2 = vrot.slane %v1287_v60, 4  ;;  %v1300_v50 = vrot.slane %v1229_v33, 4  ;;  %v1303_v12 = vsel %vm178_vm8, %v1229_v33, %v1302_v5 }
 0x4bf   :  { %v1280_v19 = vrot.slane %v1263_v58, 4  ;;  %v1283_v21 = vsel %vm178_vm8, 0.0, %v1282_v9  ;;  %v1285_v22 = vsel %vm178_vm8, 0.0, %v1284_v17  ;;  %v1359_v23 = vperm.slane %v1355_v6, %v3710_v3 }
 0x4c0   :  { %v1349_v24 = vrot.slane %v1283_v21, 4  ;;  %v1301_v26 = vsel %vm178_vm8, %v1300_v50, %v1171_v4  ;;  %v1311_v11 = vperm.slane %v1303_v12, %v3710_v3  ;;  %v1344_v27 = vsel %vm178_vm8, %v1282_v9, %v1263_v58 }
 0x4c1   :  { %v1307_v28 = vperm.slane %v1301_v26, %v3710_v3  ;;  %v1200_v39 = vpop.f32.mrf.mxu3  ;;  %v1281_v29 = vsel %vm178_vm8, 0.0, %v1280_v19  ;;  %v1348_v18 = vperm.slane %v1344_v27, %v3710_v3  ;;  %v1361_v31 = vsel %vm178_vm8, %v1360_v2, %v1285_v22 }
 0x4c2   :  { %v1288_v30 = vrot.slane %v1200_v39, 4  ;;  %v1350_v7 = vsel %vm178_vm8, %v1349_v24, %v1281_v29  ;;  %v1365_v13 = vperm.slane %v1361_v31, %v3710_v3  ;;  %v1324_v20 = vrot.slane %v1311_v11, 4 }
 0x4c3   :  { %v1142_v32 = vpop.f32.mrf.mxu1  ;;  %v1354_v25 = vperm.slane %v1350_v7, %v3710_v3  ;;  %v1368_v55 = vrot.slane %v1348_v18, 4  ;;  %v1380_v35 = vrot.slane %v1359_v23, 4  ;;  %v1312_v37 = vrot.slane %v1307_v28, 4 }
 0x4c4   :  { %v1289_v38 = vsel %vm178_vm8, %v1288_v30, %v1142_v32  ;;  %v1290_v40 = vrot.slane %v1142_v32, 4  ;;  %v1378_v15 = vrot.slane %v1365_v13, 4 }
 0x4c5   :  { %v1295_v41 = vperm.slane %v1289_v38, %v3710_v3  ;;  %v1369_v36 = vsel %vm178_vm8, %v1354_v25, %v1368_v55  ;;  %v1381_v42 = vsel %vm178_vm8, %v1365_v13, %v1380_v35  ;;  %v1366_v57 = vrot.slane %v1354_v25, 4 }
 0x4c6   :  { %v1291_v43 = vsel %vm178_vm8, %v1200_v39, %v1290_v40  ;;  %v1377_v44 = vperm.slane %v1369_v36, %v3724_v14  ;;  %v1389_v45 = vperm.slane %v1381_v42, %v3724_v14  ;;  %v1379_v47 = vsel %vm178_vm8, %v1378_v15, %v1359_v23 }
 0x4c7   :  { %v1299_v52 = vperm.slane %v1291_v43, %v3710_v3  ;;  %v1313_v48 = vsel %vm178_vm8, %v1312_v37, %v1295_v41  ;;  %v1314_v49 = vrot.slane %v1295_v41, 4  ;;  %v1367_v51 = vsel %vm178_vm8, %v1366_v57, %v1348_v18 }
 0x4c8   :  { %v1319_v53 = vperm.slane %v1313_v48, %v3724_v14  ;;  %v1394_v56 = vrot.slane %v1389_v45, 4  ;;  %v1396_v54 = vrot.slane %v1377_v44, 4  ;;  %v1373_v62 = vperm.slane %v1367_v51, %v3724_v14  ;;  %v1486_v48 = vld [vmem:[#allocation5 + $0x38] sm:$0xff]  ;;  %v1484_v51 = vld [vmem:[#allocation5 + $0x28] sm:$0xff] }
 0x4c9   :  { %v1315_v46 = vsel %vm178_vm8, %v1307_v28, %v1314_v49  ;;  %v1325_v63 = vsel %vm178_vm8, %v1324_v20, %v1299_v52  ;;  %v1326_v1 = vrot.slane %v1299_v52, 4  ;;  %v1385_v4 = vperm.slane %v1379_v47, %v3724_v14  ;;  %1506 = vmatpush.msrb.mxu1 %v1486_v48  ;;  %v1485_v49 = vld [vmem:[#allocation5 + $0x30] sm:$0xff]  ;;  %v3439_v48 = vld [vmem:[#allocation5 + $0xe4] ss:$0 sm:$0xff] }
 0x4ca   :  { %v1323_v59 = vperm.slane %v1315_v46, %v3724_v14  ;;  %v1331_v61 = vperm.slane %v1325_v63, %v3724_v14  ;;  %v1395_v0 = vsel %vm178_vm8, %v1394_v56, %v1377_v44  ;;  %v1397_v16 = vsel %vm178_vm8, %v1389_v45, %v1396_v54 }
 0x4cb   :  { %v1327_v5 = vsel %vm178_vm8, %v1311_v11, %v1326_v1  ;;  %1462 = vrot.lane.b32.xlu2 %v1395_v0, %s3632_s24  ;;  %v1390_v33 = vrot.slane %v1385_v4, 4  ;;  %v1392_v58 = vrot.slane %v1373_v62, 4  ;;  %v1336_v17 = vrot.slane %v1319_v53, 4  ;;  %1470 = vrot.lane.b32.xlu0 %v1397_v16, %s3633_s25 }
 0x4cc   :  { %v1335_v9 = vperm.slane %v1327_v5, %v3724_v14  ;;  %v1338_v60 = vrot.slane %v1323_v59, 4  ;;  %v1340_v12 = vrot.slane %v1331_v61, 4  ;;  %1507 = vmatpush.msrb.mxu1 %v1485_v49  ;;  %v1620_v49 = vld [vmem:[#allocation5 + $0xa8] sm:$0xff] }
 0x4cd   :  { %v1393_v6 = vsel %vm178_vm8, %v1385_v4, %v1392_v58  ;;  %v1391_v2 = vsel %vm178_vm8, %v1390_v33, %v1373_v62  ;;  %v1337_v24 = vsel %vm178_vm8, 0.0, %v1336_v17  ;;  %v3438_v33 = vld [vmem:[#allocation5 + $0xe6] ss:$0 sm:$0xff] }
 0x4ce   :  { %v1339_v50 = vsel %vm178_vm8, 0.0, %v1338_v60  ;;  %v1342_v19 = vrot.slane %v1335_v9, 4  ;;  %v1398_v21 = vsel %vm178_vm8, %v1338_v60, %v1319_v53  ;;  %1454 = vrot.lane.b32.xlu1 %v1393_v6, %s3621_s18  ;;  %v1341_v18 = vsel %vm178_vm8, 0.0, %v1340_v12  ;;  %v1483_v53 = vld [vmem:[#allocation5 + $0x20] sm:$0xff]  ;;  %1508 = vmatpush.msrb.mxu1 %v1484_v51  ;;  %v3539_v9 = vld [vmem:[#allocation2] sm:$0xff] }
 0x4cf   :  { %v1402_v22 = vperm.slane %v1398_v21, %v3710_v3  ;;  %v1403_v23 = vrot.slane %v1339_v50, 4  ;;  %v3540_v50 = vld [vmem:[#allocation2 + $0x8] sm:$0xff] }
 0x4d0   :  { %v1343_v26 = vsel %vm178_vm8, 0.0, %v1342_v19  ;;  %v1409_v11 = vsel %vm178_vm8, %v1342_v19, %v1331_v61  ;;  %1509 = vmatpush.msrb.mxu1 %v1483_v53 }
 0x4d1   :  { %v1404_v27 = vsel %vm178_vm8, %v1403_v23, %v1337_v24  ;;  %v1413_v28 = vperm.slane %v1409_v11, %v3710_v3  ;;  %v1414_v39 = vrot.slane %v1343_v26, 4  ;;  %v1422_v29 = vrot.slane %v1402_v22, 4 }
 0x4d2   :  { %v1408_v31 = vperm.slane %v1404_v27, %v3710_v3 }
 0x4d3   :  { %v1415_v30 = vsel %vm178_vm8, %v1414_v39, %v1341_v18  ;;  %v1434_v7 = vrot.slane %v1413_v28, 4 }
 0x4d4   :  { %v1419_v13 = vperm.slane %v1415_v30, %v3710_v3  ;;  %v1423_v20 = vsel %vm178_vm8, %v1408_v31, %v1422_v29  ;;  %v1420_v32 = vrot.slane %v1408_v31, 4  ;;  %v1577_v31 = vld [vmem:[#allocation5 + $0x58] sm:$0xff]  ;;  %v1576_v30 = vld [vmem:[#allocation5 + $0x50] sm:$0xff] }
 0x4d5   :  { %v1431_v25 = vperm.slane %v1423_v20, %v3724_v14  ;;  %1598 = vmatpush.msrb.mxu2 %v1577_v31  ;;  %v1574_v20 = vld [vmem:[#allocation5 + $0x40] sm:$0xff] }
 0x4d6   :  { %v1435_v55 = vsel %vm178_vm8, %v1419_v13, %v1434_v7  ;;  %v1421_v35 = vsel %vm178_vm8, %v1420_v32, %v1402_v22  ;;  %v1432_v37 = vrot.slane %v1419_v13, 4  ;;  %v1575_v7 = vld [vmem:[#allocation5 + $0x48] sm:$0xff] }
 0x4d7   :  { %v1443_v38 = vperm.slane %v1435_v55, %v3724_v14  ;;  %v1450_v40 = vrot.slane %v1431_v25, 4  ;;  %v1427_v15 = vperm.slane %v1421_v35, %v3724_v14  ;;  %1599 = vmatpush.msrb.mxu2 %v1576_v30  ;;  %v1626_v35 = vld [vmem:[#allocation5 + $0xd8] sm:$0xff] }
 0x4d8   :  { %v1433_v41 = vsel %vm178_vm8, %v1432_v37, %v1413_v28  ;;  %v1625_v37 = vld [vmem:[#allocation5 + $0xd0] sm:$0xff]  ;;  %1628 = vmatpush.msrb.mxu3 %v1626_v35 }
 0x4d9   :  { %v1451_v36 = vsel %vm178_vm8, %v1443_v38, %v1450_v40  ;;  %v1448_v42 = vrot.slane %v1443_v38, 4  ;;  %v1439_v57 = vperm.slane %v1433_v41, %v3724_v14  ;;  %v1446_v43 = vrot.slane %v1427_v15, 4  ;;  %1600 = vmatpush.msrb.mxu2 %v1575_v7  ;;  %v1624_v40 = vld [vmem:[#allocation5 + $0xc8] sm:$0xff] }
 0x4da   :  { %1472 = vrot.lane.b32.xlu2 %v1451_v36, %s3633_s25  ;;  %1629 = vmatpush.msrb.mxu3 %v1625_v37 }
 0x4db   :  { %v1449_v44 = vsel %vm178_vm8, %v1448_v42, %v1431_v25  ;;  %v1444_v45 = vrot.slane %v1439_v57, 4  ;;  %v1447_v47 = vsel %vm178_vm8, %v1439_v57, %v1446_v43  ;;  %1601 = vmatpush.msrb.mxu2 %v1574_v20  ;;  %v1623_v42 = vld [vmem:[#allocation5 + $0xc0] sm:$0xff] }
 0x4dc   :  { %1464 = vrot.lane.b32.xlu0 %v1449_v44, %s3632_s24  ;;  %1456 = vrot.lane.b32.xlu1 %v1447_v47, %s3621_s18  ;;  %v1622_v44 = vld [vmem:[#allocation5 + $0xb8] sm:$0xff]  ;;  %v1621_v47 = vld [vmem:[#allocation5 + $0xb0] sm:$0xff] }
 0x4dd   :  { %v1445_v52 = vsel %vm178_vm8, %v1444_v45, %v1427_v15  ;;  %1630 = vmatpush.msrb.mxu3 %v1624_v40 }
 0x4df   :  { %1631 = vmatpush.msrb.mxu3 %v1623_v42  ;;  %v1712_v42 = vld [vmem:[#allocation5 + $0x108] sm:$0xff] }
 0x4e0   :  { %1733 = vmatpush.msra.mxu0 %v1712_v42 }
 0x4e1   :  { %1632 = vmatpush.msrb.mxu3 %v1622_v44 }
 0x4e3   :  { %1633 = vmatpush.msrb.mxu3 %v1621_v47 }
 0x4e5   :  { %1634 = vmatpush.msrb.mxu3 %v1620_v49 }
 0x525   :  { %v1463_v54 = vpop.permute.xlu2 %1462 }
 0x534   :  { %v1473_v0 = vpop.permute.xlu2 %1472 }
 0x53d   :  { %v1471_v46 = vpop.permute.xlu0 %1470 }
 0x540   :  { %v1455_v56 = vpop.permute.xlu1 %1454 }
 0x541   :  { %v1476_v62 = vsel %vm886_vm9, %v1391_v2, %v1455_v56  ;;  %v3440_v56 = vld [vmem:[#allocation5 + $0xe5] ss:$0 sm:$0xff] }
 0x542   :  { %v1478_v63 = vsel %vm1027_vm13, %v1476_v62, %v1463_v54  ;;  %v1619_v54 = vld [vmem:[#allocation5 + $0xa0] sm:$0xff] }
 0x543   :  { %v1481_v1 = vsel %vm1480_vm2, %v1478_v63, %v1471_v46  ;;  %v1618_v63 = vld [vmem:[#allocation5 + $0x98] sm:$0xff]  ;;  %1635 = vmatpush.msrb.mxu3 %v1619_v54 }
 0x544   :  { %3339 = vmatmul.msk.f32.vlgmr.msrb.gmra.mxu1 %vm64_vm0, %v1481_v1 }
 0x545   :  { %1636 = vmatpush.msrb.mxu3 %v1618_v63 }
 0x54e   :  { %v1465_v4 = vpop.permute.xlu0 %1464  ;;  %v1457_v59 = vpop.permute.xlu1 %1456 }
 0x54f   :  { %v1477_v61 = vsel %vm886_vm9, %v1445_v52, %v1457_v59  ;;  %v1617_v59 = vld [vmem:[#allocation5 + $0x90] sm:$0xff] }
 0x550   :  { %v1479_v5 = vsel %vm1027_vm13, %v1477_v61, %v1465_v4  ;;  %1637 = vmatpush.msrb.mxu3 %v1617_v59 }
 0x551   :  { %v1482_v16 = vsel %vm1480_vm2, %v1479_v5, %v1473_v0  ;;  %v1616_v0 = vld [vmem:[#allocation5 + $0x88] sm:$0xff] }
 0x552   :  { %3340 = vmatmul.msk.f32.gmra.mxu1 %vm64_vm0, %v1482_v16  ;;  %v1615_v16 = vld [vmem:[#allocation5 + $0x80] sm:$0xff]  ;;  %1638 = vmatpush.msrb.mxu3 %v1616_v0 }
 0x554   :  { %1639 = vmatpush.msrb.mxu3 %v1615_v16 }
 0x5c1   :  { %v1511_v58 = vpop.f32.mrf.mxu1 }
 0x5c2   :  { %v1517_v17 = vadd.f32 %v3539_v9, %v1511_v58  ;;  %v1614_v58 = vld [vmem:[#allocation5 + $0x78] sm:$0xff] }
 0x5c3   :  { %1640 = vmatpush.msrb.mxu3 %v1614_v58 }
 0x5c4   :  { %v4223_v60 = vadd.f32 %v3438_v33, %v1517_v17 }
 0x5c6   :  { %v1524_v6 = vsel %vm64_vm0, %v4223_v60, 0.0 }
 0x5c7   :  { %1525 = vadd.xlane.f32.xlu1 %v1524_v6 }
 0x5cf   :  { %v1514_v2 = vpop.f32.mrf.mxu1 }
 0x5d0   :  { %v1518_v12 = vadd.f32 %v3540_v50, %v1514_v2 }
 0x5d2   :  { %v4227_v19 = vadd.f32 %v3438_v33, %v1518_v12  ;;  %v1613_v12 = vld [vmem:[#allocation5 + $0x70] sm:$0xff] }
 0x5d3   :  { %1641 = vmatpush.msrb.mxu3 %v1613_v12 }
 0x5d4   :  { %v1527_v21 = vsel %vm64_vm0, %v4227_v19, 0.0 }
 0x5d5   :  { %1528 = vadd.xlane.f32.xlu0 %v1527_v21  ;;  %v1612_v21 = vld [vmem:[#allocation5 + $0x68] sm:$0xff] }
 0x5d6   :  { %1642 = vmatpush.msrb.mxu3 %v1612_v21 }
 0x63a   :  { %v1526_v22 = vpop.xlane.xlu1 %1525 }
 0x63b   :  { %v1530_v23 = vmul.f32 %v1526_v22, %v3664_v10  ;;  %v1611_v22 = vld [vmem:[#allocation5 + $0x60] sm:$0xff] }
 0x63c   :  { %1643 = vmatpush.msrb.mxu3 %v1611_v22 }
 0x63d   :  { %v1532_v24 = vsub.f32 %v4223_v60, %v1530_v23  ;;  %v3441_v23 = vld [vmem:[#allocation5 + $0xe1] ss:$0 sm:$0xff] }
 0x63f   :  { %v1534_v26 = vmul.f32 %v1532_v24, %v1532_v24 }
 0x641   :  { %v1536_v11 = vsel %vm64_vm0, %v1534_v26, 0.0 }
 0x642   :  { %1537 = vadd.xlane.f32.xlu2 %v1536_v11 }
 0x648   :  { %v1529_v27 = vpop.xlane.xlu0 %1528 }
 0x649   :  { %v1531_v28 = vmul.f32 %v1529_v27, %v3664_v10 }
 0x64b   :  { %v4236_v39 = vsub.f32 %v4227_v19, %v1531_v28 }
 0x64d   :  { %v1535_v29 = vmul.f32 %v4236_v39, %v4236_v39 }
 0x64f   :  { %v1539_v18 = vsel %vm64_vm0, %v1535_v29, 0.0 }
 0x650   :  { %1540 = vadd.xlane.f32.xlu1 %v1539_v18 }
 0x6b5   :  { %v1538_v13 = vpop.xlane.xlu2 %1537 }
 0x6b6   :  { %v1542_v32 = vmul.f32 %v1538_v13, %v3664_v10 }
 0x6b8   :  { %v1544_v25 = vadd.f32 1e-05, %v1542_v32 }
 0x6ba   :  { %3491 = vrsqrt.f32 %v1544_v25  ;;  %vm1552_vm4 = vweird.f32 %v1544_v25 }
 0x6c0   :  { %v3492_v55 = vpop.eup %3491 }
 0x6c1   :  { %v1547_v38 = vmul.f32 %v3492_v55, %v1544_v25  ;;  %vm1553_vm3 = vweird.f32 %v3492_v55 }
 0x6c2   :  { %vm1554_vm5 = vmor %vm1552_vm4, %vm1553_vm3 }
 0x6c3   :  { %v1548_v15 = vmul.f32 %v3492_v55, %v1547_v38  ;;  %v1541_v41 = vpop.xlane.xlu1 %1540 }
 0x6c4   :  { %v1543_v36 = vmul.f32 %v1541_v41, %v3664_v10 }
 0x6c5   :  { %v1549_v57 = vmul.f32 0.5, %v1548_v15 }
 0x6c6   :  { %v1545_v43 = vadd.f32 1e-05, %v1543_v36 }
 0x6c7   :  { %v1550_v45 = vsub.f32 1.5, %v1549_v57  ;;  %v1711_v57 = vld [vmem:[#allocation5 + $0x100] sm:$0xff] }
 0x6c8   :  { %3493 = vrsqrt.f32 %v1545_v43  ;;  %vm1562_vm7 = vweird.f32 %v1545_v43  ;;  %1734 = vmatpush.msra.mxu0 %v1711_v57 }
 0x6c9   :  { %v1551_v52 = vmul.f32 %v3492_v55, %v1550_v45  ;;  %v1709_v45 = vld [vmem:[#allocation5 + $0xf0] sm:$0xff] }
 0x6cb   :  { %v1555_v51 = vsel %vm1554_vm5, %v3492_v55, %v1551_v52 }
 0x6cc   :  { %v1566_v53 = vmul.f32 %v1555_v51, %v1532_v24 }
 0x6ce   :  { %v3494_v62 = vpop.eup %3493  ;;  %v1569_v46 = vmul.f32 %v3439_v48, %v1566_v53 }
 0x6cf   :  { %v1557_v1 = vmul.f32 %v3494_v62, %v1545_v43  ;;  %vm1563_vm6 = vweird.f32 %v3494_v62  ;;  %v1710_v43 = vld [vmem:[#allocation5 + $0xf8] sm:$0xff] }
 0x6d0   :  { %v1572_v4 = vadd.f32 %v3440_v56, %v1569_v46  ;;  %vm1564_vm10 = vmor %vm1562_vm7, %vm1563_vm6  ;;  %1735 = vmatpush.msra.mxu0 %v1710_v43 }
 0x6d1   :  { %v1558_v61 = vmul.f32 %v3494_v62, %v1557_v1  ;;  %v3443_v1 = vld [vmem:[#allocation5 + $0x1d2] ss:$0 sm:$0xff] }
 0x6d2   :  { %3341 = vmatmul.msk.f32.vlgmr.msrb.gmra.mxu2 %vm64_vm0, %v1572_v4  ;;  %1736 = vmatpush.msra.mxu0 %v1709_v45 }
 0x6d3   :  { %v1559_v5 = vmul.f32 0.5, %v1558_v61  ;;  %v3444_v61 = vld [vmem:[#allocation5 + $0x1d3] ss:$0 sm:$0xff] }
 0x6d5   :  { %v1560_v33 = vsub.f32 1.5, %v1559_v5 }
 0x6d7   :  { %v1561_v9 = vmul.f32 %v3494_v62, %v1560_v33 }
 0x6d9   :  { %v1565_v17 = vsel %vm1564_vm10, %v3494_v62, %v1561_v9 }
 0x6da   :  { %v1567_v6 = vmul.f32 %v1565_v17, %v4236_v39  ;;  %v3442_v39 = vld [vmem:[#allocation5 + $0xe7] ss:$0 sm:$0xff] }
 0x6dc   :  { %v1570_v2 = vmul.f32 %v3439_v48, %v1567_v6 }
 0x6de   :  { %v1573_v50 = vadd.f32 %v3440_v56, %v1570_v2 }
 0x6e0   :  { %3342 = vmatmul.msk.f32.gmra.mxu2 %vm64_vm0, %v1573_v50 }
 0x755   :  { %v1603_v24 = vpop.f32.mrf.mxu2 }
 0x756   :  { %v1604_v26 = vadd.f32 %v3441_v23, %v1603_v24 }
 0x758   :  { %v1609_v11 = vmax.f32 %v1604_v26, 0.0 }
 0x75a   :  { %1644 = vmatmul.f32.vlgmr.msrb.gmra.mxu3 %v1609_v11 }
 0x763   :  { %v1606_v27 = vpop.f32.mrf.mxu2 }
 0x764   :  { %v1607_v28 = vadd.f32 %v3441_v23, %v1606_v27  ;;  %v3445_v23 = vld [vmem:[#allocation5 + $0x1d0] ss:$0 sm:$0xff] }
 0x766   :  { %v1610_v29 = vmax.f32 %v1607_v28, 0.0 }
 0x768   :  { %1647 = vmatmul.f32.gmra.mxu3 %v1610_v29 }
 0x7dd   :  { %v1645_v18 = vpop.f32.mrf.mxu3 }
 0x7de   :  { %v1651_v31 = vadd.f32 %v1645_v18, %v4223_v60 }
 0x7e0   :  { %v4247_v30 = vadd.f32 %v3442_v39, %v1651_v31 }
 0x7e2   :  { %v1659_v7 = vsel %vm64_vm0, %v4247_v30, 0.0 }
 0x7e3   :  { %1660 = vadd.xlane.f32.xlu0 %v1659_v7 }
 0x7eb   :  { %v1648_v13 = vpop.f32.mrf.mxu3 }
 0x7ec   :  { %v1652_v20 = vadd.f32 %v1648_v13, %v4227_v19 }
 0x7ee   :  { %v4252_v32 = vadd.f32 %v3442_v39, %v1652_v20 }
 0x7f0   :  { %v1662_v25 = vsel %vm64_vm0, %v4252_v32, 0.0 }
 0x7f1   :  { %1663 = vadd.xlane.f32.xlu2 %v1662_v25 }
 0x856   :  { %v1661_v55 = vpop.xlane.xlu0 %1660 }
 0x857   :  { %v1665_v35 = vmul.f32 %v1661_v55, %v3664_v10 }
 0x859   :  { %v1667_v60 = vsub.f32 %v4247_v30, %v1665_v35 }
 0x85b   :  { %v1669_v37 = vmul.f32 %v1667_v60, %v1667_v60 }
 0x85d   :  { %v1671_v38 = vsel %vm64_vm0, %v1669_v37, 0.0 }
 0x85e   :  { %1672 = vadd.xlane.f32.xlu1 %v1671_v38 }
 0x864   :  { %v1664_v40 = vpop.xlane.xlu2 %1663 }
 0x865   :  { %v1666_v15 = vmul.f32 %v1664_v40, %v3664_v10 }
 0x867   :  { %v1668_v19 = vsub.f32 %v4252_v32, %v1666_v15 }
 0x869   :  { %v1670_v41 = vmul.f32 %v1668_v19, %v1668_v19 }
 0x86b   :  { %v1674_v36 = vsel %vm64_vm0, %v1670_v41, 0.0 }
 0x86c   :  { %1675 = vadd.xlane.f32.xlu0 %v1674_v36 }
 0x8d1   :  { %v1673_v44 = vpop.xlane.xlu1 %1672 }
 0x8d2   :  { %v1677_v47 = vmul.f32 %v1673_v44, %v3664_v10 }
 0x8d4   :  { %v1679_v52 = vadd.f32 1e-05, %v1677_v47 }
 0x8d6   :  { %3495 = vrsqrt.f32 %v1679_v52  ;;  %vm1687_vm12 = vweird.f32 %v1679_v52 }
 0x8dc   :  { %v3496_v48 = vpop.eup %3495 }
 0x8dd   :  { %v1682_v49 = vmul.f32 %v3496_v48, %v1679_v52  ;;  %vm1688_vm11 = vweird.f32 %v3496_v48 }
 0x8de   :  { %vm1689_vm14 = vmor %vm1687_vm12, %vm1688_vm11 }
 0x8df   :  { %v1683_v51 = vmul.f32 %v3496_v48, %v1682_v49  ;;  %v1676_v53 = vpop.xlane.xlu0 %1675 }
 0x8e0   :  { %v1678_v56 = vmul.f32 %v1676_v53, %v3664_v10 }
 0x8e1   :  { %v1684_v54 = vmul.f32 0.5, %v1683_v51 }
 0x8e2   :  { %v1680_v62 = vadd.f32 1e-05, %v1678_v56 }
 0x8e3   :  { %v1685_v46 = vsub.f32 1.5, %v1684_v54 }
 0x8e4   :  { %3497 = vrsqrt.f32 %v1680_v62  ;;  %vm1697_vm1 = vweird.f32 %v1680_v62 }
 0x8e5   :  { %v1686_v63 = vmul.f32 %v3496_v48, %v1685_v46 }
 0x8e7   :  { %v1690_v4 = vsel %vm1689_vm14, %v3496_v48, %v1686_v63 }
 0x8e8   :  { %v1701_v59 = vmul.f32 %v1690_v4, %v1667_v60 }
 0x8ea   :  { %v3498_v0 = vpop.eup %3497  ;;  %v1704_v5 = vmul.f32 %v3443_v1, %v1701_v59 }
 0x8eb   :  { %v1692_v16 = vmul.f32 %v3498_v0, %v1680_v62  ;;  %vm1698_vm15 = vweird.f32 %v3498_v0 }
 0x8ec   :  { %v1707_v33 = vadd.f32 %v3444_v61, %v1704_v5  ;;  %vm1699_vm3 = vmor %vm1697_vm1, %vm1698_vm15 }
 0x8ed   :  { %v1693_v58 = vmul.f32 %v3498_v0, %v1692_v16 }
 0x8ee   :  { %3343 = vmatmul.msk.f32.vlgmr.msra.gmra.mxu0 %vm64_vm0, %v1707_v33 }
 0x8ef   :  { %v1694_v9 = vmul.f32 0.5, %v1693_v58 }
 0x8f1   :  { %v1695_v17 = vsub.f32 1.5, %v1694_v9 }
 0x8f3   :  { %v1696_v6 = vmul.f32 %v3498_v0, %v1695_v17 }
 0x8f5   :  { %v1700_v2 = vsel %vm1699_vm3, %v3498_v0, %v1696_v6 }
 0x8f6   :  { %v1702_v50 = vmul.f32 %v1700_v2, %v1668_v19 }
 0x8f8   :  { %v1705_v12 = vmul.f32 %v3443_v1, %v1702_v50 }
 0x8fa   :  { %v1708_v21 = vadd.f32 %v3444_v61, %v1705_v12 }
 0x8fc   :  { %3344 = vmatmul.msk.f32.gmra.mxu0 %vm64_vm0, %v1708_v21 }
 0x96b   :  { %v1738_v22 = vpop.f32.mrf.mxu0 }
 0x96c   :  { %v4269_v11 = vadd.f32 %v3445_v23, %v1738_v22 }
 0x979   :  { %v1741_v24 = vpop.f32.mrf.mxu0 }
 0x97a   :  { %v1742_v26 = vadd.f32 %v3445_v23, %v1741_v24 }
 0x97c   :  { %1760 = vrot.lane.b32.xlu0 %v1742_v26, %s3626_s21  ;;  %1754 = vrot.lane.b32.xlu1 %v1742_v26, %s3624_s0  ;;  %v1822_v29 = vrot.slane %v1742_v26, 4  ;;  %v3415_v0 = vpack.i.bf16 %v4269_v11, %v1742_v26 }
 0x97d   :  { %1748 = vrot.lane.b32.xlu2 %v1742_v26, %s3625_s1 }
 0x984   :  { %1752 = vrot.lane.b32.xlu0 %v4269_v11, %s3624_s0  ;;  %1758 = vrot.lane.b32.xlu1 %v4269_v11, %s3626_s21 }
 0x985   :  { %1746 = vrot.lane.b32.xlu2 %v4269_v11, %s3625_s1 }
 0x98d   :  { %1984 = vrot.lane.b32.xlu2 %v4269_v11, %s3627_s22 }
 0x995   :  { %1986 = vrot.lane.b32.xlu2 %v1742_v26, %s3627_s22 }
 0x9d7   :  { %v4280_v27 = vpop.permute.xlu2 %1748 }
 0x9d8   :  { %1990 = vrot.lane.b32.xlu0 %v4280_v27, %s3627_s22  ;;  %v1834_v28 = vrot.slane %v4280_v27, 4 }
 0x9df   :  { %v4318_v49 = vpop.permute.xlu2 %1746 }
 0x9ee   :  { %v4285_v39 = vpop.permute.xlu0 %1760  ;;  %v4287_v18 = vpop.permute.xlu1 %1754 }
 0x9ef   :  { %v1832_v31 = vrot.slane %v4285_v39, 4  ;;  %v1835_v7 = vsel %vm178_vm8, %v4285_v39, %v1834_v28  ;;  %v1820_v13 = vrot.slane %v4287_v18, 4  ;;  %v1823_v20 = vsel %vm178_vm8, %v4287_v18, %v1822_v29  ;;  %1994 = vrot.lane.b32.xlu1 %v4287_v18, %s3627_s22  ;;  %1998 = vrot.lane.b32.xlu0 %v4285_v39, %s3627_s22 }
 0x9f0   :  { %v1843_v25 = vperm.slane %v1835_v7, %v3710_v3  ;;  %v1831_v55 = vperm.slane %v1823_v20, %v3710_v3  ;;  %v3420_v35 = vpack.i.bf16 %v4287_v18, %v4280_v27 }
 0x9f1   :  { %v1833_v60 = vsel %vm178_vm8, %v1832_v31, %v4280_v27  ;;  %v1821_v37 = vsel %vm178_vm8, %v1820_v13, %v1742_v26 }
 0x9f2   :  { %v1839_v38 = vperm.slane %v1833_v60, %v3710_v3  ;;  %v1856_v40 = vrot.slane %v1843_v25, 4  ;;  %v1827_v15 = vperm.slane %v1821_v37, %v3710_v3  ;;  %v1858_v19 = vrot.slane %v1831_v55, 4 }
 0x9f4   :  { %v1844_v41 = vrot.slane %v1839_v38, 4  ;;  %v1846_v36 = vrot.slane %v1827_v15, 4  ;;  %v1857_v42 = vsel %vm178_vm8, %v1856_v40, %v1831_v55  ;;  %v1859_v57 = vsel %vm178_vm8, %v1843_v25, %v1858_v19 }
 0x9f5   :  { %v1863_v43 = vperm.slane %v1857_v42, %v3724_v14  ;;  %v1867_v44 = vperm.slane %v1859_v57, %v3724_v14 }
 0x9f6   :  { %v1845_v45 = vsel %vm178_vm8, %v1844_v41, %v1827_v15  ;;  %v1847_v47 = vsel %vm178_vm8, %v1839_v38, %v1846_v36  ;;  %v4314_v52 = vpop.permute.xlu0 %1752  ;;  %v4316_v48 = vpop.permute.xlu1 %1758  ;;  %v1766_v41 = vrot.slane %v4269_v11, 4 }
 0x9f7   :  { %v1872_v51 = vrot.slane %v1863_v43, 4  ;;  %v1874_v53 = vrot.slane %v1867_v44, 4  ;;  %1992 = vrot.lane.b32.xlu2 %v4314_v52, %s3627_s22  ;;  %1996 = vrot.lane.b32.xlu0 %v4316_v48, %s3627_s22  ;;  %v1851_v56 = vperm.slane %v1845_v45, %v3724_v14  ;;  %v1855_v54 = vperm.slane %v1847_v47, %v3724_v14 }
 0x9f8   :  { %1988 = vrot.lane.b32.xlu1 %v4318_v49, %s3627_s22  ;;  %v1767_v36 = vsel %vm178_vm8, %v4314_v52, %v1766_v41  ;;  %v1764_v42 = vrot.slane %v4314_v52, 4  ;;  %v1776_v44 = vrot.slane %v4316_v48, 4 }
 0x9f9   :  { %v1875_v62 = vsel %vm178_vm8, 0.0, %v1874_v53  ;;  %v1873_v63 = vsel %vm178_vm8, 0.0, %v1872_v51  ;;  %v1868_v1 = vrot.slane %v1851_v56, 4  ;;  %v1870_v4 = vrot.slane %v1855_v54, 4 }
 0x9fa   :  { %v1946_v46 = vrot.slane %v1875_v62, 4  ;;  %v1941_v59 = vsel %vm178_vm8, %v1874_v53, %v1863_v43  ;;  %v1775_v57 = vperm.slane %v1767_v36, %v3710_v3  ;;  %v1778_v43 = vrot.slane %v4318_v49, 4  ;;  %v1985_v53 = vpop.permute.xlu2 %1984 }
 0x9fb   :  { %v1871_v5 = vsel %vm178_vm8, 0.0, %v1870_v4  ;;  %v1930_v16 = vsel %vm178_vm8, %v1870_v4, %v1851_v56  ;;  %v1869_v9 = vsel %vm178_vm8, 0.0, %v1868_v1  ;;  %v1945_v6 = vperm.slane %v1941_v59, %v3710_v3 }
 0x9fc   :  { %v1947_v61 = vsel %vm178_vm8, %v1946_v46, %v1873_v63  ;;  %v1934_v33 = vperm.slane %v1930_v16, %v3710_v3  ;;  %v1935_v58 = vrot.slane %v1871_v5, 4  ;;  %v1765_v45 = vsel %vm178_vm8, %v1764_v42, %v4269_v11 }
 0x9fd   :  { %v1951_v50 = vperm.slane %v1947_v61, %v3710_v3  ;;  %v1966_v21 = vrot.slane %v1945_v6, 4  ;;  %v1779_v47 = vsel %vm178_vm8, %v4316_v48, %v1778_v43  ;;  %v1802_v51 = vrot.slane %v1775_v57, 4 }
 0x9fe   :  { %v1936_v17 = vsel %vm178_vm8, %v1935_v58, %v1869_v9  ;;  %v1954_v2 = vrot.slane %v1934_v33, 4  ;;  %v1771_v56 = vperm.slane %v1765_v45, %v3710_v3  ;;  %v1777_v54 = vsel %vm178_vm8, %v1776_v44, %v4318_v49 }
 0x9ff   :  { %3416 = vrot.lane.b32.xlu0 %v3415_v0, %s3630_s23  ;;  %v1940_v12 = vperm.slane %v1936_v17, %v3710_v3  ;;  %v1967_v24 = vsel %vm178_vm8, %v1951_v50, %v1966_v21  ;;  %v1964_v29 = vrot.slane %v1951_v50, 4  ;;  %v1787_v62 = vperm.slane %v1779_v47, %v3710_v3 }
 0xa00   :  { %v1975_v26 = vperm.slane %v1967_v24, %v3724_v14  ;;  %v1783_v46 = vperm.slane %v1777_v54, %v3710_v3  ;;  %v1790_v1 = vrot.slane %v1771_v56, 4 }
 0xa01   :  { %v1955_v22 = vsel %vm178_vm8, %v1940_v12, %v1954_v2  ;;  %v1952_v28 = vrot.slane %v1940_v12, 4  ;;  %v1965_v55 = vsel %vm178_vm8, %v1964_v29, %v1945_v6  ;;  %v1803_v63 = vsel %vm178_vm8, %v1787_v62, %v1802_v51 }
 0xa02   :  { %v1963_v23 = vperm.slane %v1955_v22, %v3724_v14  ;;  %v1980_v31 = vrot.slane %v1975_v26, 4  ;;  %v1971_v38 = vperm.slane %v1965_v55, %v3724_v14  ;;  %v1800_v4 = vrot.slane %v1787_v62, 4  ;;  %v1987_v5 = vpop.permute.xlu2 %1986 }
 0xa03   :  { %v1953_v7 = vsel %vm178_vm8, %v1952_v28, %v1934_v33  ;;  %v1811_v11 = vperm.slane %v1803_v63, %v3724_v14  ;;  %v1788_v59 = vrot.slane %v1783_v46, 4  ;;  %v1791_v61 = vsel %vm178_vm8, %v1783_v46, %v1790_v1 }
 0xa04   :  { %v1982_v13 = vrot.slane %v1963_v23, 4  ;;  %v1959_v20 = vperm.slane %v1953_v7, %v3724_v14  ;;  %v4349_v25 = vsel %vm178_vm8, %v1980_v31, %v1963_v23  ;;  %v1976_v40 = vrot.slane %v1971_v38, 4 }
 0xa05   :  { %v1801_v0 = vsel %vm178_vm8, %v1800_v4, %v1775_v57  ;;  %v1818_v16 = vrot.slane %v1811_v11, 4  ;;  %v1789_v33 = vsel %vm178_vm8, %v1788_v59, %v1771_v56  ;;  %v1799_v58 = vperm.slane %v1791_v61, %v3724_v14 }
 0xa06   :  { %v1978_v60 = vrot.slane %v1959_v20, 4  ;;  %v4353_v37 = vsel %vm178_vm8, %v1975_v26, %v1982_v13  ;;  %v4360_v19 = vsel %vm178_vm8, %v1976_v40, %v1959_v20  ;;  %v1807_v9 = vperm.slane %v1801_v0, %v3724_v14 }
 0xa07   :  { %v1795_v17 = vperm.slane %v1789_v33, %v3724_v14  ;;  %v1819_v6 = vsel %vm178_vm8, 0.0, %v1818_v16  ;;  %v1814_v50 = vrot.slane %v1799_v58, 4  ;;  %v2066_v29 = vrot.slane %v1987_v5, 4 }
 0xa08   :  { %v4357_v15 = vsel %vm178_vm8, %v1971_v38, %v1978_v60  ;;  %v1816_v12 = vrot.slane %v1807_v9, 4  ;;  %v1892_v21 = vrot.slane %v1819_v6, 4  ;;  %v1887_v23 = vsel %vm178_vm8, %v1818_v16, %v1807_v9 }
 0xa09   :  { %v1812_v22 = vrot.slane %v1795_v17, 4  ;;  %v1815_v26 = vsel %vm178_vm8, 0.0, %v1814_v50  ;;  %v1876_v28 = vsel %vm178_vm8, %v1814_v50, %v1795_v17  ;;  %v4392_v7 = vperm.slane %v1887_v23, %v3710_v3 }
 0xa0a   :  { %v1817_v31 = vsel %vm178_vm8, 0.0, %v1816_v12  ;;  %v2010_v60 = vrot.slane %v1985_v53, 4  ;;  %v1881_v38 = vrot.slane %v1815_v26, 4  ;;  %v4397_v42 = vperm.slane %v1876_v28, %v3710_v3 }
 0xa0b   :  { %v1893_v55 = vsel %vm178_vm8, %v1892_v21, %v1817_v31  ;;  %v1813_v36 = vsel %vm178_vm8, 0.0, %v1812_v22  ;;  %v1912_v1 = vrot.slane %v4392_v7, 4 }
 0xa0c   :  { %v4405_v54 = vperm.slane %v1893_v55, %v3710_v3  ;;  %v1882_v16 = vsel %vm178_vm8, %v1881_v38, %v1813_v36 }
 0xa0d   :  { %v4424_v22 = vperm.slane %v1882_v16, %v3710_v3 }
 0xa0e   :  { %v1913_v23 = vsel %vm178_vm8, %v4405_v54, %v1912_v1 }
 0xa4a   :  { %v1991_v2 = vpop.permute.xlu0 %1990 }
 0xa4b   :  { %v2078_v13 = vrot.slane %v1991_v2, 4 }
 0xa51   :  { %v1993_v24 = vpop.permute.xlu2 %1992 }
 0xa52   :  { %v2008_v20 = vrot.slane %v1993_v24, 4  ;;  %v2011_v47 = vsel %vm178_vm8, %v1993_v24, %v2010_v60  ;;  %v1910_v60 = vrot.slane %v4405_v54, 4 }
 0xa53   :  { %v2019_v0 = vperm.slane %v2011_v47, %v3710_v3 }
 0xa54   :  { %v2009_v62 = vsel %vm178_vm8, %v2008_v20, %v1985_v53 }
 0xa55   :  { %v2015_v9 = vperm.slane %v2009_v62, %v3710_v3 }
 0xa57   :  { %v2034_v38 = vrot.slane %v2015_v9, 4 }
 0xa61   :  { %v1995_v40 = vpop.permute.xlu1 %1994  ;;  %v1999_v41 = vpop.permute.xlu0 %1998 }
 0xa62   :  { %v2064_v57 = vrot.slane %v1995_v40, 4  ;;  %v2067_v43 = vsel %vm178_vm8, %v1995_v40, %v2066_v29  ;;  %v2076_v44 = vrot.slane %v1999_v41, 4  ;;  %v2079_v45 = vsel %vm178_vm8, %v1999_v41, %v2078_v13 }
 0xa63   :  { %v2075_v51 = vperm.slane %v2067_v43, %v3710_v3  ;;  %v2087_v56 = vperm.slane %v2079_v45, %v3710_v3  ;;  %v2046_v13 = vrot.slane %v2019_v0, 4 }
 0xa64   :  { %v2065_v46 = vsel %vm178_vm8, %v2064_v57, %v1987_v5  ;;  %v2077_v63 = vsel %vm178_vm8, %v2076_v44, %v1991_v2  ;;  %v1900_v2 = vrot.slane %v4397_v42, 4 }
 0xa65   :  { %v2071_v4 = vperm.slane %v2065_v46, %v3710_v3  ;;  %v2102_v11 = vrot.slane %v2075_v51, 4  ;;  %v2083_v59 = vperm.slane %v2077_v63, %v3710_v3  ;;  %v2100_v61 = vrot.slane %v2087_v56, 4 }
 0xa67   :  { %v2090_v33 = vrot.slane %v2071_v4, 4  ;;  %v2088_v58 = vrot.slane %v2083_v59, 4  ;;  %v2101_v53 = vsel %vm178_vm8, %v2100_v61, %v2075_v51  ;;  %v2103_v5 = vsel %vm178_vm8, %v2087_v56, %v2102_v11 }
 0xa68   :  { %v2107_v17 = vperm.slane %v2101_v53, %v3724_v14  ;;  %v2111_v6 = vperm.slane %v2103_v5, %v3724_v14  ;;  %v1898_v61 = vrot.slane %v4424_v22, 4 }
 0xa69   :  { %v2089_v50 = vsel %vm178_vm8, %v2088_v58, %v2071_v4  ;;  %v2091_v12 = vsel %vm178_vm8, %v2083_v59, %v2090_v33  ;;  %v1997_v21 = vpop.permute.xlu0 %1996 }
 0xa6a   :  { %v2095_v24 = vperm.slane %v2089_v50, %v3724_v14  ;;  %v2099_v26 = vperm.slane %v2091_v12, %v3724_v14  ;;  %v2116_v28 = vrot.slane %v2107_v17, 4  ;;  %v2118_v29 = vrot.slane %v2111_v6, 4  ;;  %v1989_v31 = vpop.permute.xlu1 %1988 }
 0xa6b   :  { %v2020_v20 = vrot.slane %v1997_v21, 4  ;;  %v2022_v55 = vrot.slane %v1989_v31, 4  ;;  %v4451_v50 = vperm.slane %v1913_v23, %v3724_v14  ;;  %v1899_v23 = vsel %vm178_vm8, %v1898_v61, %v4397_v42 }
 0xa6c   :  { %v2112_v40 = vrot.slane %v2095_v24, 4  ;;  %v2114_v41 = vrot.slane %v2099_v26, 4  ;;  %v2119_v36 = vsel %vm178_vm8, 0.0, %v2118_v29  ;;  %v2185_v57 = vsel %vm178_vm8, %v2118_v29, %v2107_v17 }
 0xa6d   :  { %v2190_v43 = vrot.slane %v2119_v36, 4  ;;  %v2021_v44 = vsel %vm178_vm8, %v2020_v20, %v1989_v31  ;;  %v2023_v45 = vsel %vm178_vm8, %v1997_v21, %v2022_v55  ;;  %v2117_v51 = vsel %vm178_vm8, 0.0, %v2116_v28 }
 0xa6e   :  { %v2115_v47 = vsel %vm178_vm8, 0.0, %v2114_v41  ;;  %v2174_v56 = vsel %vm178_vm8, %v2114_v41, %v2095_v24  ;;  %v2189_v54 = vperm.slane %v2185_v57, %v3710_v3  ;;  %v2027_v63 = vperm.slane %v2021_v44, %v3710_v3 }
 0xa6f   :  { %v2179_v62 = vrot.slane %v2115_v47, 4  ;;  %v2191_v46 = vsel %vm178_vm8, %v2190_v43, %v2117_v51  ;;  %v2031_v1 = vperm.slane %v2023_v45, %v3710_v3  ;;  %v2178_v59 = vperm.slane %v2174_v56, %v3710_v3 }
 0xa70   :  { %v2195_v4 = vperm.slane %v2191_v46, %v3710_v3  ;;  %v2210_v11 = vrot.slane %v2189_v54, 4  ;;  %v2032_v16 = vrot.slane %v2027_v63, 4  ;;  %v2035_v33 = vsel %vm178_vm8, %v2027_v63, %v2034_v38 }
 0xa71   :  { %v2044_v58 = vrot.slane %v2031_v1, 4  ;;  %v2047_v53 = vsel %vm178_vm8, %v2031_v1, %v2046_v13  ;;  %v2113_v5 = vsel %vm178_vm8, 0.0, %v2112_v40  ;;  %v2043_v17 = vperm.slane %v2035_v33, %v3724_v14 }
 0xa72   :  { %v2055_v6 = vperm.slane %v2047_v53, %v3724_v14  ;;  %v2033_v12 = vsel %vm178_vm8, %v2032_v16, %v2015_v9  ;;  %v2180_v24 = vsel %vm178_vm8, %v2179_v62, %v2113_v5  ;;  %v2198_v26 = vrot.slane %v2178_v59, 4 }
 0xa73   :  { %v2045_v21 = vsel %vm178_vm8, %v2044_v58, %v2019_v0  ;;  %v2039_v28 = vperm.slane %v2033_v12, %v3724_v14  ;;  %v2058_v31 = vrot.slane %v2043_v17, 4  ;;  %v2184_v20 = vperm.slane %v2180_v24, %v3710_v3 }
 0xa74   :  { %v2051_v29 = vperm.slane %v2045_v21, %v3724_v14  ;;  %v2062_v13 = vrot.slane %v2055_v6, 4  ;;  %v2211_v55 = vsel %vm178_vm8, %v2195_v4, %v2210_v11  ;;  %v1911_v9 = vsel %vm178_vm8, %v1910_v60, %v4392_v7 }
 0xa75   :  { %v2056_v0 = vrot.slane %v2039_v28, 4  ;;  %v2059_v38 = vsel %vm178_vm8, 0.0, %v2058_v31  ;;  %v2120_v36 = vsel %vm178_vm8, %v2058_v31, %v2039_v28  ;;  %v2199_v51 = vsel %vm178_vm8, %v2184_v20, %v2198_v26 }
 0xa76   :  { %v2060_v40 = vrot.slane %v2051_v29, 4  ;;  %v2063_v41 = vsel %vm178_vm8, 0.0, %v2062_v13  ;;  %v2125_v57 = vrot.slane %v2059_v38, 4  ;;  %v2131_v43 = vsel %vm178_vm8, %v2062_v13, %v2051_v29 }
 0xa77   :  { %v2136_v44 = vrot.slane %v2063_v41, 4  ;;  %v2057_v45 = vsel %vm178_vm8, 0.0, %v2056_v0  ;;  %v2124_v47 = vperm.slane %v2120_v36, %v3710_v3  ;;  %v2219_v7 = vperm.slane %v2211_v55, %v3724_v14 }
 0xa78   :  { %v2207_v60 = vperm.slane %v2199_v51, %v3724_v14  ;;  %v2196_v56 = vrot.slane %v2184_v20, 4  ;;  %v2208_v62 = vrot.slane %v2195_v4, 4  ;;  %v2061_v46 = vsel %vm178_vm8, 0.0, %v2060_v40 }
 0xa79   :  { %v2224_v63 = vrot.slane %v2219_v7, 4  ;;  %v2126_v1 = vsel %vm178_vm8, %v2125_v57, %v2057_v45  ;;  %v2135_v11 = vperm.slane %v2131_v43, %v3710_v3  ;;  %v2137_v61 = vsel %vm178_vm8, %v2136_v44, %v2061_v46 }
 0xa7a   :  { %v2197_v16 = vsel %vm178_vm8, %v2196_v56, %v2178_v59  ;;  %v2209_v33 = vsel %vm178_vm8, %v2208_v62, %v2189_v54  ;;  %v2130_v58 = vperm.slane %v2126_v1, %v3710_v3  ;;  %v2141_v53 = vperm.slane %v2137_v61, %v3710_v3 }
 0xa7b   :  { %v2225_v5 = vsel %vm178_vm8, %v2224_v63, %v2207_v60  ;;  %v2203_v4 = vperm.slane %v2197_v16, %v3724_v14  ;;  %v2215_v17 = vperm.slane %v2209_v33, %v3724_v14  ;;  %v2144_v6 = vrot.slane %v2124_v47, 4 }
 0xa7c   :  { %3353 = vmatpush.xpose.msk.msrb.mxu0 %vm886_vm9, %v2225_v5  ;;  %v2156_v12 = vrot.slane %v2135_v11, 4  ;;  %v2142_v21 = vrot.slane %v2130_v58, 4  ;;  %v2154_v24 = vrot.slane %v2141_v53, 4  ;;  %v1901_v54 = vsel %vm178_vm8, %v4424_v22, %v1900_v2 }
 0xa7d   :  { %v2220_v59 = vrot.slane %v2215_v17, 4  ;;  %v2222_v26 = vrot.slane %v2203_v4, 4  ;;  %v1905_v28 = vperm.slane %v1899_v23, %v3724_v14  ;;  %v1917_v29 = vperm.slane %v1911_v9, %v3724_v14 }
 0xa7e   :  { %v2145_v31 = vsel %vm178_vm8, %v2130_v58, %v2144_v6  ;;  %v2157_v13 = vsel %vm178_vm8, %v2141_v53, %v2156_v12  ;;  %v2143_v20 = vsel %vm178_vm8, %v2142_v21, %v2124_v47  ;;  %v2155_v55 = vsel %vm178_vm8, %v2154_v24, %v2135_v11 }
 0xa7f   :  { %v2221_v0 = vsel %vm178_vm8, %v2220_v59, %v2203_v4  ;;  %v2223_v42 = vsel %vm178_vm8, %v2215_v17, %v2222_v26  ;;  %v2165_v2 = vperm.slane %v2157_v13, %v3724_v14  ;;  %v2149_v22 = vperm.slane %v2143_v20, %v3724_v14 }
 0xa80   :  { %3345 = vmatpush.xpose.msk.msra.mxu1 %vm886_vm9, %v2221_v0  ;;  %3349 = vmatpush.xpose.msk.msra.mxu2 %vm886_vm9, %v2223_v42  ;;  %v2161_v23 = vperm.slane %v2155_v55, %v3724_v14  ;;  %v2153_v9 = vperm.slane %v2145_v31, %v3724_v14  ;;  %v2226_v41 = vrot.slane %v2207_v60, 4  ;;  %v1909_v57 = vperm.slane %v1901_v54, %v3724_v14  ;;  %v4558_v0 = vpop.permute.xlu0 %3416 }
 0xa81   :  { %v2170_v38 = vrot.slane %v2165_v2, 4  ;;  %v2168_v40 = vrot.slane %v2149_v22, 4  ;;  %v1926_v43 = vrot.slane %v4451_v50, 4  ;;  %v1924_v44 = vrot.slane %v1905_v28, 4 }
 0xa82   :  { %v2166_v36 = vrot.slane %v2161_v23, 4  ;;  %v1922_v51 = vrot.slane %v1917_v29, 4  ;;  %v2227_v60 = vsel %vm178_vm8, %v2219_v7, %v2226_v41  ;;  %v2172_v62 = vrot.slane %v2153_v9, 4 }
 0xa83   :  { %v2171_v45 = vsel %vm178_vm8, %v2170_v38, %v2153_v9  ;;  %v2169_v47 = vsel %vm178_vm8, %v2161_v23, %v2168_v40  ;;  %v1927_v46 = vsel %vm178_vm8, %v1926_v43, %v1909_v57  ;;  %v1925_v63 = vsel %vm178_vm8, %v1917_v29, %v1924_v44 }
 0xa84   :  { %3354 = vmatpush.xpose.msk.msrb.mxu0 %vm886_vm9, %v2171_v45  ;;  %v2167_v56 = vsel %vm178_vm8, %v2166_v36, %v2149_v22  ;;  %3350 = vmatpush.xpose.msk.msra.mxu2 %vm886_vm9, %v2169_v47  ;;  %v1923_v1 = vsel %vm178_vm8, %v1922_v51, %v1905_v28  ;;  %v2173_v11 = vsel %vm178_vm8, %v2165_v2, %v2172_v62  ;;  %v1928_v7 = vrot.slane %v1909_v57, 4 }
 0xa85   :  { %3346 = vmatpush.xpose.msk.msra.mxu1 %vm886_vm9, %v2167_v56  ;;  %v3430_v55 = vpack.i.bf16 %v4316_v48, %v4285_v39 }
 0xa86   :  { %v1929_v61 = vsel %vm178_vm8, %v4451_v50, %v1928_v7 }
 0xa87   :  { %3355 = vmatmul.msk.f32.vlgmr.msrb.gmra.mxu0 %vm886_vm9, %v1927_v46  ;;  %3351 = vmatmul.msk.f32.vlgmr.msra.gmra.mxu2 %vm886_vm9, %v1925_v63 }
 0xa88   :  { %3347 = vmatmul.msk.f32.vlgmr.msra.gmra.mxu1 %vm886_vm9, %v1923_v1 }
 0xa89   :  { %3357 = vmatpush.xpose.msk.msrb.mxu1 %vm886_vm9, %v2227_v60 }
 0xa8d   :  { %3358 = vmatpush.xpose.msk.msrb.mxu1 %vm886_vm9, %v2173_v11 }
 0xa8f   :  { %3356 = vmatmul.msk.f32.gmra.mxu0 %vm886_vm9, %v4349_v25  ;;  %3352 = vmatmul.msk.f32.gmra.mxu2 %vm886_vm9, %v4357_v15 }
 0xa90   :  { %3348 = vmatmul.msk.f32.gmra.mxu1 %vm886_vm9, %v4360_v19 }
 0xa98   :  { %3359 = vmatmul.msk.f32.vlgmr.msrb.gmra.mxu1 %vm886_vm9, %v1929_v61 }
 0xaa0   :  { %3360 = vmatmul.msk.f32.gmra.mxu1 %vm886_vm9, %v4353_v37 }
 0xb04   :  { %v2571_v16 = vpop.f32.mrf.mxu0 }
 0xb05   :  { %v2572_v33 = vadd.f32 %v2571_v16, %v3958_v8  ;;  %v2501_v58 = vpop.f32.mrf.mxu1 }
 0xb06   :  { %v2502_v25 = vadd.f32 %v2501_v58, %v3958_v8 }
 0xb07   :  { %v2624_v15 = vsel %vm1027_vm13, %v2572_v33, -inf }
 0xb08   :  { %2625 = vmax.xlane.f32.xlu0 %v2624_v15  ;;  %v2612_v19 = vsel %vm1027_vm13, %v2502_v25, -inf  ;;  %v3419_v15 = vunpack.i.h.bf16 %v4558_v0 }
 0xb09   :  { %2613 = vmax.xlane.f32.xlu1 %v2612_v19 }
 0xb0a   :  { %v2536_v53 = vpop.f32.mrf.mxu2 }
 0xb0b   :  { %v2537_v50 = vadd.f32 %v2536_v53, %v3958_v8 }
 0xb0c   :  { %v2574_v5 = vpop.f32.mrf.mxu0 }
 0xb0d   :  { %v2575_v4 = vadd.f32 %v2574_v5, %v3968_v34  ;;  %v2504_v17 = vpop.f32.mrf.mxu1  ;;  %v2618_v37 = vsel %vm1027_vm13, %v2537_v50, -inf  ;;  %v2254_v5 = vrot.slane %v3419_v15, 4 }
 0xb0e   :  { %2619 = vmax.xlane.f32.xlu2 %v2618_v37  ;;  %v2505_v12 = vadd.f32 %v2504_v17, %v3968_v34 }
 0xb0f   :  { %v2627_v6 = vsel %vm1027_vm13, %v2575_v4, -inf }
 0xb10   :  { %v2615_v26 = vsel %vm1027_vm13, %v2505_v12, -inf }
 0xb11   :  { %2628 = vmax.xlane.f32.xlu1 %v2627_v6 }
 0xb12   :  { %v2539_v21 = vpop.f32.mrf.mxu2 }
 0xb13   :  { %v2540_v24 = vadd.f32 %v2539_v21, %v3968_v34 }
 0xb15   :  { %v2606_v54 = vpop.f32.mrf.mxu1  ;;  %v2621_v59 = vsel %vm1027_vm13, %v2540_v24, -inf }
 0xb16   :  { %v2607_v28 = vadd.f32 %v2606_v54, %v3958_v8  ;;  %2622 = vmax.xlane.f32.xlu0 %v2621_v59  ;;  %2616 = vmax.xlane.f32.xlu2 %v2615_v26  ;;  %v3425_v8 = vpack.i.bf16 %v4314_v52, %v4318_v49  ;;  %v3418_v59 = vunpack.i.l.bf16 %v4558_v0 }
 0xb18   :  { %v2630_v29 = vsel %vm1027_vm13, %v2607_v28, -inf }
 0xb19   :  { %2631 = vmax.xlane.f32.xlu1 %v2630_v29 }
 0xb1d   :  { %v2609_v31 = vpop.f32.mrf.mxu1 }
 0xb1e   :  { %v2610_v13 = vadd.f32 %v2609_v31, %v3968_v34 }
 0xb20   :  { %v2633_v20 = vsel %vm1027_vm13, %v2610_v13, -inf }
 0xb21   :  { %2634 = vmax.xlane.f32.xlu2 %v2633_v20 }
 0xb2a   :  { %3431 = vrot.lane.b32.xlu0 %v3430_v55, %s3630_s23 }
 0xb32   :  { %3421 = vrot.lane.b32.xlu1 %v3420_v35, %s3630_s23 }
 0xb39   :  { %3426 = vrot.lane.b32.xlu2 %v3425_v8, %s3630_s23 }
 0xb7b   :  { %v2626_v34 = vpop.xlane.xlu0 %2625 }
 0xb7c   :  { %v2640_v42 = vsub.f32 %v2572_v33, %v2626_v34  ;;  %v2614_v2 = vpop.xlane.xlu1 %2613 }
 0xb7d   :  { %v2636_v22 = vsub.f32 %v2502_v25, %v2614_v2 }
 0xb7e   :  { %v2652_v23 = vmul.f32 1.442695, %v2640_v42 }
 0xb7f   :  { %v2644_v39 = vmul.f32 1.442695, %v2636_v22 }
 0xb80   :  { %3499 = vpow2.f32 %v2652_v23 }
 0xb81   :  { %3501 = vpow2.f32 %v2644_v39  ;;  %v2620_v48 = vpop.xlane.xlu2 %2619 }
 0xb82   :  { %v2638_v9 = vsub.f32 %v2537_v50, %v2620_v48 }
 0xb84   :  { %v2648_v38 = vmul.f32 1.442695, %v2638_v9  ;;  %v2629_v27 = vpop.xlane.xlu1 %2628  ;;  %v2310_v9 = vrot.slane %v3418_v59, 4 }
 0xb85   :  { %v2641_v60 = vsub.f32 %v2575_v4, %v2629_v27 }
 0xb86   :  { %v4560_v18 = vpop.eup %3499  ;;  %3503 = vpow2.f32 %v2648_v38 }
 0xb87   :  { %v4562_v35 = vpop.eup %3501  ;;  %v2672_v52 = vsel %vm1027_vm13, %v4560_v18, 0.0  ;;  %v2654_v46 = vmul.f32 1.442695, %v2641_v60 }
 0xb88   :  { %2673 = vadd.xlane.f32.xlu1 %v2672_v52  ;;  %v2660_v49 = vsel %vm1027_vm13, %v4562_v35, 0.0 }
 0xb89   :  { %2661 = vadd.xlane.f32.xlu0 %v2660_v49  ;;  %v2623_v40 = vpop.xlane.xlu0 %2622  ;;  %v2617_v41 = vpop.xlane.xlu2 %2616 }
 0xb8a   :  { %v2639_v36 = vsub.f32 %v2540_v24, %v2623_v40  ;;  %v2637_v57 = vsub.f32 %v2505_v12, %v2617_v41 }
 0xb8c   :  { %v4568_v43 = vpop.eup %3503  ;;  %v2650_v44 = vmul.f32 1.442695, %v2639_v36  ;;  %v2646_v45 = vmul.f32 1.442695, %v2637_v57  ;;  %v2632_v47 = vpop.xlane.xlu1 %2631 }
 0xb8d   :  { %v2642_v51 = vsub.f32 %v2607_v28, %v2632_v47  ;;  %v2666_v56 = vsel %vm1027_vm13, %v4568_v43, 0.0 }
 0xb8e   :  { %3505 = vpow2.f32 %v2650_v44  ;;  %2667 = vadd.xlane.f32.xlu2 %v2666_v56 }
 0xb8f   :  { %3507 = vpow2.f32 %v2646_v45  ;;  %v2656_v62 = vmul.f32 1.442695, %v2642_v51 }
 0xb91   :  { %3509 = vpow2.f32 %v2656_v62 }
 0xb92   :  { %3511 = vpow2.f32 %v2654_v46 }
 0xb94   :  { %v4572_v63 = vpop.eup %3505  ;;  %v2635_v1 = vpop.xlane.xlu2 %2634 }
 0xb95   :  { %v4574_v11 = vpop.eup %3507  ;;  %v2643_v7 = vsub.f32 %v2610_v13, %v2635_v1  ;;  %v2669_v61 = vsel %vm1027_vm13, %v4572_v63, 0.0 }
 0xb96   :  { %2670 = vadd.xlane.f32.xlu1 %v2669_v61  ;;  %v2663_v16 = vsel %vm1027_vm13, %v4574_v11, 0.0 }
 0xb97   :  { %v4580_v33 = vpop.eup %3509  ;;  %v2658_v58 = vmul.f32 1.442695, %v2643_v7  ;;  %2664 = vadd.xlane.f32.xlu0 %v2663_v16 }
 0xb98   :  { %v2678_v25 = vsel %vm1027_vm13, %v4580_v33, 0.0  ;;  %v4585_v50 = vpop.eup %3511 }
 0xb99   :  { %3513 = vpow2.f32 %v2658_v58  ;;  %2679 = vadd.xlane.f32.xlu2 %v2678_v25  ;;  %v2675_v28 = vsel %vm1027_vm13, %v4585_v50, 0.0 }
 0xb9c   :  { %v3427_v19 = vpop.permute.xlu2 %3426  ;;  %v3432_v53 = vpop.permute.xlu0 %3431 }
 0xb9d   :  { %v3429_v4 = vunpack.i.h.bf16 %v3427_v19  ;;  %v3428_v17 = vunpack.i.l.bf16 %v3427_v19  ;;  %v3434_v37 = vunpack.i.h.bf16 %v3432_v53  ;;  %v3433_v13 = vunpack.i.l.bf16 %v3432_v53 }
 0xb9f   :  { %v4587_v6 = vpop.eup %3513  ;;  %v2252_v12 = vrot.slane %v3429_v4, 4  ;;  %v2255_v21 = vsel %vm178_vm8, %v3429_v4, %v2254_v5  ;;  %v2266_v24 = vrot.slane %v3428_v17, 4  ;;  %v2264_v54 = vrot.slane %v3434_v37, 4 }
 0xba0   :  { %v2263_v26 = vperm.slane %v2255_v21, %v3710_v3  ;;  %v2681_v29 = vsel %vm1027_vm13, %v4587_v6, 0.0  ;;  %v2320_v36 = vrot.slane %v3433_v13, 4 }
 0xba1   :  { %v2253_v31 = vsel %vm178_vm8, %v2252_v12, %v3419_v15  ;;  %v2265_v20 = vsel %vm178_vm8, %v2264_v54, %v3428_v17  ;;  %v2267_v55 = vsel %vm178_vm8, %v3434_v37, %v2266_v24  ;;  %2676 = vadd.xlane.f32.xlu2 %v2675_v28  ;;  %2682 = vadd.xlane.f32.xlu0 %v2681_v29 }
 0xba2   :  { %v2259_v8 = vperm.slane %v2253_v31, %v3710_v3  ;;  %v2290_v0 = vrot.slane %v2263_v26, 4  ;;  %v2271_v34 = vperm.slane %v2265_v20, %v3710_v3  ;;  %v2275_v42 = vperm.slane %v2267_v55, %v3710_v3 }
 0xba4   :  { %v2278_v2 = vrot.slane %v2259_v8, 4  ;;  %v2276_v22 = vrot.slane %v2271_v34, 4  ;;  %v2288_v23 = vrot.slane %v2275_v42, 4  ;;  %v2291_v39 = vsel %vm178_vm8, %v2275_v42, %v2290_v0  ;;  %v3422_v48 = vpop.permute.xlu1 %3421 }
 0xba5   :  { %v2299_v38 = vperm.slane %v2291_v39, %v3724_v14  ;;  %v3424_v27 = vunpack.i.h.bf16 %v3422_v48  ;;  %v3423_v52 = vunpack.i.l.bf16 %v3422_v48 }
 0xba6   :  { %v2277_v49 = vsel %vm178_vm8, %v2276_v22, %v2259_v8  ;;  %v2279_v40 = vsel %vm178_vm8, %v2271_v34, %v2278_v2  ;;  %v2289_v41 = vsel %vm178_vm8, %v2288_v23, %v2263_v26 }
 0xba7   :  { %v2283_v57 = vperm.slane %v2277_v49, %v3724_v14  ;;  %v2287_v44 = vperm.slane %v2279_v40, %v3724_v14  ;;  %v2295_v45 = vperm.slane %v2289_v41, %v3724_v14  ;;  %v2306_v47 = vrot.slane %v2299_v38, 4 }
 0xba8   :  { %v2308_v51 = vrot.slane %v3424_v27, 4  ;;  %v2311_v56 = vsel %vm178_vm8, %v3424_v27, %v2310_v9  ;;  %v2321_v60 = vsel %vm178_vm8, %v2320_v36, %v3423_v52  ;;  %v2322_v62 = vrot.slane %v3423_v52, 4 }
 0xba9   :  { %v2302_v46 = vrot.slane %v2287_v44, 4  ;;  %v2304_v1 = vrot.slane %v2295_v45, 4  ;;  %v2307_v7 = vsel %vm178_vm8, 0.0, %v2306_v47  ;;  %v2319_v61 = vperm.slane %v2311_v56, %v3710_v3 }
 0xbaa   :  { %v2380_v16 = vrot.slane %v2307_v7, 4  ;;  %v2309_v58 = vsel %vm178_vm8, %v2308_v51, %v3418_v59  ;;  %v2323_v25 = vsel %vm178_vm8, %v3433_v13, %v2322_v62  ;;  %v2327_v15 = vperm.slane %v2321_v60, %v3710_v3 }
 0xbab   :  { %v2303_v19 = vsel %vm178_vm8, 0.0, %v2302_v46  ;;  %v2315_v53 = vperm.slane %v2309_v58, %v3710_v3  ;;  %v2346_v5 = vrot.slane %v2319_v61, 4  ;;  %v2331_v4 = vperm.slane %v2323_v25, %v3710_v3 }
 0xbac   :  { %v2332_v17 = vrot.slane %v2327_v15, 4  ;;  %v2300_v37 = vrot.slane %v2283_v57, 4  ;;  %v2305_v12 = vsel %vm178_vm8, 0.0, %v2304_v1  ;;  %v2364_v21 = vsel %vm178_vm8, %v2302_v46, %v2283_v57 }
 0xbad   :  { %v2334_v24 = vrot.slane %v2315_v53, 4  ;;  %v2344_v54 = vrot.slane %v2331_v4, 4  ;;  %v2347_v59 = vsel %vm178_vm8, %v2331_v4, %v2346_v5  ;;  %v2368_v26 = vperm.slane %v2364_v21, %v3710_v3 }
 0xbae   :  { %v2333_v28 = vsel %vm178_vm8, %v2332_v17, %v2315_v53  ;;  %v2355_v29 = vperm.slane %v2347_v59, %v3724_v14  ;;  %v2301_v31 = vsel %vm178_vm8, 0.0, %v2300_v37  ;;  %v2369_v13 = vrot.slane %v2303_v19, 4 }
 0xbaf   :  { %v2335_v20 = vsel %vm178_vm8, %v2327_v15, %v2334_v24  ;;  %v2339_v55 = vperm.slane %v2333_v28, %v3724_v14  ;;  %v2345_v8 = vsel %vm178_vm8, %v2344_v54, %v2319_v61  ;;  %v2375_v0 = vsel %vm178_vm8, %v2306_v47, %v2295_v45 }
 0xbb0   :  { %v2343_v34 = vperm.slane %v2335_v20, %v3724_v14  ;;  %v2351_v42 = vperm.slane %v2345_v8, %v3724_v14  ;;  %v2362_v2 = vrot.slane %v2355_v29, 4  ;;  %v2370_v22 = vsel %vm178_vm8, %v2369_v13, %v2301_v31 }
 0xbb1   :  { %v2356_v23 = vrot.slane %v2339_v55, 4  ;;  %v2374_v39 = vperm.slane %v2370_v22, %v3710_v3  ;;  %v2379_v48 = vperm.slane %v2375_v0, %v3710_v3  ;;  %v2381_v9 = vsel %vm178_vm8, %v2380_v16, %v2305_v12 }
 0xbb2   :  { %v2358_v38 = vrot.slane %v2343_v34, 4  ;;  %v2360_v27 = vrot.slane %v2351_v42, 4  ;;  %v2363_v52 = vsel %vm178_vm8, 0.0, %v2362_v2  ;;  %v2429_v49 = vsel %vm178_vm8, %v2362_v2, %v2351_v42 }
 0xbb3   :  { %v2434_v40 = vrot.slane %v2363_v52, 4  ;;  %v2357_v41 = vsel %vm178_vm8, 0.0, %v2356_v23  ;;  %v2433_v36 = vperm.slane %v2429_v49, %v3710_v3  ;;  %v2385_v57 = vperm.slane %v2381_v9, %v3710_v3 }
 0xbb4   :  { %v2359_v44 = vsel %vm178_vm8, 0.0, %v2358_v38  ;;  %v2361_v45 = vsel %vm178_vm8, 0.0, %v2360_v27  ;;  %v2418_v47 = vsel %vm178_vm8, %v2358_v38, %v2339_v55  ;;  %v2388_v51 = vrot.slane %v2368_v26, 4 }
 0xbb5   :  { %v2423_v56 = vrot.slane %v2359_v44, 4  ;;  %v2422_v60 = vperm.slane %v2418_v47, %v3710_v3  ;;  %v2435_v62 = vsel %vm178_vm8, %v2434_v40, %v2361_v45  ;;  %v2454_v46 = vrot.slane %v2433_v36, 4 }
 0xbb6   :  { %v2439_v1 = vperm.slane %v2435_v62, %v3710_v3  ;;  %v2389_v7 = vsel %vm178_vm8, %v2374_v39, %v2388_v51  ;;  %v2400_v61 = vrot.slane %v2379_v48, 4  ;;  %v2386_v16 = vrot.slane %v2374_v39, 4 }
 0xbb7   :  { %v2424_v58 = vsel %vm178_vm8, %v2423_v56, %v2357_v41  ;;  %v2442_v25 = vrot.slane %v2422_v60, 4  ;;  %v2397_v15 = vperm.slane %v2389_v7, %v3724_v14  ;;  %v2398_v19 = vrot.slane %v2385_v57, 4 }
 0xbb8   :  { %v2428_v53 = vperm.slane %v2424_v58, %v3710_v3  ;;  %v2455_v5 = vsel %vm178_vm8, %v2439_v1, %v2454_v46  ;;  %v2452_v4 = vrot.slane %v2439_v1, 4  ;;  %v2401_v17 = vsel %vm178_vm8, %v2385_v57, %v2400_v61 }
 0xbb9   :  { %v2463_v37 = vperm.slane %v2455_v5, %v3724_v14  ;;  %v2409_v12 = vperm.slane %v2401_v17, %v3724_v14  ;;  %v2387_v21 = vsel %vm178_vm8, %v2386_v16, %v2368_v26  ;;  %v2399_v24 = vsel %vm178_vm8, %v2398_v19, %v2379_v48 }
 0xbba   :  { %v2443_v54 = vsel %vm178_vm8, %v2428_v53, %v2442_v25  ;;  %v2440_v59 = vrot.slane %v2428_v53, 4  ;;  %v2453_v28 = vsel %vm178_vm8, %v2452_v4, %v2433_v36  ;;  %v2393_v29 = vperm.slane %v2387_v21, %v3724_v14 }
 0xbbb   :  { %v2451_v31 = vperm.slane %v2443_v54, %v3724_v14  ;;  %v2468_v13 = vrot.slane %v2463_v37, 4  ;;  %v2459_v20 = vperm.slane %v2453_v28, %v3724_v14  ;;  %v2414_v55 = vrot.slane %v2409_v12, 4 }
 0xbbc   :  { %v2441_v8 = vsel %vm178_vm8, %v2440_v59, %v2422_v60  ;;  %v2405_v0 = vperm.slane %v2399_v24, %v3724_v14  ;;  %v2416_v23 = vrot.slane %v2397_v15, 4  ;;  %v2412_v38 = vrot.slane %v2393_v29, 4 }
 0xbbd   :  { %v2469_v26 = vsel %vm178_vm8, %v2468_v13, %v2451_v31  ;;  %v2447_v34 = vperm.slane %v2441_v8, %v3724_v14  ;;  %v2464_v42 = vrot.slane %v2459_v20, 4  ;;  %v2470_v2 = vrot.slane %v2451_v31, 4 }
 0xbbe   :  { %2778 = vmatpush.msra.mxu0 %v2469_v26  ;;  %v2410_v22 = vrot.slane %v2405_v0, 4  ;;  %v2415_v48 = vsel %vm178_vm8, %v2414_v55, %v2397_v15  ;;  %v2417_v40 = vsel %vm178_vm8, %v2409_v12, %v2416_v23  ;;  %v2413_v41 = vsel %vm178_vm8, %v2405_v0, %v2412_v38 }
 0xbbf   :  { %v2465_v39 = vsel %vm178_vm8, %v2464_v42, %v2447_v34  ;;  %v2466_v9 = vrot.slane %v2447_v34, 4  ;;  %v2471_v27 = vsel %vm178_vm8, %v2463_v37, %v2470_v2 }
 0xbc0   :  { %2720 = vmatpush.msrb.mxu2 %v2465_v39  ;;  %2779 = vmatpush.msra.mxu0 %v2415_v48  ;;  %v2411_v52 = vsel %vm178_vm8, %v2410_v22, %v2393_v29 }
 0xbc1   :  { %2807 = vmatpush.msra.mxu1 %v2471_v27  ;;  %v2467_v49 = vsel %vm178_vm8, %v2459_v20, %v2466_v9 }
 0xbc2   :  { %2721 = vmatpush.msrb.mxu2 %v2411_v52  ;;  %2749 = vmatpush.msra.mxu3 %v2467_v49 }
 0xbc3   :  { %2808 = vmatpush.msra.mxu1 %v2417_v40 }
 0xbc4   :  { %2750 = vmatpush.msra.mxu3 %v2413_v41 }
 0xbfb   :  { %v2674_v36 = vpop.xlane.xlu1 %2673 }
 0xbfc   :  { %3515 = vrcp.f32 %v2674_v36  ;;  %v2662_v57 = vpop.xlane.xlu0 %2661 }
 0xbfd   :  { %3517 = vrcp.f32 %v2662_v57 }
 0xc01   :  { %v2668_v44 = vpop.xlane.xlu2 %2667 }
 0xc02   :  { %v3516_v45 = vpop.eup %3515  ;;  %3519 = vrcp.f32 %v2668_v44 }
 0xc03   :  { %v3518_v47 = vpop.eup %3517  ;;  %v2696_v51 = vmul.f32 %v3516_v45, %v4560_v18 }
 0xc04   :  { %v2692_v56 = vmul.f32 %v3518_v47, %v4562_v35 }
 0xc05   :  { %3365 = vmatmul.msk.f32.vlgmr.msra.gmra.mxu0 %vm1027_vm13, %v2696_v51 }
 0xc06   :  { %3361 = vmatmul.msk.f32.vlgmr.msrb.gmra.mxu2 %vm1027_vm13, %v2692_v56 }
 0xc08   :  { %v3520_v60 = vpop.eup %3519 }
 0xc09   :  { %v2694_v62 = vmul.f32 %v3520_v60, %v4568_v43  ;;  %v2671_v46 = vpop.xlane.xlu1 %2670 }
 0xc0a   :  { %3521 = vrcp.f32 %v2671_v46  ;;  %v2665_v1 = vpop.xlane.xlu0 %2664 }
 0xc0b   :  { %3523 = vrcp.f32 %v2665_v1  ;;  %3363 = vmatmul.msk.f32.vlgmr.msra.gmra.mxu3 %vm1027_vm13, %v2694_v62 }
 0xc0c   :  { %v2680_v7 = vpop.xlane.xlu2 %2679 }
 0xc0d   :  { %3525 = vrcp.f32 %v2680_v7 }
 0xc10   :  { %v3522_v61 = vpop.eup %3521 }
 0xc11   :  { %v3524_v16 = vpop.eup %3523  ;;  %v2695_v18 = vmul.f32 %v3522_v61, %v4572_v63 }
 0xc12   :  { %v2693_v35 = vmul.f32 %v3524_v16, %v4574_v11 }
 0xc13   :  { %v3526_v58 = vpop.eup %3525  ;;  %3364 = vmatmul.msk.f32.gmra.mxu3 %vm1027_vm13, %v2695_v18 }
 0xc14   :  { %v2698_v25 = vmul.f32 %v3526_v58, %v4580_v33  ;;  %v2683_v43 = vpop.xlane.xlu0 %2682  ;;  %v2677_v15 = vpop.xlane.xlu2 %2676  ;;  %3362 = vmatmul.msk.f32.gmra.mxu2 %vm1027_vm13, %v2693_v35 }
 0xc15   :  { %3527 = vrcp.f32 %v2683_v43 }
 0xc16   :  { %3529 = vrcp.f32 %v2677_v15  ;;  %3367 = vmatmul.msk.f32.vlgmr.msra.gmra.mxu1 %vm1027_vm13, %v2698_v25 }
 0xc1b   :  { %v3528_v19 = vpop.eup %3527 }
 0xc1c   :  { %v3530_v53 = vpop.eup %3529  ;;  %v2699_v5 = vmul.f32 %v3528_v19, %v4587_v6 }
 0xc1d   :  { %v2697_v63 = vmul.f32 %v3530_v53, %v4585_v50 }
 0xc1e   :  { %3368 = vmatmul.msk.f32.gmra.mxu1 %vm1027_vm13, %v2699_v5 }
 0xc1f   :  { %3366 = vmatmul.msk.f32.gmra.mxu0 %vm1027_vm13, %v2697_v63 }
 0xc82   :  { %v2781_v4 = vpop.f32.mrf.mxu0 }
 0xc83   :  { %v2816_v17 = vrot.slane %v2781_v4, 4 }
 0xc89   :  { %v2723_v11 = vpop.f32.mrf.mxu2 }
 0xc8a   :  { %v2818_v33 = vrot.slane %v2723_v11, 4  ;;  %v2817_v21 = vsel %vm178_vm8, %v2816_v17, %v2723_v11 }
 0xc8b   :  { %v2823_v6 = vperm.slane %v2817_v21, %v3710_v3 }
 0xc8c   :  { %v2819_v37 = vsel %vm178_vm8, %v2781_v4, %v2818_v33 }
 0xc8d   :  { %v2827_v24 = vperm.slane %v2819_v37, %v3710_v3  ;;  %v2842_v20 = vrot.slane %v2823_v6, 4 }
 0xc8e   :  { %v2752_v12 = vpop.f32.mrf.mxu3 }
 0xc8f   :  { %v2830_v54 = vrot.slane %v2752_v12, 4  ;;  %v2854_v29 = vrot.slane %v2827_v24, 4 }
 0xc93   :  { %v2810_v59 = vpop.f32.mrf.mxu1 }
 0xc94   :  { %v2828_v50 = vrot.slane %v2810_v59, 4  ;;  %v2831_v28 = vsel %vm178_vm8, %v2810_v59, %v2830_v54 }
 0xc95   :  { %v2839_v31 = vperm.slane %v2831_v28, %v3710_v3 }
 0xc96   :  { %v2829_v13 = vsel %vm178_vm8, %v2828_v50, %v2752_v12  ;;  %v2755_v42 = vpop.f32.mrf.mxu3 }
 0xc97   :  { %v2835_v55 = vperm.slane %v2829_v13, %v3710_v3  ;;  %v2852_v8 = vrot.slane %v2839_v31, 4  ;;  %v2855_v0 = vsel %vm178_vm8, %v2839_v31, %v2854_v29  ;;  %v2726_v34 = vpop.f32.mrf.mxu2  ;;  %v2886_v52 = vrot.slane %v2755_v42, 4 }
 0xc98   :  { %v2863_v26 = vperm.slane %v2855_v0, %v3724_v14  ;;  %v2874_v27 = vrot.slane %v2726_v34, 4 }
 0xc99   :  { %v2840_v2 = vrot.slane %v2835_v55, 4  ;;  %v2843_v22 = vsel %vm178_vm8, %v2835_v55, %v2842_v20  ;;  %v2853_v23 = vsel %vm178_vm8, %v2852_v8, %v2827_v24 }
 0xc9a   :  { %v2851_v39 = vperm.slane %v2843_v22, %v3724_v14  ;;  %v2859_v48 = vperm.slane %v2853_v23, %v3724_v14  ;;  %v2870_v9 = vrot.slane %v2863_v26, 4 }
 0xc9b   :  { %v2841_v38 = vsel %vm178_vm8, %v2840_v2, %v2823_v6  ;;  %v2813_v44 = vpop.f32.mrf.mxu1 }
 0xc9c   :  { %v2847_v49 = vperm.slane %v2841_v38, %v3724_v14  ;;  %v2866_v40 = vrot.slane %v2851_v39, 4  ;;  %v2868_v41 = vrot.slane %v2859_v48, 4  ;;  %v2871_v36 = vsel %vm178_vm8, 0.0, %v2870_v9  ;;  %v2784_v57 = vpop.f32.mrf.mxu0 }
 0xc9d   :  { %v2939_v45 = vsel %vm178_vm8, %v2870_v9, %v2859_v48  ;;  %v2944_v47 = vrot.slane %v2871_v36, 4  ;;  %v2872_v51 = vrot.slane %v2784_v57, 4  ;;  %v2875_v56 = vsel %vm178_vm8, %v2784_v57, %v2874_v27 }
 0xc9e   :  { %v2864_v60 = vrot.slane %v2847_v49, 4  ;;  %v2867_v62 = vsel %vm178_vm8, 0.0, %v2866_v40  ;;  %v2869_v46 = vsel %vm178_vm8, 0.0, %v2868_v41  ;;  %v2943_v1 = vperm.slane %v2939_v45, %v3710_v3 }
 0xc9f   :  { %v2933_v7 = vrot.slane %v2867_v62, 4  ;;  %v2873_v61 = vsel %vm178_vm8, %v2872_v51, %v2726_v34  ;;  %v2883_v16 = vperm.slane %v2875_v56, %v3710_v3  ;;  %v2884_v18 = vrot.slane %v2813_v44, 4 }
 0xca0   :  { %v2879_v35 = vperm.slane %v2873_v61, %v3710_v3  ;;  %v2887_v58 = vsel %vm178_vm8, %v2813_v44, %v2886_v52  ;;  %v2865_v25 = vsel %vm178_vm8, 0.0, %v2864_v60  ;;  %v2928_v43 = vsel %vm178_vm8, %v2866_v40, %v2847_v49 }
 0xca1   :  { %v2910_v15 = vrot.slane %v2883_v16, 4  ;;  %v2885_v19 = vsel %vm178_vm8, %v2884_v18, %v2755_v42  ;;  %v2895_v53 = vperm.slane %v2887_v58, %v3710_v3  ;;  %v2932_v5 = vperm.slane %v2928_v43, %v3710_v3 }
 0xca2   :  { %v2898_v63 = vrot.slane %v2879_v35, 4  ;;  %v2891_v11 = vperm.slane %v2885_v19, %v3710_v3  ;;  %v2934_v33 = vsel %vm178_vm8, %v2933_v7, %v2865_v25  ;;  %v2945_v4 = vsel %vm178_vm8, %v2944_v47, %v2869_v46 }
 0xca3   :  { %v2908_v17 = vrot.slane %v2895_v53, 4  ;;  %v2911_v37 = vsel %vm178_vm8, %v2895_v53, %v2910_v15  ;;  %v2938_v12 = vperm.slane %v2934_v33, %v3710_v3  ;;  %v2949_v21 = vperm.slane %v2945_v4, %v3710_v3 }
 0xca4   :  { %v2896_v24 = vrot.slane %v2891_v11, 4  ;;  %v2899_v54 = vsel %vm178_vm8, %v2891_v11, %v2898_v63  ;;  %v2919_v6 = vperm.slane %v2911_v37, %v3724_v14  ;;  %v2952_v59 = vrot.slane %v2932_v5, 4 }
 0xca5   :  { %v2907_v50 = vperm.slane %v2899_v54, %v3724_v14  ;;  %v2909_v28 = vsel %vm178_vm8, %v2908_v17, %v2883_v16  ;;  %v2964_v29 = vrot.slane %v2943_v1, 4  ;;  %v2950_v31 = vrot.slane %v2938_v12, 4 }
 0xca6   :  { %v2897_v13 = vsel %vm178_vm8, %v2896_v24, %v2879_v35  ;;  %v2915_v20 = vperm.slane %v2909_v28, %v3724_v14  ;;  %v2926_v55 = vrot.slane %v2919_v6, 4  ;;  %v2953_v8 = vsel %vm178_vm8, %v2938_v12, %v2952_v59 }
 0xca7   :  { %v2903_v0 = vperm.slane %v2897_v13, %v3724_v14  ;;  %v2922_v26 = vrot.slane %v2907_v50, 4  ;;  %v2961_v34 = vperm.slane %v2953_v8, %v3724_v14  ;;  %v2965_v42 = vsel %vm178_vm8, %v2949_v21, %v2964_v29  ;;  %v3069_v29 = vld [vmem:[#allocation5 + $0x128] sm:$0xff]  ;;  %v3066_v13 = vld [vmem:[#allocation5 + $0x110] sm:$0xff] }
 0xca8   :  { %v2924_v2 = vrot.slane %v2915_v20, 4  ;;  %v2927_v22 = vsel %vm178_vm8, 0.0, %v2926_v55  ;;  %v2993_v23 = vsel %vm178_vm8, %v2926_v55, %v2915_v20  ;;  %v2973_v39 = vperm.slane %v2965_v42, %v3724_v14  ;;  %3089 = vmatpush.msra.mxu2 %v3069_v29  ;;  %v3200_v29 = vld [vmem:[#allocation5 + $0x180] sm:$0xff] }
 0xca9   :  { %v2920_v48 = vrot.slane %v2903_v0, 4  ;;  %v2923_v9 = vsel %vm178_vm8, 0.0, %v2922_v26  ;;  %v2997_v38 = vperm.slane %v2993_v23, %v3710_v3  ;;  %v2998_v27 = vrot.slane %v2927_v22, 4 }
 0xcaa   :  { %v2925_v52 = vsel %vm178_vm8, 0.0, %v2924_v2  ;;  %v2987_v49 = vrot.slane %v2923_v9, 4  ;;  %v2978_v40 = vrot.slane %v2973_v39, 4  ;;  %v2980_v41 = vrot.slane %v2961_v34, 4  ;;  %v3446_v9 = vld [vmem:[#allocation5 + $0x1d6] ss:$0 sm:$0xff] }
 0xcab   :  { %v2951_v36 = vsel %vm178_vm8, %v2950_v31, %v2932_v5  ;;  %v2962_v57 = vrot.slane %v2949_v21, 4  ;;  %v2921_v44 = vsel %vm178_vm8, 0.0, %v2920_v48  ;;  %v2982_v45 = vsel %vm178_vm8, %v2922_v26, %v2903_v0  ;;  %v3068_v31 = vld [vmem:[#allocation5 + $0x120] sm:$0xff] }
 0xcac   :  { %v2979_v47 = vsel %vm178_vm8, %v2978_v40, %v2961_v34  ;;  %v2981_v51 = vsel %vm178_vm8, %v2973_v39, %v2980_v41  ;;  %v2957_v56 = vperm.slane %v2951_v36, %v3724_v14  ;;  %v2986_v60 = vperm.slane %v2982_v45, %v3710_v3  ;;  %3090 = vmatpush.msra.mxu2 %v3068_v31 }
 0xcad   :  { %3046 = vrot.lane.b32.xlu2 %v2979_v47, %s3632_s24  ;;  %3054 = vrot.lane.b32.xlu0 %v2981_v51, %s3633_s25  ;;  %v2963_v62 = vsel %vm178_vm8, %v2962_v57, %v2943_v1  ;;  %v2988_v46 = vsel %vm178_vm8, %v2987_v49, %v2921_v44  ;;  %v2999_v7 = vsel %vm178_vm8, %v2998_v27, %v2925_v52  ;;  %v3018_v61 = vrot.slane %v2997_v38, 4 }
 0xcae   :  { %v2969_v16 = vperm.slane %v2963_v62, %v3724_v14  ;;  %v2976_v18 = vrot.slane %v2957_v56, 4  ;;  %v2992_v35 = vperm.slane %v2988_v46, %v3710_v3  ;;  %v3003_v58 = vperm.slane %v2999_v7, %v3710_v3  ;;  %v3160_v7 = vld [vmem:[#allocation5 + $0x148] sm:$0xff] }
 0xcaf   :  { %v3006_v25 = vrot.slane %v2986_v60, 4  ;;  %3181 = vmatpush.msrb.mxu3 %v3160_v7 }
 0xcb0   :  { %v2974_v43 = vrot.slane %v2969_v16, 4  ;;  %v2977_v15 = vsel %vm178_vm8, %v2969_v16, %v2976_v18  ;;  %v3019_v19 = vsel %vm178_vm8, %v3003_v58, %v3018_v61  ;;  %v3004_v53 = vrot.slane %v2992_v35, 4  ;;  %v3159_v61 = vld [vmem:[#allocation5 + $0x140] sm:$0xff]  ;;  %v3158_v18 = vld [vmem:[#allocation5 + $0x138] sm:$0xff] }
 0xcb1   :  { %3038 = vrot.lane.b32.xlu1 %v2977_v15, %s3621_s18  ;;  %v3007_v1 = vsel %vm178_vm8, %v2992_v35, %v3006_v25  ;;  %v3027_v5 = vperm.slane %v3019_v19, %v3724_v14  ;;  %v3016_v63 = vrot.slane %v3003_v58, 4  ;;  %3182 = vmatpush.msrb.mxu3 %v3159_v61  ;;  %v3157_v58 = vld [vmem:[#allocation5 + $0x130] sm:$0xff]  ;;  %v3208_v15 = vld [vmem:[#allocation5 + $0x1c0] sm:$0xff]  ;;  %v3207_v19 = vld [vmem:[#allocation5 + $0x1b8] sm:$0xff] }
 0xcb2   :  { %v3015_v11 = vperm.slane %v3007_v1, %v3724_v14  ;;  %v3005_v33 = vsel %vm178_vm8, %v3004_v53, %v2986_v60  ;;  %v2975_v3 = vsel %vm178_vm8, %v2974_v43, %v2957_v56  ;;  %v3209_v43 = vld [vmem:[#allocation5 + $0x1c8] sm:$0xff] }
 0xcb3   :  { %v3032_v4 = vrot.slane %v3027_v5, 4  ;;  %v3011_v17 = vperm.slane %v3005_v33, %v3724_v14  ;;  %v3017_v37 = vsel %vm178_vm8, %v3016_v63, %v2997_v38  ;;  %3183 = vmatpush.msrb.mxu3 %v3158_v18  ;;  %3211 = vmatpush.msrb.mxu0 %v3209_v43  ;;  %v3205_v33 = vld [vmem:[#allocation5 + $0x1a8] sm:$0xff] }
 0xcb4   :  { %v3034_v12 = vrot.slane %v3015_v11, 4  ;;  %v3023_v21 = vperm.slane %v3017_v37, %v3724_v14  ;;  %v3067_v14 = vld [vmem:[#allocation5 + $0x118] sm:$0xff] }
 0xcb5   :  { %v3033_v24 = vsel %vm178_vm8, %v3032_v4, %v3015_v11  ;;  %v3030_v54 = vrot.slane %v3011_v17, 4  ;;  %3091 = vmatpush.msra.mxu2 %v3067_v14  ;;  %3184 = vmatpush.msrb.mxu3 %v3157_v58  ;;  %v3204_v4 = vld [vmem:[#allocation5 + $0x1a0] sm:$0xff]  ;;  %v3203_v37 = vld [vmem:[#allocation5 + $0x198] sm:$0xff] }
 0xcb6   :  { %3048 = vrot.lane.b32.xlu0 %v3033_v24, %s3632_s24  ;;  %v3035_v6 = vsel %vm178_vm8, %v3027_v5, %v3034_v12  ;;  %v3028_v59 = vrot.slane %v3023_v21, 4  ;;  %3212 = vmatpush.msrb.mxu0 %v3208_v15  ;;  %v3206_v5 = vld [vmem:[#allocation5 + $0x1b0] sm:$0xff] }
 0xcb7   :  { %3056 = vrot.lane.b32.xlu2 %v3035_v6, %s3633_s25  ;;  %v3031_v50 = vsel %vm178_vm8, %v3023_v21, %v3030_v54  ;;  %3092 = vmatpush.msra.mxu2 %v3066_v13  ;;  %v3202_v21 = vld [vmem:[#allocation5 + $0x190] sm:$0xff]  ;;  %v3201_v6 = vld [vmem:[#allocation5 + $0x188] sm:$0xff] }
 0xcb8   :  { %v3029_v28 = vsel %vm178_vm8, %v3028_v59, %v3011_v17  ;;  %3213 = vmatpush.msrb.mxu0 %v3207_v19 }
 0xcb9   :  { %3040 = vrot.lane.b32.xlu1 %v3031_v50, %s3621_s18 }
 0xcba   :  { %3214 = vmatpush.msrb.mxu0 %v3206_v5 }
 0xcbc   :  { %3215 = vmatpush.msrb.mxu0 %v3205_v33 }
 0xcbe   :  { %3216 = vmatpush.msrb.mxu0 %v3204_v4 }
 0xcc0   :  { %3217 = vmatpush.msrb.mxu0 %v3203_v37 }
 0xcc2   :  { %3218 = vmatpush.msrb.mxu0 %v3202_v21 }
 0xcc4   :  { %3219 = vmatpush.msrb.mxu0 %v3201_v6 }
 0xcc6   :  { %3220 = vmatpush.msrb.mxu0 %v3200_v29 }
 0xd07   :  { %v3047_v8 = vpop.permute.xlu2 %3046 }
 0xd11   :  { %v3057_v23 = vpop.permute.xlu2 %3056 }
 0xd1f   :  { %v3055_v20 = vpop.permute.xlu0 %3054 }
 0xd23   :  { %v3039_v55 = vpop.permute.xlu1 %3038 }
 0xd24   :  { %v3060_v0 = vsel %vm886_vm9, %v2975_v3, %v3039_v55  ;;  %v3199_v55 = vld [vmem:[#allocation5 + $0x178] sm:$0xff] }
 0xd25   :  { %v3062_v26 = vsel %vm1027_vm13, %v3060_v0, %v3047_v8  ;;  %3221 = vmatpush.msrb.mxu0 %v3199_v55 }
 0xd26   :  { %v3064_v34 = vsel %vm1480_vm2, %v3062_v26, %v3055_v20  ;;  %v3448_v20 = vld [vmem:[#allocation5 + $0x1d5] ss:$0 sm:$0xff] }
 0xd27   :  { %3369 = vmatmul.msk.f32.vlgmr.msra.gmra.mxu2 %vm64_vm0, %v3064_v34  ;;  %v3198_v26 = vld [vmem:[#allocation5 + $0x170] sm:$0xff] }
 0xd28   :  { %v3049_v2 = vpop.permute.xlu0 %3048  ;;  %3222 = vmatpush.msrb.mxu0 %v3198_v26 }
 0xd2b   :  { %v3041_v42 = vpop.permute.xlu1 %3040 }
 0xd2c   :  { %v3061_v22 = vsel %vm886_vm9, %v3029_v28, %v3041_v42  ;;  %v3447_v28 = vld [vmem:[#allocation5 + $0x1d4] ss:$0 sm:$0xff] }
 0xd2d   :  { %v3063_v39 = vsel %vm1027_vm13, %v3061_v22, %v3049_v2  ;;  %v3197_v2 = vld [vmem:[#allocation5 + $0x168] sm:$0xff] }
 0xd2e   :  { %v3065_v48 = vsel %vm1480_vm2, %v3063_v39, %v3057_v23  ;;  %3223 = vmatpush.msrb.mxu0 %v3197_v2 }
 0xd2f   :  { %3370 = vmatmul.msk.f32.gmra.mxu2 %vm64_vm0, %v3065_v48 }
 0xdaa   :  { %v3094_v38 = vpop.f32.mrf.mxu2 }
 0xdab   :  { %v3100_v27 = vadd.f32 %v3094_v38, %v4247_v30  ;;  %v3196_v38 = vld [vmem:[#allocation5 + $0x160] sm:$0xff] }
 0xdac   :  { %3224 = vmatpush.msrb.mxu0 %v3196_v38 }
 0xdad   :  { %v4785_v52 = vadd.f32 %v3446_v9, %v3100_v27  ;;  %v3195_v27 = vld [vmem:[#allocation5 + $0x158] sm:$0xff] }
 0xdae   :  { %3225 = vmatpush.msrb.mxu0 %v3195_v27 }
 0xdaf   :  { %v3107_v49 = vsel %vm64_vm0, %v4785_v52, 0.0 }
 0xdb0   :  { %3108 = vadd.xlane.f32.xlu1 %v3107_v49  ;;  %v3194_v49 = vld [vmem:[#allocation5 + $0x150] sm:$0xff] }
 0xdb1   :  { %3226 = vmatpush.msrb.mxu0 %v3194_v49 }
 0xdb2   :  { %v3097_v40 = vpop.f32.mrf.mxu2 }
 0xdb3   :  { %v3101_v41 = vadd.f32 %v3097_v40, %v4252_v32  ;;  %v3449_v40 = vld [vmem:[#allocation5 + $0x1d1] ss:$0 sm:$0xff] }
 0xdb5   :  { %v4790_v36 = vadd.f32 %v3446_v9, %v3101_v41 }
 0xdb7   :  { %v3110_v57 = vsel %vm64_vm0, %v4790_v36, 0.0 }
 0xdb8   :  { %3111 = vadd.xlane.f32.xlu0 %v3110_v57 }
 0xe23   :  { %v3109_v44 = vpop.xlane.xlu1 %3108 }
 0xe24   :  { %v3113_v45 = vmul.f32 %v3109_v44, %v3664_v10 }
 0xe26   :  { %v3115_v30 = vsub.f32 %v4785_v52, %v3113_v45 }
 0xe28   :  { %v3117_v47 = vmul.f32 %v3115_v30, %v3115_v30 }
 0xe2a   :  { %v3119_v51 = vsel %vm64_vm0, %v3117_v47, 0.0 }
 0xe2b   :  { %3120 = vadd.xlane.f32.xlu2 %v3119_v51  ;;  %v3112_v56 = vpop.xlane.xlu0 %3111  ;;  %v3450_v51 = vld [vmem:[#allocation5 + $0x1d7] ss:$0 sm:$0xff] }
 0xe2c   :  { %v3114_v60 = vmul.f32 %v3112_v56, %v3664_v10 }
 0xe2e   :  { %v4799_v32 = vsub.f32 %v4790_v36, %v3114_v60 }
 0xe30   :  { %v3118_v62 = vmul.f32 %v4799_v32, %v4799_v32 }
 0xe32   :  { %v3122_v46 = vsel %vm64_vm0, %v3118_v62, 0.0 }
 0xe33   :  { %3123 = vadd.xlane.f32.xlu1 %v3122_v46 }
 0xe9e   :  { %v3121_v16 = vpop.xlane.xlu2 %3120 }
 0xe9f   :  { %v3125_v35 = vmul.f32 %v3121_v16, %v3664_v10 }
 0xea1   :  { %v3127_v25 = vadd.f32 1e-05, %v3125_v35 }
 0xea3   :  { %3531 = vrsqrt.f32 %v3127_v25  ;;  %vm3135_vm9 = vweird.f32 %v3127_v25 }
 0xea6   :  { %v3124_v53 = vpop.xlane.xlu1 %3123 }
 0xea7   :  { %v3126_v1 = vmul.f32 %v3124_v53, %v3664_v10 }
 0xea9   :  { %v3532_v63 = vpop.eup %3531  ;;  %v3128_v11 = vadd.f32 1e-05, %v3126_v1 }
 0xeaa   :  { %v3130_v3 = vmul.f32 %v3532_v63, %v3127_v25  ;;  %vm3136_vm8 = vweird.f32 %v3532_v63 }
 0xeab   :  { %3533 = vrsqrt.f32 %v3128_v11  ;;  %vm3137_vm13 = vmor %vm3135_vm9, %vm3136_vm8  ;;  %vm3145_vm4 = vweird.f32 %v3128_v11 }
 0xeac   :  { %v3131_v17 = vmul.f32 %v3532_v63, %v3130_v3 }
 0xeae   :  { %v3132_v12 = vmul.f32 0.5, %v3131_v17 }
 0xeb0   :  { %v3133_v24 = vsub.f32 1.5, %v3132_v12 }
 0xeb1   :  { %v3534_v54 = vpop.eup %3533 }
 0xeb2   :  { %v3134_v59 = vmul.f32 %v3532_v63, %v3133_v24  ;;  %v3140_v50 = vmul.f32 %v3534_v54, %v3128_v11  ;;  %vm3146_vm2 = vweird.f32 %v3534_v54 }
 0xeb3   :  { %vm3147_vm5 = vmor %vm3145_vm4, %vm3146_vm2 }
 0xeb4   :  { %v3138_v31 = vsel %vm3137_vm13, %v3532_v63, %v3134_v59  ;;  %v3141_v14 = vmul.f32 %v3534_v54, %v3140_v50  ;;  %v3451_v59 = vld [vmem:[#allocation5 + $0xe8] ss:$0 sm:$0xff] }
 0xeb5   :  { %v3149_v13 = vmul.f32 %v3138_v31, %v3115_v30  ;;  %v3452_v31 = vld [vmem:[#allocation5 + $0xe9] ss:$0 sm:$0xff] }
 0xeb6   :  { %v3142_v8 = vmul.f32 0.5, %v3141_v14 }
 0xeb7   :  { %v3152_v0 = vmul.f32 %v3447_v28, %v3149_v13 }
 0xeb8   :  { %v3143_v34 = vsub.f32 1.5, %v3142_v8 }
 0xeb9   :  { %v3155_v42 = vadd.f32 %v3448_v20, %v3152_v0 }
 0xeba   :  { %v3144_v22 = vmul.f32 %v3534_v54, %v3143_v34 }
 0xebb   :  { %3371 = vmatmul.msk.f32.vlgmr.msrb.gmra.mxu3 %vm64_vm0, %v3155_v42 }
 0xebc   :  { %v3148_v23 = vsel %vm3147_vm5, %v3534_v54, %v3144_v22 }
 0xebd   :  { %v3150_v39 = vmul.f32 %v3148_v23, %v4799_v32 }
 0xebf   :  { %v3153_v48 = vmul.f32 %v3447_v28, %v3150_v39 }
 0xec1   :  { %v3156_v9 = vadd.f32 %v3448_v20, %v3153_v48 }
 0xec3   :  { %3372 = vmatmul.msk.f32.gmra.mxu3 %vm64_vm0, %v3156_v9 }
 0xf3e   :  { %v3186_v41 = vpop.f32.mrf.mxu3 }
 0xf3f   :  { %v3187_v57 = vadd.f32 %v3449_v40, %v3186_v41 }
 0xf41   :  { %v3192_v44 = vmax.f32 %v3187_v57, 0.0 }
 0xf43   :  { %3227 = vmatmul.f32.vlgmr.msrb.gmra.mxu0 %v3192_v44 }
 0xf46   :  { %v3189_v45 = vpop.f32.mrf.mxu3 }
 0xf47   :  { %v3190_v30 = vadd.f32 %v3449_v40, %v3189_v45 }
 0xf49   :  { %v3193_v47 = vmax.f32 %v3190_v30, 0.0 }
 0xf4b   :  { %3230 = vmatmul.f32.gmra.mxu0 %v3193_v47 }
 0xfc0   :  { %v3228_v56 = vpop.f32.mrf.mxu0 }
 0xfc1   :  { %v3234_v60 = vadd.f32 %v3228_v56, %v4785_v52 }
 0xfc3   :  { %v3237_v32 = vadd.f32 %v3450_v51, %v3234_v60 }
 0xfc5   :  { %v3241_v62 = vsel %vm64_vm0, %v3237_v32, 0.0 }
 0xfc6   :  { %3242 = vadd.xlane.f32.xlu0 %v3241_v62 }
 0xfc8   :  { %v3231_v46 = vpop.f32.mrf.mxu0 }
 0xfc9   :  { %v3235_v7 = vadd.f32 %v3231_v46, %v4790_v36 }
 0xfcb   :  { %v3238_v61 = vadd.f32 %v3450_v51, %v3235_v7 }
 0xfcd   :  { %v3244_v16 = vsel %vm64_vm0, %v3238_v61, 0.0 }
 0xfce   :  { %3245 = vadd.xlane.f32.xlu2 %v3244_v16 }
0x1039   :  { %v3243_v18 = vpop.xlane.xlu0 %3242 }
0x103a   :  { %v3247_v35 = vmul.f32 %v3243_v18, %v3664_v10 }
0x103c   :  { %v3249_v58 = vsub.f32 %v3237_v32, %v3247_v35 }
0x103e   :  { %v3251_v25 = vmul.f32 %v3249_v58, %v3249_v58 }
0x1040   :  { %v3253_v43 = vsel %vm64_vm0, %v3251_v25, 0.0 }
0x1041   :  { %3254 = vadd.xlane.f32.xlu1 %v3253_v43  ;;  %v3246_v52 = vpop.xlane.xlu2 %3245 }
0x1042   :  { %v3248_v15 = vmul.f32 %v3246_v52, %v3664_v10 }
0x1044   :  { %v3250_v19 = vsub.f32 %v3238_v61, %v3248_v15 }
0x1046   :  { %v3252_v53 = vmul.f32 %v3250_v19, %v3250_v19 }
0x1048   :  { %v3256_v1 = vsel %vm64_vm0, %v3252_v53, 0.0 }
0x1049   :  { %3257 = vadd.xlane.f32.xlu0 %v3256_v1 }
0x10b4   :  { %v3255_v36 = vpop.xlane.xlu1 %3254 }
0x10b5   :  { %v3259_v5 = vmul.f32 %v3255_v36, %v3664_v10 }
0x10b7   :  { %v3261_v63 = vadd.f32 1e-05, %v3259_v5 }
0x10b9   :  { %3535 = vrsqrt.f32 %v3261_v63  ;;  %vm3269_vm7 = vweird.f32 %v3261_v63 }
0x10bc   :  { %v3258_v11 = vpop.xlane.xlu0 %3257 }
0x10bd   :  { %v3260_v33 = vmul.f32 %v3258_v11, %v3664_v10 }
0x10bf   :  { %v3536_v3 = vpop.eup %3535  ;;  %v3262_v4 = vadd.f32 1e-05, %v3260_v33 }
0x10c0   :  { %v3264_v17 = vmul.f32 %v3536_v3, %v3261_v63  ;;  %vm3270_vm6 = vweird.f32 %v3536_v3 }
0x10c1   :  { %3537 = vrsqrt.f32 %v3262_v4  ;;  %vm3271_vm10 = vmor %vm3269_vm7, %vm3270_vm6  ;;  %vm3279_vm12 = vweird.f32 %v3262_v4 }
0x10c2   :  { %v3265_v37 = vmul.f32 %v3536_v3, %v3264_v17 }
0x10c4   :  { %v3266_v12 = vmul.f32 0.5, %v3265_v37 }
0x10c6   :  { %v3267_v21 = vsub.f32 1.5, %v3266_v12 }
0x10c7   :  { %v3538_v24 = vpop.eup %3537 }
0x10c8   :  { %v3268_v54 = vmul.f32 %v3536_v3, %v3267_v21  ;;  %v3274_v6 = vmul.f32 %v3538_v24, %v3262_v4  ;;  %vm3280_vm11 = vweird.f32 %v3538_v24 }
0x10c9   :  { %vm3281_vm14 = vmor %vm3279_vm12, %vm3280_vm11 }
0x10ca   :  { %v3272_v50 = vsel %vm3271_vm10, %v3536_v3, %v3268_v54  ;;  %v3275_v28 = vmul.f32 %v3538_v24, %v3274_v6 }
0x10cb   :  { %v3283_v29 = vmul.f32 %v3272_v50, %v3249_v58 }
0x10cc   :  { %v3276_v14 = vmul.f32 0.5, %v3275_v28 }
0x10cd   :  { %v3286_v10 = vmul.f32 %v3451_v59, %v3283_v29 }
0x10ce   :  { %v3277_v13 = vsub.f32 1.5, %v3276_v14 }
0x10cf   :  { %v3289_v20 = vadd.f32 %v3452_v31, %v3286_v10 }
0x10d0   :  { %v3278_v55 = vmul.f32 %v3538_v24, %v3277_v13 }
0x10d1   :  { %3291 = vst.msk [vmem:[#allocation7] sm:$0xff] %vm64_vm0, %v3289_v20 }
0x10d2   :  { %v3282_v8 = vsel %vm3281_vm14, %v3538_v24, %v3278_v55 }
0x10d3   :  { %v3284_v0 = vmul.f32 %v3282_v8, %v3250_v19 }
0x10d5   :  { %v3287_v26 = vmul.f32 %v3451_v59, %v3284_v0 }
0x10d7   :  { %v3290_v34 = vadd.f32 %v3452_v31, %v3287_v26 }
0x10d9   :  { %3292 = vst.msk [vmem:[#allocation7 + $0x8] sm:$0xff] %vm64_vm0, %v3290_v34 }
0x10da   :  { %3305 = dma.vmem_to_hbm [thread:$0]  %s3298_s27, 256, %s3300_s30, [#allocation4], %s3620_s17, %s3620_s17, %s3621_s18  }
0x10db   :  { %3617 = dma.done.wait [#allocation4], 256  }
0x10dc   :  { %3618 = vsyncadd [#allocation4], 4294967040 }
0x10dd   :  { %3310 = vsyncpa [#allocation3], 1 }
0x10de   :  { %3311 = vsyncpa [#allocation6], 1 }
0x10df   :  { %3312 = vsyncpa [#allocation4], 1 }

</bundles_post_ra>
